<compile_context>
chip_gen: v7x
topology: tpu7x:2x2x1
jax: 0.10.0
libtpu: 0.0.40
codegen_flags: <defaults>
</compile_context>

<pallas_src>
import functools
import math

import numpy as np
import jax
import jax.numpy as jnp
from jax import lax
from jax.experimental import pallas as pl
from jax.experimental.pallas import tpu as pltpu

_SQRT_2_OVER_PI = math.sqrt(2.0 / math.pi)

C_DIM = 32                 # transformer_dim
NUM_MULTIMASK = 9
NUM_MASK_TOKENS = NUM_MULTIMASK + 1
IOU_HIDDEN = 64            # iou_head_hidden_dim (small synthetic setting)
NUM_REFINE_ITERS = 1       # module default
H_IMG = W_IMG = 14         # hardcoded by `.view(B, C, 14, 14)` in the module
H_OUT = W_OUT = 4 * H_IMG  # 56 after two ConvTranspose2d(k=2, s=2)
SUB = 16                   # 4x4 sub-pixel positions per 14x14 cell

_VMEM_LIMIT = 32 * 1024 * 1024


def _gelu(x):
    # TODO(synk): PyTorch nn.GELU default is the exact erf formulation; the tanh
    # approximation is used here (Mosaic-safe, max abs err ~1e-3).
    return 0.5 * x * (1.0 + jnp.tanh(_SQRT_2_OVER_PI * (x + 0.044715 * x * x * x)))


def _ln_gelu(z, gamma, beta, eps=1e-5):
    # LayerNorm2d == GroupNorm(1, C): stats over every element of the per-sample block.
    mean = jnp.mean(z, keepdims=True)
    var = jnp.mean(jnp.square(z - mean), keepdims=True)
    zn = (z - mean) * lax.rsqrt(var + eps)
    return _gelu(zn * gamma + beta)


# ----------------------------------------------------------------------------
# Kernel 1: fused upsample path (expanded sub-pixel channels), grid=(B,)
# ----------------------------------------------------------------------------
def _upsample_kernel_guided(src_ref, gde_ref, w1_ref, b1_ref, g1w_ref, g1b_ref,
                            w2_ref, b2_ref, g2w_ref, g2b_ref,
                            wf_ref, wg_ref, bf_ref, o_ref):
    x = src_ref[0]                                                  # (196, C)
    z = jnp.dot(x, w1_ref[...], preferred_element_type=jnp.float32) + b1_ref[...]
    z = _ln_gelu(z, g1w_ref[...], g1b_ref[...])                     # (196, 64)
    z = jnp.dot(z, w2_ref[...], preferred_element_type=jnp.float32) + b2_ref[...]
    z = _ln_gelu(z, g2w_ref[...], g2b_ref[...])                     # (196, 128)
    up = (jnp.dot(z, wf_ref[...], preferred_element_type=jnp.float32)
          + jnp.dot(gde_ref[0], wg_ref[...], preferred_element_type=jnp.float32)
          + bf_ref[...])                                            # (196, 64)
    o_ref[0] = up.astype(o_ref.dtype)


def _upsample_kernel_plain(src_ref, w1_ref, b1_ref, g1w_ref, g1b_ref,
                           w2_ref, b2_ref, g2w_ref, g2b_ref,
                           wf_ref, bf_ref, o_ref):
    x = src_ref[0]
    z = jnp.dot(x, w1_ref[...], preferred_element_type=jnp.float32) + b1_ref[...]
    z = _ln_gelu(z, g1w_ref[...], g1b_ref[...])
    z = jnp.dot(z, w2_ref[...], preferred_element_type=jnp.float32) + b2_ref[...]
    z = _ln_gelu(z, g2w_ref[...], g2b_ref[...])
    up = jnp.dot(z, wf_ref[...], preferred_element_type=jnp.float32) + bf_ref[...]
    o_ref[0] = up.astype(o_ref.dtype)


def _expand_upsample_weights(p, has_guide):
    """Build the expanded sub-pixel-channel weights for the fused upsample kernel."""
    C, Ce = C_DIM, C_DIM // 8
    C2, C4 = C // 2, C // 4

    # convT1: torch weight (Cin, Cout, 2, 2) -> (Cin, Cout*4), channel a = co*4+ky*2+kx
    w1e = p["up1_w"].reshape(C, C2 * 4)
    b1e = jnp.repeat(p["up1_b"], 4)[None, :]
    g1w = jnp.repeat(p["ln1_w"], 4)[None, :]
    g1b = jnp.repeat(p["ln1_b"], 4)[None, :]

    # convT2 in expanded space: input a = ci*4 + ky1*2 + kx1,
    # output c = co*16 + dy*4 + dx with dy = 2*ky1+ky2, dx = 2*kx1+kx2.
    ci, co, ky1, kx1, ky2, kx2 = np.indices((C2, C4, 2, 2, 2, 2))
    a_idx = (ci * 4 + ky1 * 2 + kx1).ravel()
    c_idx = (co * SUB + (2 * ky1 + ky2) * 4 + (2 * kx1 + kx2)).ravel()
    vals = p["up2_w"][ci.ravel(), co.ravel(), ky2.ravel(), kx2.ravel()]
    w2e = jnp.zeros((C2 * 4, C4 * SUB), jnp.float32).at[a_idx, c_idx].set(vals)
    b2e = jnp.repeat(p["up2_b"], SUB)[None, :]
    g2w = jnp.repeat(p["ln2_w"], SUB)[None, :]
    g2b = jnp.repeat(p["ln2_b"], SUB)[None, :]

    # final 1x1 conv (C4 -> Ce): diagonal over the 16 sub-pixel positions.
    co, cf, d = np.indices((C4, Ce, SUB))
    wfe = jnp.zeros((C4 * SUB, Ce * SUB), jnp.float32).at[
        (co * SUB + d).ravel(), (cf * SUB + d).ravel()].set(
        p["final_w"][cf.ravel(), co.ravel(), 0, 0])

    bias = p["final_b"]
    out = dict(w1e=w1e, b1e=b1e, g1w=g1w, g1b=g1b,
               w2e=w2e, b2e=b2e, g2w=g2w, g2b=g2b, wfe=wfe)
    if has_guide:
        cg, cf, d = np.indices((C, Ce, SUB))
        wge = jnp.zeros((C * SUB, Ce * SUB), jnp.float32).at[
            (cg * SUB + d).ravel(), (cf * SUB + d).ravel()].set(
            p["guide_w"][cf.ravel(), cg.ravel(), 0, 0])
        out["wge"] = wge
        bias = bias + p["guide_b"]
    out["bfe"] = jnp.repeat(bias, SUB)[None, :]
    return out


def _expand_guide(guide_matrix, B):
    """Bilinear resize (align_corners=False) + re-layout to the expanded channels."""
    C = C_DIM
    g = jax.image.resize(guide_matrix, (B, C, H_OUT, W_OUT), method="bilinear")
    g = g.reshape(B, C, H_IMG, 4, W_IMG, 4).transpose(0, 2, 4, 1, 3, 5)
    return g.reshape(B, H_IMG * W_IMG, C * SUB)


def _unshuffle(z3e, B):
    """(B, 196, Ce*16) expanded layout -> standard (B, Ce, 56, 56)."""
    Ce = C_DIM // 8
    up = z3e.reshape(B, H_IMG, W_IMG, Ce, 4, 4).transpose(0, 3, 1, 4, 2, 5)
    return up.reshape(B, Ce, H_OUT, W_OUT)


def fused_upsample(src, guide_e, uw):
    B, HW, C = src.shape
    Ce = C_DIM // 8
    has_guide = guide_e is not None

    def shared_spec(a):
        return pl.BlockSpec(a.shape, lambda b: (0, 0))

    in_arrays = [src]
    in_specs = [pl.BlockSpec((1, HW, C), lambda b: (b, 0, 0))]
    if has_guide:
        in_arrays.append(guide_e)
        in_specs.append(pl.BlockSpec((1,) + guide_e.shape[1:], lambda b: (b, 0, 0)))

    w_order = ["w1e", "b1e", "g1w", "g1b", "w2e", "b2e", "g2w", "g2b", "wfe"]
    if has_guide:
        w_order.append("wge")
    w_order.append("bfe")
    for k in w_order:
        in_arrays.append(uw[k])
        in_specs.append(shared_spec(uw[k]))

    kernel = _upsample_kernel_guided if has_guide else _upsample_kernel_plain
    return pl.pallas_call(
        kernel,
        out_shape=jax.ShapeDtypeStruct((B, HW, Ce * SUB), jnp.float32),
        grid=(B,),
        in_specs=in_specs,
        out_specs=pl.BlockSpec((1, HW, Ce * SUB), lambda b: (b, 0, 0)),
        compiler_params=pltpu.CompilerParams(
            dimension_semantics=("parallel",),
            vmem_limit_bytes=_VMEM_LIMIT),
    )(*in_arrays)


# ----------------------------------------------------------------------------
# Kernel 2: hypernetwork MLPs + IoU head + mask generation + one refinement
# ----------------------------------------------------------------------------
def _heads_refine_kernel(up_pad_ref, hs_ref,
                         hw1_ref, hb1_ref, hw2_ref, hb2_ref, hw3_ref, hb3_ref,
                         iw1_ref, ib1_ref, iw2_ref, ib2_ref, iw3_ref, ib3_ref,
                         rw1_ref, rb1_ref, rw2_ref, rb2_ref,
                         masks_ref, iou_ref):
    T = NUM_MASK_TOKENS
    Ce = C_DIM // 8
    H, W = H_OUT, W_OUT

    # ------------------------ IoU prediction head ------------------------
    itok = hs_ref[0, 0:1, :]                                        # (1, C)
    i1 = jnp.maximum(jnp.dot(itok, iw1_ref[...],
                             preferred_element_type=jnp.float32) + ib1_ref[...], 0.0)
    i2 = jnp.maximum(jnp.dot(i1, iw2_ref[...],
                             preferred_element_type=jnp.float32) + ib2_ref[...], 0.0)
    iou = jnp.dot(i2, iw3_ref[...], preferred_element_type=jnp.float32) + ib3_ref[...]
    iou_ref[0] = iou.astype(iou_ref.dtype)

    # ------------- shared refiner conv planes (token independent) -------------
    up_pad = up_pad_ref[0]                                          # (Ce, H+2, W+2)
    shifted = [up_pad[:, ky:ky + H, kx:kx + W]                      # 9 x (Ce, H, W)
               for ky in range(3) for kx in range(3)]
    up = shifted[4]                                                 # unpadded upscaled

    w1c = rw1_ref[...]                                              # (Ce, (1+Ce)*9)
    b1c = rb1_ref[...]                                              # (1, Ce)
    w2c = rw2_ref[...]                                              # (1, Ce)
    b2c = rb2_ref[...]                                              # (1, 1)

    a_planes = []   # conv of the Ce upscaled channels + bias, per refiner out-chan
    c_planes = []   # conv of each upscaled channel with the mask-channel 3x3 kernel
    for co in range(Ce):
        a = jnp.zeros((H, W), jnp.float32) + b1c[:, co:co + 1]
        for cu in range(Ce):
            base = (1 + cu) * 9
            for k in range(9):
                a = a + w1c[co:co + 1, base + k:base + k + 1] * shifted[k][cu]
        a_planes.append(a)
        c = w1c[co:co + 1, 0:1] * shifted[0]
        for k in range(1, 9):
            c = c + w1c[co:co + 1, k:k + 1] * shifted[k]
        c_planes.append(c)                                          # (Ce, H, W)

    # --------------- per-token hypernet MLP + mask + refinement ---------------
    for t in range(T):
        tok = hs_ref[0, 1 + t:2 + t, :]                             # (1, C)
        h = jnp.maximum(jnp.dot(tok, hw1_ref[t],
                                preferred_element_type=jnp.float32) + hb1_ref[t:t + 1, :], 0.0)
        h = jnp.maximum(jnp.dot(h, hw2_ref[t],
                                preferred_element_type=jnp.float32) + hb2_ref[t:t + 1, :], 0.0)
        hyp = jnp.dot(h, hw3_ref[t],
                      preferred_element_type=jnp.float32) + hb3_ref[t:t + 1, :]   # (1, Ce)

        # dynamic mask for this token: sum_cf hyp[cf] * upscaled[cf]
        mask0 = hyp[:, 0:1] * up[0]
        for cf in range(1, Ce):
            mask0 = mask0 + hyp[:, cf:cf + 1] * up[cf]              # (H, W)

        # One refinement iteration.  conv is linear and the incoming mask equals
        # sum_cf hyp[cf]*up[cf], so conv(mask) is recombined from c_planes exactly.
        delta = jnp.zeros((H, W), jnp.float32) + b2c
        for co in range(Ce):
            conv1 = a_planes[co] + hyp[:, 0:1] * c_planes[co][0]
            for cf in range(1, Ce):
                conv1 = conv1 + hyp[:, cf:cf + 1] * c_planes[co][cf]
            delta = delta + w2c[:, co:co + 1] * _gelu(conv1)

        masks_ref[0, t] = (mask0 + delta).astype(masks_ref.dtype)


def _heads_weights(p):
    Ce = C_DIM // 8
    return dict(
        hyp_w1=p["hyp_w1"], hyp_b1=p["hyp_b1"],
        hyp_w2=p["hyp_w2"], hyp_b2=p["hyp_b2"],
        hyp_w3=p["hyp_w3"], hyp_b3=p["hyp_b3"],
        iou_w1=p["iou_w1"], iou_b1=p["iou_b1"][None, :],
        iou_w2=p["iou_w2"], iou_b2=p["iou_b2"][None, :],
        iou_w3=p["iou_w3"], iou_b3=p["iou_b3"][None, :],
        ref_w1=p["ref_w1"].reshape(Ce, (1 + Ce) * 9),
        ref_b1=p["ref_b1"][None, :],
        ref_w2=p["ref_w2"][:, :, 0, 0],
        ref_b2=p["ref_b2"][None, :],
    )


def fused_heads_and_refine(up_pad, hs_dec, hw):
    B = up_pad.shape[0]
    T, Ce = NUM_MASK_TOKENS, C_DIM // 8

    def shared_spec(a):
        if a.ndim == 2:
            return pl.BlockSpec(a.shape, lambda b: (0, 0))
        return pl.BlockSpec(a.shape, lambda b: (0, 0, 0))

    w_order = ["hyp_w1", "hyp_b1", "hyp_w2", "hyp_b2", "hyp_w3", "hyp_b3",
               "iou_w1", "iou_b1", "iou_w2", "iou_b2", "iou_w3", "iou_b3",
               "ref_w1", "ref_b1", "ref_w2", "ref_b2"]
    in_arrays = [up_pad, hs_dec] + [hw[k] for k in w_order]
    in_specs = ([pl.BlockSpec((1, Ce, H_OUT + 2, W_OUT + 2), lambda b: (b, 0, 0, 0)),
                 pl.BlockSpec((1, 1 + T, C_DIM), lambda b: (b, 0, 0))]
                + [shared_spec(hw[k]) for k in w_order])

    masks, iou = pl.pallas_call(
        _heads_refine_kernel,
        out_shape=(jax.ShapeDtypeStruct((B, T, H_OUT, W_OUT), jnp.float32),
                   jax.ShapeDtypeStruct((B, 1, T), jnp.float32)),
        grid=(B,),
        in_specs=in_specs,
        out_specs=(pl.BlockSpec((1, T, H_OUT, W_OUT), lambda b: (b, 0, 0, 0)),
                   pl.BlockSpec((1, 1, T), lambda b: (b, 0, 0))),
        compiler_params=pltpu.CompilerParams(
            dimension_semantics=("parallel",),
            vmem_limit_bytes=_VMEM_LIMIT),
    )(*in_arrays)
    return masks, iou[:, 0, :]


# ----------------------------------------------------------------------------
# Injected transformer dependency (synthetic, plain JAX glue)
# ----------------------------------------------------------------------------
def synthetic_transformer(params, src, pos_src, tokens):
    """Stand-in for the injected `transformer` module.
    src/pos_src: (B, C, H, W); tokens: (B, T, C).
    Returns hs (B, T, C), transformer_output (B, H*W, C), attn."""
    B, C, H, W = src.shape
    src_seq = jnp.transpose((src + pos_src).reshape(B, C, H * W), (0, 2, 1))
    q = tokens @ params["t_wq"]
    k = src_seq @ params["t_wk"]
    v = src_seq @ params["t_wv"]
    scale = 1.0 / jnp.sqrt(jnp.float32(C))
    attn = jax.nn.softmax(q @ jnp.swapaxes(k, 1, 2) * scale, axis=-1)
    hs = tokens + attn @ v
    hs = hs + jax.nn.relu(hs @ params["t_w1"]) @ params["t_w2"]
    attn_img = jax.nn.softmax(k @ jnp.swapaxes(q, 1, 2) * scale, axis=-1)
    transformer_output = src_seq + attn_img @ (hs @ params["t_wv2"])
    return hs, transformer_output, attn_img


# ----------------------------------------------------------------------------
# MaskDecoder forward
# ----------------------------------------------------------------------------
def mask_decoder_forward(params, image_embeddings, image_pe,
                         sparse_prompt_embeddings, dense_prompt_embeddings,
                         guide_matrix=None, multimask_output=True):
    T = NUM_MASK_TOKENS
    B = sparse_prompt_embeddings.shape[0]

    # TODO(synk): the fused refiner is exact only for the first refinement
    # iteration (module default); >1 iterations would need a direct in-kernel
    # 3x3 conv of the refined masks.
    assert NUM_REFINE_ITERS == 1

    output_tokens = jnp.concatenate([params["iou_token"], params["mask_tokens"]], axis=0)
    output_tokens = jnp.broadcast_to(output_tokens[None], (B,) + output_tokens.shape)
    tokens = jnp.concatenate([output_tokens, sparse_prompt_embeddings], axis=1)

    src = image_embeddings + dense_prompt_embeddings
    hs, transformer_output, _ = synthetic_transformer(params, src, image_pe, tokens)
    # transformer_output (B, 196, C) already matches the layout implied by
    # permute(0, 2, 1).view(B, C, 14, 14) in the reference module.

    has_guide = guide_matrix is not None
    uw = _expand_upsample_weights(params, has_guide)
    guide_e = _expand_guide(guide_matrix, B) if has_guide else None

    z3e = fused_upsample(transformer_output, guide_e, uw)           # (B, 196, 64)
    up = _unshuffle(z3e, B)                                         # (B, Ce, 56, 56)
    up_pad = jnp.pad(up, ((0, 0), (0, 0), (1, 1), (1, 1)))          # halo for 3x3 conv

    hs_dec = hs[:, :1 + T, :]                                       # iou + mask tokens
    masks, iou = fused_heads_and_refine(up_pad, hs_dec, _heads_weights(params))

    if multimask_output:
        return masks[:, 1:], iou[:, 1:]
    return masks[:, :1], iou[:, :1]


# ----------------------------------------------------------------------------
# Deterministic parameter initialization (shapes per MaskDecoder.__init__)
# ----------------------------------------------------------------------------
def init_params(key):
    C, T, Ce = C_DIM, NUM_MASK_TOKENS, C_DIM // 8
    keys = iter(jax.random.split(key, 64))

    def nrm(shape, scale=0.05):
        return (scale * jax.random.normal(next(keys), shape)).astype(jnp.float32)

    p = {}
    p["iou_token"] = nrm((1, C))
    p["mask_tokens"] = nrm((T, C))
    p["up1_w"] = nrm((C, C // 2, 2, 2));      p["up1_b"] = nrm((C // 2,))
    p["ln1_w"] = jnp.ones((C // 2,), jnp.float32)
    p["ln1_b"] = jnp.zeros((C // 2,), jnp.float32)
    p["up2_w"] = nrm((C // 2, C // 4, 2, 2)); p["up2_b"] = nrm((C // 4,))
    p["ln2_w"] = jnp.ones((C // 4,), jnp.float32)
    p["ln2_b"] = jnp.zeros((C // 4,), jnp.float32)
    p["final_w"] = nrm((Ce, C // 4, 1, 1));   p["final_b"] = nrm((Ce,))
    p["guide_w"] = nrm((Ce, C, 1, 1));        p["guide_b"] = nrm((Ce,))
    p["hyp_w1"] = nrm((T, C, C));   p["hyp_b1"] = nrm((T, C))
    p["hyp_w2"] = nrm((T, C, C));   p["hyp_b2"] = nrm((T, C))
    p["hyp_w3"] = nrm((T, C, Ce));  p["hyp_b3"] = nrm((T, Ce))
    p["iou_w1"] = nrm((C, IOU_HIDDEN));          p["iou_b1"] = nrm((IOU_HIDDEN,))
    p["iou_w2"] = nrm((IOU_HIDDEN, IOU_HIDDEN)); p["iou_b2"] = nrm((IOU_HIDDEN,))
    p["iou_w3"] = nrm((IOU_HIDDEN, T));          p["iou_b3"] = nrm((T,))
    p["ref_w1"] = nrm((Ce, 1 + Ce, 3, 3));    p["ref_b1"] = nrm((Ce,))
    p["ref_w2"] = nrm((1, Ce, 1, 1));         p["ref_b2"] = nrm((1,))
    # synthetic injected transformer
    p["t_wq"] = nrm((C, C)); p["t_wk"] = nrm((C, C)); p["t_wv"] = nrm((C, C))
    p["t_w1"] = nrm((C, 2 * C)); p["t_w2"] = nrm((2 * C, C)); p["t_wv2"] = nrm((C, C))
    return p


if __name__ == "__main__":
    key = jax.random.PRNGKey(0)
    pk, ik = jax.random.split(key)
    params = init_params(pk)

    B = 2
    ks = jax.random.split(ik, 5)
    image_embeddings = jax.random.normal(ks[0], (B, C_DIM, H_IMG, W_IMG), jnp.float32)
    image_pe = jax.random.normal(ks[1], (B, C_DIM, H_IMG, W_IMG), jnp.float32)
    sparse_prompt_embeddings = jax.random.normal(ks[2], (B, 5, C_DIM), jnp.float32)
    dense_prompt_embeddings = jax.random.normal(ks[3], (B, C_DIM, H_IMG, W_IMG), jnp.float32)
    guide_matrix = jax.random.normal(ks[4], (B, C_DIM, H_IMG, W_IMG), jnp.float32)

    masks, iou_pred = mask_decoder_forward(
        params, image_embeddings, image_pe, sparse_prompt_embeddings,
        dense_prompt_embeddings, guide_matrix, multimask_output=True)
    jax.block_until_ready((masks, iou_pred))

    assert masks.shape == (B, NUM_MULTIMASK, H_OUT, W_OUT), masks.shape
    assert iou_pred.shape == (B, NUM_MULTIMASK), iou_pred.shape
    assert jnp.all(jnp.isfinite(masks)) and jnp.all(jnp.isfinite(iou_pred))
    print("KERNEL_OK")
</pallas_src>

<mosaic_0001>
module attributes {stable_mosaic.version = 11 : i64} {
  func.func @_upsample_kernel_guided(%arg0: i32, %arg1: memref<1x196x32xf32, #tpu.memory_space<vmem>>, %arg2: memref<1x196x512xf32, #tpu.memory_space<vmem>>, %arg3: memref<32x64xf32, #tpu.memory_space<vmem>>, %arg4: memref<1x64xf32, #tpu.memory_space<vmem>>, %arg5: memref<1x64xf32, #tpu.memory_space<vmem>>, %arg6: memref<1x64xf32, #tpu.memory_space<vmem>>, %arg7: memref<64x128xf32, #tpu.memory_space<vmem>>, %arg8: memref<1x128xf32, #tpu.memory_space<vmem>>, %arg9: memref<1x128xf32, #tpu.memory_space<vmem>>, %arg10: memref<1x128xf32, #tpu.memory_space<vmem>>, %arg11: memref<128x64xf32, #tpu.memory_space<vmem>>, %arg12: memref<512x64xf32, #tpu.memory_space<vmem>>, %arg13: memref<1x64xf32, #tpu.memory_space<vmem>>, %arg14: memref<1x196x64xf32, #tpu.memory_space<vmem>>) attributes {dimension_semantics = [#tpu.dimension_semantics<parallel>], iteration_bounds = array<i64: 2>, scalar_prefetch = 0 : i64, scratch_operands = 0 : i64, tpu.core_type = #tpu.core_type<tc>, window_params = [{transform_indices = @transform_0, window_bounds = array<i64: 1, 196, 32>}, {transform_indices = @transform_1, window_bounds = array<i64: 1, 196, 512>}, {pipeline_mode = #tpu.pipeline_mode<synchronous>, transform_indices = @transform_2, window_bounds = array<i64: 32, 64>}, {pipeline_mode = #tpu.pipeline_mode<synchronous>, transform_indices = @transform_3, window_bounds = array<i64: 1, 64>}, {pipeline_mode = #tpu.pipeline_mode<synchronous>, transform_indices = @transform_4, window_bounds = array<i64: 1, 64>}, {pipeline_mode = #tpu.pipeline_mode<synchronous>, transform_indices = @transform_5, window_bounds = array<i64: 1, 64>}, {pipeline_mode = #tpu.pipeline_mode<synchronous>, transform_indices = @transform_6, window_bounds = array<i64: 64, 128>}, {pipeline_mode = #tpu.pipeline_mode<synchronous>, transform_indices = @transform_7, window_bounds = array<i64: 1, 128>}, {pipeline_mode = #tpu.pipeline_mode<synchronous>, transform_indices = @transform_8, window_bounds = array<i64: 1, 128>}, {pipeline_mode = #tpu.pipeline_mode<synchronous>, transform_indices = @transform_9, window_bounds = array<i64: 1, 128>}, {pipeline_mode = #tpu.pipeline_mode<synchronous>, transform_indices = @transform_10, window_bounds = array<i64: 128, 64>}, {pipeline_mode = #tpu.pipeline_mode<synchronous>, transform_indices = @transform_11, window_bounds = array<i64: 512, 64>}, {pipeline_mode = #tpu.pipeline_mode<synchronous>, transform_indices = @transform_12, window_bounds = array<i64: 1, 64>}, {transform_indices = @transform_13, window_bounds = array<i64: 1, 196, 64>}]} {
    %c0 = arith.constant 0 : index
    %c0_0 = arith.constant 0 : index
    %c0_1 = arith.constant 0 : index
    %0 = vector.load %arg1[%c0, %c0_0, %c0_1] : memref<1x196x32xf32, #tpu.memory_space<vmem>>, vector<1x196x32xf32>
    %1 = vector.shape_cast %0 : vector<1x196x32xf32> to vector<196x32xf32>
    %c0_2 = arith.constant 0 : index
    %c0_3 = arith.constant 0 : index
    %2 = vector.load %arg3[%c0_2, %c0_3] : memref<32x64xf32, #tpu.memory_space<vmem>>, vector<32x64xf32>
    %cst = arith.constant dense<0.000000e+00> : vector<196x64xf32>
    %3 = tpu.matmul %1, %2, %cst {dimension_numbers = #tpu.dot_dimension_numbers<[1], [0], [0], [1], [0, 0, 1, 1], [], []>} : vector<196x32xf32>, vector<32x64xf32>, vector<196x64xf32> -> vector<196x64xf32>
    %c0_4 = arith.constant 0 : index
    %c0_5 = arith.constant 0 : index
    %4 = vector.load %arg4[%c0_4, %c0_5] : memref<1x64xf32, #tpu.memory_space<vmem>>, vector<1x64xf32>
    %5 = vector.broadcast %4 : vector<1x64xf32> to vector<196x64xf32>
    %6 = arith.addf %3, %5 : vector<196x64xf32>
    %c0_6 = arith.constant 0 : index
    %c0_7 = arith.constant 0 : index
    %7 = vector.load %arg5[%c0_6, %c0_7] : memref<1x64xf32, #tpu.memory_space<vmem>>, vector<1x64xf32>
    %c0_8 = arith.constant 0 : index
    %c0_9 = arith.constant 0 : index
    %8 = vector.load %arg6[%c0_8, %c0_9] : memref<1x64xf32, #tpu.memory_space<vmem>>, vector<1x64xf32>
    %9 = vector.shape_cast %6 : vector<196x64xf32> to vector<1x196x64xf32>
    %cst_10 = arith.constant dense<0.000000e+00> : vector<1xf32>
    %10 = vector.multi_reduction <add>, %9, %cst_10 [1, 2] : vector<1x196x64xf32> to vector<1xf32>
    %11 = vector.shape_cast %10 : vector<1xf32> to vector<1x1x1xf32>
    %12 = vector.extract %11[0, 0, 0] : f32 from vector<1x1x1xf32>
    %13 = vector.broadcast %12 : f32 to vector<1x1xf32>
    %cst_11 = arith.constant 1.254400e+04 : f32
    %14 = vector.broadcast %cst_11 : f32 to vector<1x1xf32>
    %15 = arith.divf %13, %14 : vector<1x1xf32>
    %16 = vector.broadcast %15 : vector<1x1xf32> to vector<196x64xf32>
    %17 = arith.subf %6, %16 : vector<196x64xf32>
    %18 = arith.mulf %17, %17 : vector<196x64xf32>
    %19 = vector.shape_cast %18 : vector<196x64xf32> to vector<1x196x64xf32>
    %cst_12 = arith.constant dense<0.000000e+00> : vector<1xf32>
    %20 = vector.multi_reduction <add>, %19, %cst_12 [1, 2] : vector<1x196x64xf32> to vector<1xf32>
    %21 = vector.shape_cast %20 : vector<1xf32> to vector<1x1x1xf32>
    %22 = vector.extract %21[0, 0, 0] : f32 from vector<1x1x1xf32>
    %23 = vector.broadcast %22 : f32 to vector<1x1xf32>
    %cst_13 = arith.constant 1.254400e+04 : f32
    %24 = vector.broadcast %cst_13 : f32 to vector<1x1xf32>
    %25 = arith.divf %23, %24 : vector<1x1xf32>
    %26 = vector.broadcast %15 : vector<1x1xf32> to vector<196x64xf32>
    %27 = arith.subf %6, %26 : vector<196x64xf32>
    %cst_14 = arith.constant 9.99999974E-6 : f32
    %28 = vector.broadcast %cst_14 : f32 to vector<1x1xf32>
    %29 = arith.addf %25, %28 : vector<1x1xf32>
    %30 = math.rsqrt %29 : vector<1x1xf32>
    %31 = vector.broadcast %30 : vector<1x1xf32> to vector<196x64xf32>
    %32 = arith.mulf %27, %31 : vector<196x64xf32>
    %33 = vector.broadcast %7 : vector<1x64xf32> to vector<196x64xf32>
    %34 = arith.mulf %32, %33 : vector<196x64xf32>
    %35 = vector.broadcast %8 : vector<1x64xf32> to vector<196x64xf32>
    %36 = arith.addf %34, %35 : vector<196x64xf32>
    %cst_15 = arith.constant 5.000000e-01 : f32
    %37 = vector.broadcast %cst_15 : f32 to vector<196x64xf32>
    %38 = arith.mulf %37, %36 : vector<196x64xf32>
    %cst_16 = arith.constant 4.471500e-02 : f32
    %39 = vector.broadcast %cst_16 : f32 to vector<196x64xf32>
    %40 = arith.mulf %39, %36 : vector<196x64xf32>
    %41 = arith.mulf %40, %36 : vector<196x64xf32>
    %42 = arith.mulf %41, %36 : vector<196x64xf32>
    %43 = arith.addf %36, %42 : vector<196x64xf32>
    %cst_17 = arith.constant 0.797884583 : f32
    %44 = vector.broadcast %cst_17 : f32 to vector<196x64xf32>
    %45 = arith.mulf %44, %43 : vector<196x64xf32>
    %46 = math.tanh %45 : vector<196x64xf32>
    %cst_18 = arith.constant 1.000000e+00 : f32
    %47 = vector.broadcast %cst_18 : f32 to vector<196x64xf32>
    %48 = arith.addf %47, %46 : vector<196x64xf32>
    %49 = arith.mulf %38, %48 : vector<196x64xf32>
    %c0_19 = arith.constant 0 : index
    %c0_20 = arith.constant 0 : index
    %50 = vector.load %arg7[%c0_19, %c0_20] : memref<64x128xf32, #tpu.memory_space<vmem>>, vector<64x128xf32>
    %cst_21 = arith.constant dense<0.000000e+00> : vector<196x128xf32>
    %51 = tpu.matmul %49, %50, %cst_21 {dimension_numbers = #tpu.dot_dimension_numbers<[1], [0], [0], [1], [0, 0, 1, 1], [], []>} : vector<196x64xf32>, vector<64x128xf32>, vector<196x128xf32> -> vector<196x128xf32>
    %c0_22 = arith.constant 0 : index
    %c0_23 = arith.constant 0 : index
    %52 = vector.load %arg8[%c0_22, %c0_23] : memref<1x128xf32, #tpu.memory_space<vmem>>, vector<1x128xf32>
    %53 = vector.broadcast %52 : vector<1x128xf32> to vector<196x128xf32>
    %54 = arith.addf %51, %53 : vector<196x128xf32>
    %c0_24 = arith.constant 0 : index
    %c0_25 = arith.constant 0 : index
    %55 = vector.load %arg9[%c0_24, %c0_25] : memref<1x128xf32, #tpu.memory_space<vmem>>, vector<1x128xf32>
    %c0_26 = arith.constant 0 : index
    %c0_27 = arith.constant 0 : index
    %56 = vector.load %arg10[%c0_26, %c0_27] : memref<1x128xf32, #tpu.memory_space<vmem>>, vector<1x128xf32>
    %57 = vector.shape_cast %54 : vector<196x128xf32> to vector<1x196x128xf32>
    %cst_28 = arith.constant dense<0.000000e+00> : vector<1xf32>
    %58 = vector.multi_reduction <add>, %57, %cst_28 [1, 2] : vector<1x196x128xf32> to vector<1xf32>
    %59 = vector.shape_cast %58 : vector<1xf32> to vector<1x1x1xf32>
    %60 = vector.extract %59[0, 0, 0] : f32 from vector<1x1x1xf32>
    %61 = vector.broadcast %60 : f32 to vector<1x1xf32>
    %cst_29 = arith.constant 2.508800e+04 : f32
    %62 = vector.broadcast %cst_29 : f32 to vector<1x1xf32>
    %63 = arith.divf %61, %62 : vector<1x1xf32>
    %64 = vector.broadcast %63 : vector<1x1xf32> to vector<196x128xf32>
    %65 = arith.subf %54, %64 : vector<196x128xf32>
    %66 = arith.mulf %65, %65 : vector<196x128xf32>
    %67 = vector.shape_cast %66 : vector<196x128xf32> to vector<1x196x128xf32>
    %cst_30 = arith.constant dense<0.000000e+00> : vector<1xf32>
    %68 = vector.multi_reduction <add>, %67, %cst_30 [1, 2] : vector<1x196x128xf32> to vector<1xf32>
    %69 = vector.shape_cast %68 : vector<1xf32> to vector<1x1x1xf32>
    %70 = vector.extract %69[0, 0, 0] : f32 from vector<1x1x1xf32>
    %71 = vector.broadcast %70 : f32 to vector<1x1xf32>
    %cst_31 = arith.constant 2.508800e+04 : f32
    %72 = vector.broadcast %cst_31 : f32 to vector<1x1xf32>
    %73 = arith.divf %71, %72 : vector<1x1xf32>
    %74 = vector.broadcast %63 : vector<1x1xf32> to vector<196x128xf32>
    %75 = arith.subf %54, %74 : vector<196x128xf32>
    %cst_32 = arith.constant 9.99999974E-6 : f32
    %76 = vector.broadcast %cst_32 : f32 to vector<1x1xf32>
    %77 = arith.addf %73, %76 : vector<1x1xf32>
    %78 = math.rsqrt %77 : vector<1x1xf32>
    %79 = vector.broadcast %78 : vector<1x1xf32> to vector<196x128xf32>
    %80 = arith.mulf %75, %79 : vector<196x128xf32>
    %81 = vector.broadcast %55 : vector<1x128xf32> to vector<196x128xf32>
    %82 = arith.mulf %80, %81 : vector<196x128xf32>
    %83 = vector.broadcast %56 : vector<1x128xf32> to vector<196x128xf32>
    %84 = arith.addf %82, %83 : vector<196x128xf32>
    %cst_33 = arith.constant 5.000000e-01 : f32
    %85 = vector.broadcast %cst_33 : f32 to vector<196x128xf32>
    %86 = arith.mulf %85, %84 : vector<196x128xf32>
    %cst_34 = arith.constant 4.471500e-02 : f32
    %87 = vector.broadcast %cst_34 : f32 to vector<196x128xf32>
    %88 = arith.mulf %87, %84 : vector<196x128xf32>
    %89 = arith.mulf %88, %84 : vector<196x128xf32>
    %90 = arith.mulf %89, %84 : vector<196x128xf32>
    %91 = arith.addf %84, %90 : vector<196x128xf32>
    %cst_35 = arith.constant 0.797884583 : f32
    %92 = vector.broadcast %cst_35 : f32 to vector<196x128xf32>
    %93 = arith.mulf %92, %91 : vector<196x128xf32>
    %94 = math.tanh %93 : vector<196x128xf32>
    %cst_36 = arith.constant 1.000000e+00 : f32
    %95 = vector.broadcast %cst_36 : f32 to vector<196x128xf32>
    %96 = arith.addf %95, %94 : vector<196x128xf32>
    %97 = arith.mulf %86, %96 : vector<196x128xf32>
    %c0_37 = arith.constant 0 : index
    %c0_38 = arith.constant 0 : index
    %98 = vector.load %arg11[%c0_37, %c0_38] : memref<128x64xf32, #tpu.memory_space<vmem>>, vector<128x64xf32>
    %cst_39 = arith.constant dense<0.000000e+00> : vector<196x64xf32>
    %99 = tpu.matmul %97, %98, %cst_39 {dimension_numbers = #tpu.dot_dimension_numbers<[1], [0], [0], [1], [0, 0, 1, 1], [], []>} : vector<196x128xf32>, vector<128x64xf32>, vector<196x64xf32> -> vector<196x64xf32>
    %c0_40 = arith.constant 0 : index
    %c0_41 = arith.constant 0 : index
    %c0_42 = arith.constant 0 : index
    %100 = vector.load %arg2[%c0_40, %c0_41, %c0_42] : memref<1x196x512xf32, #tpu.memory_space<vmem>>, vector<1x196x512xf32>
    %101 = vector.shape_cast %100 : vector<1x196x512xf32> to vector<196x512xf32>
    %c0_43 = arith.constant 0 : index
    %c0_44 = arith.constant 0 : index
    %102 = vector.load %arg12[%c0_43, %c0_44] : memref<512x64xf32, #tpu.memory_space<vmem>>, vector<512x64xf32>
    %cst_45 = arith.constant dense<0.000000e+00> : vector<196x64xf32>
    %103 = tpu.matmul %101, %102, %cst_45 {dimension_numbers = #tpu.dot_dimension_numbers<[1], [0], [0], [1], [0, 0, 1, 1], [], []>} : vector<196x512xf32>, vector<512x64xf32>, vector<196x64xf32> -> vector<196x64xf32>
    %104 = arith.addf %99, %103 : vector<196x64xf32>
    %c0_46 = arith.constant 0 : index
    %c0_47 = arith.constant 0 : index
    %105 = vector.load %arg13[%c0_46, %c0_47] : memref<1x64xf32, #tpu.memory_space<vmem>>, vector<1x64xf32>
    %106 = vector.broadcast %105 : vector<1x64xf32> to vector<196x64xf32>
    %107 = arith.addf %104, %106 : vector<196x64xf32>
    %c0_48 = arith.constant 0 : index
    %c0_49 = arith.constant 0 : index
    %c0_50 = arith.constant 0 : index
    %108 = vector.load %arg14[%c0_48, %c0_49, %c0_50] : memref<1x196x64xf32, #tpu.memory_space<vmem>>, vector<1x196x64xf32>
    %109 = vector.shape_cast %108 : vector<1x196x64xf32> to vector<196x64xf32>
    %110 = vector.shape_cast %107 : vector<196x64xf32> to vector<1x196x64xf32>
    tpu.vector_store %arg14[%c0_48, %c0_49, %c0_50], %110 {strides = array<i32>} : memref<1x196x64xf32, #tpu.memory_space<vmem>>, vector<1x196x64xf32>,
    return
  }
  func.func @transform_0(%arg0: i32) -> (i32, i32, i32) {
    %c0_i32 = arith.constant 0 : i32
    %c0_i32_0 = arith.constant 0 : i32
    %c0_i32_1 = arith.constant 0 : i32
    return %arg0, %c0_i32, %c0_i32_0 : i32, i32, i32
  }
  func.func @transform_1(%arg0: i32) -> (i32, i32, i32) {
    %c0_i32 = arith.constant 0 : i32
    %c0_i32_0 = arith.constant 0 : i32
    %c0_i32_1 = arith.constant 0 : i32
    return %arg0, %c0_i32, %c0_i32_0 : i32, i32, i32
  }
  func.func @transform_2(%arg0: i32) -> (i32, i32) {
    %c0_i32 = arith.constant 0 : i32
    %c0_i32_0 = arith.constant 0 : i32
    %c0_i32_1 = arith.constant 0 : i32
    return %c0_i32, %c0_i32_0 : i32, i32
  }
  func.func @transform_3(%arg0: i32) -> (i32, i32) {
    %c0_i32 = arith.constant 0 : i32
    %c0_i32_0 = arith.constant 0 : i32
    %c0_i32_1 = arith.constant 0 : i32
    return %c0_i32, %c0_i32_0 : i32, i32
  }
  func.func @transform_4(%arg0: i32) -> (i32, i32) {
    %c0_i32 = arith.constant 0 : i32
    %c0_i32_0 = arith.constant 0 : i32
    %c0_i32_1 = arith.constant 0 : i32
    return %c0_i32, %c0_i32_0 : i32, i32
  }
  func.func @transform_5(%arg0: i32) -> (i32, i32) {
    %c0_i32 = arith.constant 0 : i32
    %c0_i32_0 = arith.constant 0 : i32
    %c0_i32_1 = arith.constant 0 : i32
    return %c0_i32, %c0_i32_0 : i32, i32
  }
  func.func @transform_6(%arg0: i32) -> (i32, i32) {
    %c0_i32 = arith.constant 0 : i32
    %c0_i32_0 = arith.constant 0 : i32
    %c0_i32_1 = arith.constant 0 : i32
    return %c0_i32, %c0_i32_0 : i32, i32
  }
  func.func @transform_7(%arg0: i32) -> (i32, i32) {
    %c0_i32 = arith.constant 0 : i32
    %c0_i32_0 = arith.constant 0 : i32
    %c0_i32_1 = arith.constant 0 : i32
    return %c0_i32, %c0_i32_0 : i32, i32
  }
  func.func @transform_8(%arg0: i32) -> (i32, i32) {
    %c0_i32 = arith.constant 0 : i32
    %c0_i32_0 = arith.constant 0 : i32
    %c0_i32_1 = arith.constant 0 : i32
    return %c0_i32, %c0_i32_0 : i32, i32
  }
  func.func @transform_9(%arg0: i32) -> (i32, i32) {
    %c0_i32 = arith.constant 0 : i32
    %c0_i32_0 = arith.constant 0 : i32
    %c0_i32_1 = arith.constant 0 : i32
    return %c0_i32, %c0_i32_0 : i32, i32
  }
  func.func @transform_10(%arg0: i32) -> (i32, i32) {
    %c0_i32 = arith.constant 0 : i32
    %c0_i32_0 = arith.constant 0 : i32
    %c0_i32_1 = arith.constant 0 : i32
    return %c0_i32, %c0_i32_0 : i32, i32
  }
  func.func @transform_11(%arg0: i32) -> (i32, i32) {
    %c0_i32 = arith.constant 0 : i32
    %c0_i32_0 = arith.constant 0 : i32
    %c0_i32_1 = arith.constant 0 : i32
    return %c0_i32, %c0_i32_0 : i32, i32
  }
  func.func @transform_12(%arg0: i32) -> (i32, i32) {
    %c0_i32 = arith.constant 0 : i32
    %c0_i32_0 = arith.constant 0 : i32
    %c0_i32_1 = arith.constant 0 : i32
    return %c0_i32, %c0_i32_0 : i32, i32
  }
  func.func @transform_13(%arg0: i32) -> (i32, i32, i32) {
    %c0_i32 = arith.constant 0 : i32
    %c0_i32_0 = arith.constant 0 : i32
    %c0_i32_1 = arith.constant 0 : i32
    return %arg0, %c0_i32, %c0_i32_0 : i32, i32, i32
  }
}

</mosaic_0001>

<bundles_post_ra>
// kernel: tpu_custom_call.1
= control target key start
LH: loop header
LB: loop body
LE: loop exit
PB: predicated region body
PF: predicated region fallthrough
CT: control target
= control target key end

     0   :  { %s3657_s25 = smov 0   ;;  %s5728_s0 = inlined_call_operand.vmem [shape: f32[2,196,32], index: 0, kind: input, shape index: {}]   ;;  %s5729_s1 = inlined_call_operand.vmem [shape: f32[2,196,512], index: 1, kind: input, shape index: {}]   ;;  %s5730_s2 = inlined_call_operand.vmem [shape: f32[32,64], index: 2, kind: input, shape index: {}]   ;;  %s5731_s3 = inlined_call_operand.vmem [shape: f32[1,64], index: 3, kind: input, shape index: {}]   ;;  %s5732_s4 = inlined_call_operand.vmem [shape: f32[1,64], index: 4, kind: input, shape index: {}]   ;;  %s5733_s5 = inlined_call_operand.vmem [shape: f32[1,64], index: 5, kind: input, shape index: {}]   ;;  %s5734_s6 = inlined_call_operand.vmem [shape: f32[64,128], index: 6, kind: input, shape index: {}]   ;;  %s5735_s7 = inlined_call_operand.vmem [shape: f32[1,128], index: 7, kind: input, shape index: {}]   ;;  %s5736_s8 = inlined_call_operand.vmem [shape: f32[1,128], index: 8, kind: input, shape index: {}]   ;;  %s5737_s9 = inlined_call_operand.vmem [shape: f32[1,128], index: 9, kind: input, shape index: {}]   ;;  %s5738_s10 = inlined_call_operand.vmem [shape: f32[128,64], index: 10, kind: input, shape index: {}]   ;;  %s5739_s11 = inlined_call_operand.vmem [shape: f32[512,64], index: 11, kind: input, shape index: {}]   ;;  %s5740_s12 = inlined_call_operand.vmem [shape: f32[1,64], index: 12, kind: input, shape index: {}]   ;;  %s5741_s13 = inlined_call_operand.vmem [shape: f32[2,196,64], index: 13, kind: output, shape index: {}]  }
   0x1 LB: > { %s2846_s26 = sadd.s32 4294967295, %s3582_s25   ;;  %p2850_p0 = scmp.ge.s32.totalorder %s3582_s25, 1  ;;  %s3582_s25 = sphi %s3657_s25, %s23_s25  }
   0x2   : > { %p397_p1 = scmp.lt.s32.totalorder %s3582_s25, 3 }
   0x4   : > { %p398_p2 = pnand %p2850_p0, %p397_p1 }
   0x5   : > { %v486_v0 = vld [vmem:[%s5730_s2] sm:$0xff] (!%p398_p2)  ;;  %v487_v1 = vld [vmem:[%s5730_s2 + $0x8] sm:$0xff] (!%p398_p2)  ;;  %v488_v2 = vld [vmem:[%s5730_s2 + $0x10] sm:$0xff] (!%p398_p2)  ;;  %v3584_v3 = vmov (!%p398_p2), 0.0|0.0   ;;  %vm3585_vm0 = vmmov (!%p398_p2), 0   ;;  %v3586_v6 = vmov (!%p398_p2), 0.0  }
   0x6   : > { %401 = sbr.rel (%p398_p2) target bundleno = 1945 (0x799), region = 72  ;;  %3297 = vmatprep.subr.bf16.mxu0 (!%p398_p2), %v3584_v3  ;;  %v3298_v4 = vpack.c.bf16 (!%p398_p2), %v487_v1, %v486_v0  ;;  %v489_v5 = vld [vmem:[%s5730_s2 + $0x18] sm:$0xff] (!%p398_p2)  ;;  %3024 = vmatprep.mubr.msk.f32.mxu0 (!%p398_p2), %vm3585_vm0, %v3586_v6  ;;  %p446_p3 = scmp.lt.s32.totalorder (!%p398_p2), %s2846_s26, 1  ;;  %vm497_vm1 = vcmask (!%p398_p2), 261120   ;;  %v3796_v57 = vld [vmem:[%s5731_s3] ss:$0 sm:$0xff] (!%p398_p2) }
   0x7   : > { %3303 = vmatprep.subr.bf16.mxu1 (!%p398_p2), %v3584_v3  ;;  %3115 = vmatprep.mubr.msk.f32.mxu1 (!%p398_p2), %vm3585_vm0, %v3586_v6  ;;  %v3301_v7 = vpack.c.bf16 (!%p398_p2), %v489_v5, %v488_v2  ;;  %vm765_vm2 = vcmask (!%p398_p2), 523264   ;;  %vm813_vm3 = vcmask (!%p398_p2), 519168   ;;  %vm1557_vm4 = vcmask (!%p398_p2), 1043456  }
   0x8   : > { %3299 = vmatpush3.bf16.msra.mxu0 (!%p398_p2), %v3298_v4 }
   0x9   : > { %3300 = vmatprep.subr.bf16.mxu0 (!%p398_p2), %v3584_v3 }
   0xc   : > { %3302 = vmatpush3.bf16.msra.mxu0 (!%p398_p2), %v3301_v7 }
   0xd   : > { %s5743_s26 = smov (!%p446_p3, %s2846_s26), 1  ;;  %3315 = vmatprep.subr.bf16.mxu0 %v3584_v3 }
   0xe   : > { %s3451_s18 = smul.u32 200, %s5743_s26 }
   0xf   : > { %s3452_s27 = smul.u32 800, %s5743_s26 }
  0x10   : > { %s3692_s21 = scalar_lea.vmem %s5728_s0, %s3451_s18  ;;  %s5624_s14 = scalar_lea.vmem %s5741_s13, %s3451_s18 }
  0x11   : > { %v461_v8 = vld [vmem:[%s3692_s21] sm:$0xff]  ;;  %v462_v9 = vld [vmem:[%s3692_s21 + $0x8] sm:$0xff]  ;;  %v463_v10 = vld [vmem:[%s3692_s21 + $0x10] sm:$0xff]  ;;  %s4947_s30 = scalar_lea.vmem %s5729_s1, %s3452_s27 }
  0x12   : > { %3025 = vmatmul.mubr.msk.f32.vlgmr.msra.gmra.mrb[0].mxu0 %vm497_vm1, %v461_v8  ;;  %v464_v11 = vld [vmem:[%s3692_s21 + $0x18] sm:$0xff]  ;;  %v465_v12 = vld [vmem:[%s3692_s21 + $0x20] sm:$0xff]  ;;  %v466_v13 = vld [vmem:[%s3692_s21 + $0x28] sm:$0xff] }
  0x13   : > { %3027 = vmatprep.mubr.msk.f32.mxu0 %vm3585_vm0, %v3586_v6  ;;  %v467_v14 = vld [vmem:[%s3692_s21 + $0x30] sm:$0xff]  ;;  %v468_v15 = vld [vmem:[%s3692_s21 + $0x38] sm:$0xff]  ;;  %v469_v16 = vld [vmem:[%s3692_s21 + $0x40] sm:$0xff] }
  0x14   : > { %v470_v17 = vld [vmem:[%s3692_s21 + $0x48] sm:$0xff]  ;;  %v471_v18 = vld [vmem:[%s3692_s21 + $0x50] sm:$0xff]  ;;  %v472_v19 = vld [vmem:[%s3692_s21 + $0x58] sm:$0xff] }
  0x15   : > { %v473_v20 = vld [vmem:[%s3692_s21 + $0x60] sm:$0xff]  ;;  %v474_v21 = vld [vmem:[%s3692_s21 + $0x68] sm:$0xff]  ;;  %v475_v22 = vld [vmem:[%s3692_s21 + $0x70] sm:$0xff] }
  0x16   : > { %3028 = vmatmul.mubr.msk.f32.gmra.mrb[2].mxu0 %vm497_vm1, %v462_v9  ;;  %v476_v23 = vld [vmem:[%s3692_s21 + $0x78] sm:$0xff]  ;;  %v477_v24 = vld [vmem:[%s3692_s21 + $0x80] sm:$0xff]  ;;  %v478_v25 = vld [vmem:[%s3692_s21 + $0x88] sm:$0xff] }
  0x17   : > { %3030 = vmatprep.mubr.msk.f32.mxu0 %vm3585_vm0, %v3586_v6  ;;  %v479_v26 = vld [vmem:[%s3692_s21 + $0x90] sm:$0xff]  ;;  %v480_v27 = vld [vmem:[%s3692_s21 + $0x98] sm:$0xff]  ;;  %v481_v28 = vld [vmem:[%s3692_s21 + $0xa0] sm:$0xff] }
  0x18   : > { %v482_v29 = vld [vmem:[%s3692_s21 + $0xa8] sm:$0xff]  ;;  %v483_v30 = vld [vmem:[%s3692_s21 + $0xb0] sm:$0xff]  ;;  %v484_v31 = vld [vmem:[%s3692_s21 + $0xb8] sm:$0xff] }
  0x19   : > { %v485_v32 = vld [vmem:[%s3692_s21 + $0xc0] sm:$0xf] }
  0x1a   : > { %3031 = vmatmul.mubr.msk.f32.gmra.mrb[4].mxu0 %vm497_vm1, %v463_v10 }
  0x1b   : > { %3033 = vmatprep.mubr.msk.f32.mxu0 %vm3585_vm0, %v3586_v6 }
  0x1e   : > { %3034 = vmatmul.mubr.msk.f32.gmra.mrb[6].mxu0 %vm497_vm1, %v464_v11 }
  0x1f   : > { %3036 = vmatprep.mubr.msk.f32.mxu0 %vm3585_vm0, %v3586_v6 }
  0x22   : > { %3037 = vmatmul.mubr.msk.f32.gmra.mrb[8].mxu0 %vm497_vm1, %v465_v12 }
  0x23   : > { %3039 = vmatprep.mubr.msk.f32.mxu0 %vm3585_vm0, %v3586_v6 }
  0x26   : > { %3040 = vmatmul.mubr.msk.f32.gmra.mrb[10].mxu0 %vm497_vm1, %v466_v13 }
  0x27   : > { %3042 = vmatprep.mubr.msk.f32.mxu0 %vm3585_vm0, %v3586_v6 }
  0x2a   : > { %3043 = vmatmul.mubr.msk.f32.gmra.mrb[12].mxu0 %vm497_vm1, %v467_v14 }
  0x2b   : > { %3045 = vmatprep.mubr.msk.f32.mxu0 %vm3585_vm0, %v3586_v6 }
  0x2e   : > { %3046 = vmatmul.mubr.msk.f32.gmra.mrb[14].mxu0 %vm497_vm1, %v468_v15 }
  0x2f   : > { %3048 = vmatprep.mubr.msk.f32.mxu0 %vm3585_vm0, %v3586_v6 }
  0x32   : > { %3049 = vmatmul.mubr.msk.f32.gmra.mrb[16].mxu0 %vm497_vm1, %v469_v16 }
  0x33   : > { %3051 = vmatprep.mubr.msk.f32.mxu0 %vm3585_vm0, %v3586_v6 }
  0x36   : > { %3052 = vmatmul.mubr.msk.f32.gmra.mrb[18].mxu0 %vm497_vm1, %v470_v17 }
  0x37   : > { %3054 = vmatprep.mubr.msk.f32.mxu0 %vm3585_vm0, %v3586_v6 }
  0x3a   : > { %3055 = vmatmul.mubr.msk.f32.gmra.mrb[20].mxu0 %vm497_vm1, %v471_v18 }
  0x3b   : > { %3057 = vmatprep.mubr.msk.f32.mxu0 %vm3585_vm0, %v3586_v6 }
  0x3e   : > { %3058 = vmatmul.mubr.msk.f32.gmra.mrb[22].mxu0 %vm497_vm1, %v472_v19 }
  0x3f   : > { %3060 = vmatprep.mubr.msk.f32.mxu0 %vm3585_vm0, %v3586_v6 }
  0x42   : > { %3061 = vmatmul.mubr.msk.f32.gmra.mrb[24].mxu0 %vm497_vm1, %v473_v20 }
  0x43   : > { %3063 = vmatprep.mubr.msk.f32.mxu0 %vm3585_vm0, %v3586_v6 }
  0x46   : > { %3064 = vmatmul.mubr.msk.f32.gmra.mrb[26].mxu0 %vm497_vm1, %v474_v21 }
  0x47   : > { %3066 = vmatprep.mubr.msk.f32.mxu0 %vm3585_vm0, %v3586_v6 }
  0x4a   : > { %3067 = vmatmul.mubr.msk.f32.gmra.mrb[28].mxu0 %vm497_vm1, %v475_v22 }
  0x4b   : > { %3069 = vmatprep.mubr.msk.f32.mxu0 %vm3585_vm0, %v3586_v6 }
  0x4e   : > { %3070 = vmatmul.mubr.msk.f32.gmra.mrb[30].mxu0 %vm497_vm1, %v476_v23 }
  0x4f   : > { %3072 = vmatprep.mubr.msk.f32.mxu0 %vm3585_vm0, %v3586_v6 }
  0x52   : > { %3073 = vmatmul.mubr.msk.f32.gmra.mrb[32].mxu0 %vm497_vm1, %v477_v24 }
  0x53   : > { %3075 = vmatprep.mubr.msk.f32.mxu0 %vm3585_vm0, %v3586_v6 }
  0x56   : > { %3076 = vmatmul.mubr.msk.f32.gmra.mrb[34].mxu0 %vm497_vm1, %v478_v25 }
  0x57   : > { %3078 = vmatprep.mubr.msk.f32.mxu0 %vm3585_vm0, %v3586_v6 }
  0x5a   : > { %3079 = vmatmul.mubr.msk.f32.gmra.mrb[36].mxu0 %vm497_vm1, %v479_v26 }
  0x5b   : > { %3081 = vmatprep.mubr.msk.f32.mxu0 %vm3585_vm0, %v3586_v6 }
  0x5e   : > { %3082 = vmatmul.mubr.msk.f32.gmra.mrb[38].mxu0 %vm497_vm1, %v480_v27 }
  0x5f   : > { %3084 = vmatprep.mubr.msk.f32.mxu0 %vm3585_vm0, %v3586_v6 }
  0x62   : > { %3085 = vmatmul.mubr.msk.f32.gmra.mrb[40].mxu0 %vm497_vm1, %v481_v28 }
  0x63   : > { %3087 = vmatprep.mubr.msk.f32.mxu0 %vm3585_vm0, %v3586_v6 }
  0x66   : > { %3088 = vmatmul.mubr.msk.f32.gmra.mrb[42].mxu0 %vm497_vm1, %v482_v29 }
  0x67   : > { %3090 = vmatprep.mubr.msk.f32.mxu0 %vm3585_vm0, %v3586_v6 }
  0x6a   : > { %3091 = vmatmul.mubr.msk.f32.gmra.mrb[44].mxu0 %vm497_vm1, %v483_v30 }
  0x6b   : > { %3093 = vmatprep.mubr.msk.f32.mxu0 %vm3585_vm0, %v3586_v6 }
  0x6e   : > { %3094 = vmatmul.mubr.msk.f32.gmra.mrb[46].mxu0 %vm497_vm1, %v484_v31 }
  0x6f   : > { %3096 = vmatprep.mubr.msk.f32.mxu0 %vm3585_vm0, %v3586_v6 }
  0x72   : > { %3097 = vmatmul.mubr.msk.f32.gmra.mrb[48].mxu0 %vm497_vm1, %v485_v32 }
  0xe5   : > { %v639_v33 = vpop.f32.mrb[0].mxu0 }
  0xe6   : > { %v3026_v34 = vpop.f32.mrb[1].mxu0  ;;  %v3802_v60 = vadd.f32 %v3796_v57, %v639_v33 }
  0xe8   : > { %v766_v2 = vsel %vm765_vm2, %v3802_v60, 0.0 }
  0xe9   : > { %v644_v35 = vpop.f32.mrb[2].mxu0 }
  0xea   : > { %v3029_v36 = vpop.f32.mrb[3].mxu0  ;;  %v3799_v58 = vadd.f32 %v3796_v57, %v644_v35 }
  0xec   : > { %v767_v63 = vsel %vm765_vm2, %v3799_v58, 0.0 }
  0xed   : > { %v649_v37 = vpop.f32.mrb[4].mxu0  ;;  %v768_v8 = vadd.f32 %v767_v63, %v766_v2 }
  0xee   : > { %v3032_v38 = vpop.f32.mrb[5].mxu0  ;;  %v3805_v61 = vadd.f32 %v3796_v57, %v649_v37 }
  0xf0   : > { %v769_v4 = vsel %vm765_vm2, %v3805_v61, 0.0 }
  0xf1   : > { %v654_v39 = vpop.f32.mrb[6].mxu0  ;;  %v770_v11 = vadd.f32 %v769_v4, %v768_v8 }
  0xf2   : > { %v3035_v40 = vpop.f32.mrb[7].mxu0  ;;  %v3810_v0 = vadd.f32 %v3796_v57, %v654_v39 }
  0xf4   : > { %v771_v9 = vsel %vm765_vm2, %v3810_v0, 0.0 }
  0xf5   : > { %v659_v41 = vpop.f32.mrb[8].mxu0  ;;  %v772_v16 = vadd.f32 %v771_v9, %v770_v11 }
  0xf6   : > { %v3038_v42 = vpop.f32.mrb[9].mxu0  ;;  %v3817_v5 = vadd.f32 %v3796_v57, %v659_v41 }
  0xf8   : > { %v773_v13 = vsel %vm765_vm2, %v3817_v5, 0.0 }
  0xf9   : > { %v664_v43 = vpop.f32.mrb[10].mxu0  ;;  %v774_v19 = vadd.f32 %v773_v13, %v772_v16 }
  0xfa   : > { %v3041_v44 = vpop.f32.mrb[11].mxu0  ;;  %v3822_v10 = vadd.f32 %v3796_v57, %v664_v43 }
  0xfc   : > { %v775_v17 = vsel %vm765_vm2, %v3822_v10, 0.0 }
  0xfd   : > { %v669_v45 = vpop.f32.mrb[12].mxu0  ;;  %v776_v24 = vadd.f32 %v775_v17, %v774_v19 }
  0xfe   : > { %v3044_v46 = vpop.f32.mrb[13].mxu0  ;;  %v3827_v14 = vadd.f32 %v3796_v57, %v669_v45 }
 0x100   : > { %v777_v21 = vsel %vm765_vm2, %v3827_v14, 0.0 }
 0x101   : > { %v674_v47 = vpop.f32.mrb[14].mxu0  ;;  %v778_v27 = vadd.f32 %v777_v21, %v776_v24 }
 0x102   : > { %v3047_v48 = vpop.f32.mrb[15].mxu0  ;;  %v3832_v18 = vadd.f32 %v3796_v57, %v674_v47 }
 0x104   : > { %v779_v25 = vsel %vm765_vm2, %v3832_v18, 0.0 }
 0x105   : > { %v679_v49 = vpop.f32.mrb[16].mxu0  ;;  %v780_v32 = vadd.f32 %v779_v25, %v778_v27 }
 0x106   : > { %v3050_v50 = vpop.f32.mrb[17].mxu0  ;;  %v3837_v22 = vadd.f32 %v3796_v57, %v679_v49 }
 0x108   : > { %v781_v29 = vsel %vm765_vm2, %v3837_v22, 0.0 }
 0x109   : > { %v684_v51 = vpop.f32.mrb[18].mxu0  ;;  %v782_v35 = vadd.f32 %v781_v29, %v780_v32 }
 0x10a   : > { %v3053_v52 = vpop.f32.mrb[19].mxu0  ;;  %v3842_v26 = vadd.f32 %v3796_v57, %v684_v51 }
 0x10c   : > { %v783_v33 = vsel %vm765_vm2, %v3842_v26, 0.0 }
 0x10d   : > { %v689_v53 = vpop.f32.mrb[20].mxu0  ;;  %v784_v40 = vadd.f32 %v783_v33, %v782_v35 }
 0x10e   : > { %v3056_v54 = vpop.f32.mrb[21].mxu0  ;;  %v3847_v30 = vadd.f32 %v3796_v57, %v689_v53 }
 0x110   : > { %v785_v37 = vsel %vm765_vm2, %v3847_v30, 0.0 }
 0x111   : > { %v694_v55 = vpop.f32.mrb[22].mxu0  ;;  %v786_v43 = vadd.f32 %v785_v37, %v784_v40 }
 0x112   : > { %v3059_v56 = vpop.f32.mrb[23].mxu0  ;;  %v3852_v34 = vadd.f32 %v3796_v57, %v694_v55 }
 0x114   : > { %v787_v41 = vsel %vm765_vm2, %v3852_v34, 0.0 }
 0x115   : > { %v699_v59 = vpop.f32.mrb[24].mxu0  ;;  %v788_v48 = vadd.f32 %v787_v41, %v786_v43 }
 0x116   : > { %v3062_v62 = vpop.f32.mrb[25].mxu0  ;;  %v3857_v38 = vadd.f32 %v3796_v57, %v699_v59 }
 0x118   : > { %v789_v45 = vsel %vm765_vm2, %v3857_v38, 0.0 }
 0x119   : > { %v704_v1 = vpop.f32.mrb[26].mxu0  ;;  %v790_v51 = vadd.f32 %v789_v45, %v788_v48 }
 0x11a   : > { %v3065_v7 = vpop.f32.mrb[27].mxu0  ;;  %v3862_v42 = vadd.f32 %v3796_v57, %v704_v1 }
 0x11c   : > { %v791_v49 = vsel %vm765_vm2, %v3862_v42, 0.0 }
 0x11d   : > { %v709_v12 = vpop.f32.mrb[28].mxu0  ;;  %v792_v56 = vadd.f32 %v791_v49, %v790_v51 }
 0x11e   : > { %v3068_v15 = vpop.f32.mrb[29].mxu0  ;;  %v3867_v46 = vadd.f32 %v3796_v57, %v709_v12 }
 0x120   : > { %v793_v53 = vsel %vm765_vm2, %v3867_v46, 0.0 }
 0x121   : > { %v714_v20 = vpop.f32.mrb[30].mxu0  ;;  %v794_v63 = vadd.f32 %v793_v53, %v792_v56 }
 0x122   : > { %v3071_v23 = vpop.f32.mrb[31].mxu0  ;;  %v3872_v50 = vadd.f32 %v3796_v57, %v714_v20 }
 0x124   : > { %v795_v59 = vsel %vm765_vm2, %v3872_v50, 0.0 }
 0x125   : > { %v719_v28 = vpop.f32.mrb[32].mxu0  ;;  %v796_v8 = vadd.f32 %v795_v59, %v794_v63 }
 0x126   : > { %v3074_v31 = vpop.f32.mrb[33].mxu0  ;;  %v3877_v54 = vadd.f32 %v3796_v57, %v719_v28 }
 0x128   : > { %v797_v2 = vsel %vm765_vm2, %v3877_v54, 0.0 }
 0x129   : > { %v724_v36 = vpop.f32.mrb[34].mxu0  ;;  %v798_v12 = vadd.f32 %v797_v2, %v796_v8 }
 0x12a   : > { %v3077_v39 = vpop.f32.mrb[35].mxu0  ;;  %v3882_v62 = vadd.f32 %v3796_v57, %v724_v36 }
 0x12c   : > { %v799_v9 = vsel %vm765_vm2, %v3882_v62, 0.0 }
 0x12d   : > { %v729_v44 = vpop.f32.mrb[36].mxu0  ;;  %v800_v19 = vadd.f32 %v799_v9, %v798_v12 }
 0x12e   : > { %v3080_v47 = vpop.f32.mrb[37].mxu0  ;;  %v3887_v4 = vadd.f32 %v3796_v57, %v729_v44 }
 0x130   : > { %v801_v15 = vsel %vm765_vm2, %v3887_v4, 0.0 }
 0x131   : > { %v734_v52 = vpop.f32.mrb[38].mxu0  ;;  %v802_v23 = vadd.f32 %v801_v15, %v800_v19 }
 0x132   : > { %v3083_v55 = vpop.f32.mrb[39].mxu0  ;;  %v3892_v11 = vadd.f32 %v3796_v57, %v734_v52 }
 0x134   : > { %v803_v20 = vsel %vm765_vm2, %v3892_v11, 0.0 }
 0x135   : > { %v739_v1 = vpop.f32.mrb[40].mxu0  ;;  %v804_v29 = vadd.f32 %v803_v20, %v802_v23 }
 0x136   : > { %v3086_v7 = vpop.f32.mrb[41].mxu0  ;;  %v3897_v16 = vadd.f32 %v3796_v57, %v739_v1 }
 0x138   : > { %v805_v25 = vsel %vm765_vm2, %v3897_v16, 0.0 }
 0x139   : > { %v744_v13 = vpop.f32.mrb[42].mxu0  ;;  %v806_v32 = vadd.f32 %v805_v25, %v804_v29 }
 0x13a   : > { %v3089_v17 = vpop.f32.mrb[43].mxu0  ;;  %v3902_v21 = vadd.f32 %v3796_v57, %v744_v13 }
 0x13c   : > { %v807_v31 = vsel %vm765_vm2, %v3902_v21, 0.0 }
 0x13d   : > { %v749_v24 = vpop.f32.mrb[44].mxu0  ;;  %v808_v39 = vadd.f32 %v807_v31, %v806_v32 }
 0x13e   : > { %v3907_v27 = vadd.f32 %v3796_v57, %v749_v24  ;;  %v3092_v28 = vpop.f32.mrb[45].mxu0 }
 0x140   : > { %v809_v35 = vsel %vm765_vm2, %v3907_v27, 0.0 }
 0x141   : > { %v754_v33 = vpop.f32.mrb[46].mxu0  ;;  %v810_v41 = vadd.f32 %v809_v35, %v808_v39 }
 0x142   : > { %v3914_v36 = vadd.f32 %v3796_v57, %v754_v33  ;;  %v3095_v37 = vpop.f32.mrb[47].mxu0 }
 0x144   : > { %v811_v40 = vsel %vm765_vm2, %v3914_v36, 0.0 }
 0x145   : > { %v759_v43 = vpop.f32.mrb[48].mxu0  ;;  %v812_v47 = vadd.f32 %v811_v40, %v810_v41 }
 0x146   : > { %v3919_v44 = vadd.f32 %v3796_v57, %v759_v43  ;;  %v3098_v45 = vpop.f32.mrb[49].mxu0 }
 0x148   : > { %v814_v48 = vsel %vm813_vm3, %v3919_v44, 0.0 }
 0x149   : > { %v815_v49 = vadd.f32 %v814_v48, %v812_v47 }
 0x14b   : > { %816 = vadd.xlane.f32.xlu0 %v815_v49 }
 0x1d8   : > { %v817_v51 = vpop.xlane.xlu0 %816 }
 0x1d9   : > { %v818_v52 = vrot.slane %v817_v51, 4 }
 0x1db   : > { %v819_v53 = vadd.f32 %v818_v52, %v817_v51 }
 0x1dd   : > { %v820_v55 = vrot.slane %v819_v53, 2 }
 0x1df   : > { %v821_v56 = vadd.f32 %v820_v55, %v819_v53 }
 0x1e1   : > { %v822_v59 = vrot.slane %v821_v56, 1 }
 0x1e3   : > { %v823_v63 = vadd.f32 %v822_v59, %v821_v56 }
 0x1e5   : > { %3453 = vpush %v823_v63 }
 0x216   : > { %s3454_s24 = spop %3453 }
 0x217   : > { %v825_v1 = vstv %s3454_s24 }
 0x218   : > { %v3923_v2 = vmul.f32 7.9719386e-05, %v825_v1 }
 0x21a   : > { %v3927_v57 = vsub.f32 %v3802_v60, %v3923_v2  ;;  %v3931_v7 = vsub.f32 %v3799_v58, %v3923_v2  ;;  %v3935_v8 = vsub.f32 %v3805_v61, %v3923_v2  ;;  %v3939_v9 = vsub.f32 %v3810_v0, %v3923_v2 }
 0x21b   : > { %v3947_v60 = vsub.f32 %v3817_v5, %v3923_v2  ;;  %v3953_v61 = vsub.f32 %v3822_v10, %v3923_v2  ;;  %v3961_v20 = vsub.f32 %v3827_v14, %v3923_v2  ;;  %v3968_v10 = vsub.f32 %v3832_v18, %v3923_v2 }
 0x21c   : > { %v853_v12 = vmul.f32 %v3927_v57, %v3927_v57  ;;  %v854_v13 = vmul.f32 %v3931_v7, %v3931_v7  ;;  %v855_v58 = vmul.f32 %v3935_v8, %v3935_v8  ;;  %v856_v0 = vmul.f32 %v3939_v9, %v3939_v9 }
 0x21d   : > { %v857_v5 = vmul.f32 %v3947_v60, %v3947_v60  ;;  %v858_v25 = vmul.f32 %v3953_v61, %v3953_v61  ;;  %v3975_v14 = vsub.f32 %v3837_v22, %v3923_v2  ;;  %v859_v31 = vmul.f32 %v3961_v20, %v3961_v20 }
 0x21e   : > { %v878_v15 = vsel %vm765_vm2, %v853_v12, 0.0  ;;  %v879_v17 = vsel %vm765_vm2, %v854_v13, 0.0  ;;  %v881_v23 = vsel %vm765_vm2, %v855_v58, 0.0  ;;  %v883_v28 = vsel %vm765_vm2, %v856_v0, 0.0 }
 0x21f   : > { %v880_v19 = vadd.f32 %v879_v17, %v878_v15  ;;  %v885_v32 = vsel %vm765_vm2, %v857_v5, 0.0  ;;  %v3982_v18 = vsub.f32 %v3842_v26, %v3923_v2  ;;  %v860_v35 = vmul.f32 %v3968_v10, %v3968_v10 }
 0x220   : > { %v887_v37 = vsel %vm765_vm2, %v858_v25, 0.0  ;;  %v3989_v22 = vsub.f32 %v3847_v30, %v3923_v2  ;;  %v861_v40 = vmul.f32 %v3975_v14, %v3975_v14  ;;  %v889_v41 = vsel %vm765_vm2, %v859_v31, 0.0 }
 0x221   : > { %v882_v24 = vadd.f32 %v881_v23, %v880_v19  ;;  %v3996_v26 = vsub.f32 %v3852_v34, %v3923_v2  ;;  %v862_v45 = vmul.f32 %v3982_v18, %v3982_v18  ;;  %v891_v47 = vsel %vm765_vm2, %v860_v35, 0.0 }
 0x222   : > { %v4003_v30 = vsub.f32 %v3857_v38, %v3923_v2  ;;  %v863_v49 = vmul.f32 %v3989_v22, %v3989_v22  ;;  %v893_v51 = vsel %vm765_vm2, %v861_v40, 0.0  ;;  %v4010_v34 = vsub.f32 %v3862_v42, %v3923_v2 }
 0x223   : > { %v884_v29 = vadd.f32 %v883_v28, %v882_v24  ;;  %v864_v53 = vmul.f32 %v3996_v26, %v3996_v26  ;;  %v895_v55 = vsel %vm765_vm2, %v862_v45, 0.0  ;;  %v4017_v38 = vsub.f32 %v3867_v46, %v3923_v2 }
 0x224   : > { %v865_v59 = vmul.f32 %v4003_v30, %v4003_v30  ;;  %v897_v63 = vsel %vm765_vm2, %v863_v49, 0.0  ;;  %v4024_v42 = vsub.f32 %v3872_v50, %v3923_v2  ;;  %v866_v12 = vmul.f32 %v4010_v34, %v4010_v34 }
 0x225   : > { %v886_v33 = vadd.f32 %v885_v32, %v884_v29  ;;  %v899_v13 = vsel %vm765_vm2, %v864_v53, 0.0  ;;  %v4031_v46 = vsub.f32 %v3877_v54, %v3923_v2  ;;  %v867_v0 = vmul.f32 %v4017_v38, %v4017_v38 }
 0x226   : > { %v901_v15 = vsel %vm765_vm2, %v865_v59, 0.0  ;;  %v4038_v50 = vsub.f32 %v3882_v62, %v3923_v2  ;;  %v868_v19 = vmul.f32 %v4024_v42, %v4024_v42  ;;  %v903_v5 = vsel %vm765_vm2, %v866_v12, 0.0 }
 0x227   : > { %v888_v39 = vadd.f32 %v887_v37, %v886_v33  ;;  %v4045_v54 = vsub.f32 %v3887_v4, %v3923_v2  ;;  %v869_v24 = vmul.f32 %v4031_v46, %v4031_v46  ;;  %v905_v25 = vsel %vm765_vm2, %v867_v0, 0.0  ;;  %v1252_v0 = vld [vmem:[%s5734_s6] sm:$0xff] }
 0x228   : > { %v4052_v62 = vsub.f32 %v3892_v11, %v3923_v2  ;;  %v870_v29 = vmul.f32 %v4038_v50, %v4038_v50  ;;  %v907_v31 = vsel %vm765_vm2, %v868_v19, 0.0  ;;  %v4059_v4 = vsub.f32 %v3897_v16, %v3923_v2 }
 0x229   : > { %v890_v43 = vadd.f32 %v889_v41, %v888_v39  ;;  %v871_v33 = vmul.f32 %v4045_v54, %v4045_v54  ;;  %v909_v35 = vsel %vm765_vm2, %v869_v24, 0.0  ;;  %v4066_v11 = vsub.f32 %v3902_v21, %v3923_v2  ;;  %v1256_v24 = vld [vmem:[%s5734_s6 + $0x20] sm:$0xff] }
 0x22a   : > { %v872_v39 = vmul.f32 %v4052_v62, %v4052_v62  ;;  %v911_v40 = vsel %vm765_vm2, %v870_v29, 0.0  ;;  %v4073_v16 = vsub.f32 %v3907_v27, %v3923_v2  ;;  %v4080_v21 = vsub.f32 %v3914_v36, %v3923_v2  ;;  %v1258_v29 = vld [vmem:[%s5734_s6 + $0x30] sm:$0xff] }
 0x22b   : > { %v892_v48 = vadd.f32 %v891_v47, %v890_v43  ;;  %v873_v43 = vmul.f32 %v4059_v4, %v4059_v4  ;;  %v913_v45 = vsel %vm765_vm2, %v871_v33, 0.0  ;;  %v4087_v27 = vsub.f32 %v3919_v44, %v3923_v2 }
 0x22c   : > { %v915_v49 = vsel %vm765_vm2, %v872_v39, 0.0  ;;  %v876_v36 = vmul.f32 %v4080_v21, %v4080_v21 }
 0x22d   : > { %v894_v52 = vadd.f32 %v893_v51, %v892_v48  ;;  %v874_v48 = vmul.f32 %v4066_v11, %v4066_v11  ;;  %v917_v53 = vsel %vm765_vm2, %v873_v43, 0.0 }
 0x22e   : > { %v923_v44 = vsel %vm765_vm2, %v876_v36, 0.0 }
 0x22f   : > { %v896_v56 = vadd.f32 %v895_v55, %v894_v52  ;;  %v875_v52 = vmul.f32 %v4073_v16, %v4073_v16 }
 0x231   : > { %v898_v1 = vadd.f32 %v897_v63, %v896_v56  ;;  %v919_v56 = vsel %vm765_vm2, %v874_v48, 0.0  ;;  %v877_v63 = vmul.f32 %v4087_v27, %v4087_v27 }
 0x233   : > { %v900_v58 = vadd.f32 %v899_v13, %v898_v1  ;;  %v921_v1 = vsel %vm765_vm2, %v875_v52, 0.0  ;;  %v925_v13 = vsel %vm813_vm3, %v877_v63, 0.0 }
 0x235   : > { %v902_v17 = vadd.f32 %v901_v15, %v900_v58  ;;  %v1253_v15 = vld [vmem:[%s5734_s6 + $0x8] sm:$0xff] }
 0x236   : > { %v3304_v19 = vpack.c.bf16 %v1253_v15, %v1252_v0 }
 0x237   : > { %v904_v23 = vadd.f32 %v903_v5, %v902_v17  ;;  %v1254_v17 = vld [vmem:[%s5734_s6 + $0x10] sm:$0xff]  ;;  %v1255_v5 = vld [vmem:[%s5734_s6 + $0x18] sm:$0xff] }
 0x238   : > { %3305 = vmatpush3.bf16.msra.mxu1 %v3304_v19 }
 0x239   : > { %v906_v28 = vadd.f32 %v905_v25, %v904_v23  ;;  %v3307_v23 = vpack.c.bf16 %v1255_v5, %v1254_v17  ;;  %3306 = vmatprep.subr.bf16.mxu1 %v3584_v3  ;;  %v1257_v25 = vld [vmem:[%s5734_s6 + $0x28] sm:$0xff] }
 0x23b   : > { %v908_v32 = vadd.f32 %v907_v31, %v906_v28  ;;  %v3310_v28 = vpack.c.bf16 %v1257_v25, %v1256_v24  ;;  %v1259_v31 = vld [vmem:[%s5734_s6 + $0x38] sm:$0xff] }
 0x23c   : > { %3308 = vmatpush3.bf16.msra.mxu1 %v3307_v23 }
 0x23d   : > { %v910_v37 = vadd.f32 %v909_v35, %v908_v32  ;;  %3309 = vmatprep.subr.bf16.mxu1 %v3584_v3  ;;  %v3313_v32 = vpack.c.bf16 %v1259_v31, %v1258_v29 }
 0x23f   : > { %v912_v41 = vadd.f32 %v911_v40, %v910_v37 }
 0x240   : > { %3311 = vmatpush3.bf16.msra.mxu1 %v3310_v28 }
 0x241   : > { %v914_v47 = vadd.f32 %v913_v45, %v912_v41  ;;  %3312 = vmatprep.subr.bf16.mxu1 %v3584_v3 }
 0x243   : > { %v916_v51 = vadd.f32 %v915_v49, %v914_v47 }
 0x244   : > { %3314 = vmatpush3.bf16.msra.mxu1 %v3313_v32 }
 0x245   : > { %v918_v55 = vadd.f32 %v917_v53, %v916_v51  ;;  %3363 = vmatprep.subr.bf16.mxu1 %v3584_v3  ;;  %v4133_v51 = vld [vmem:[%s5732_s4] ss:$0 sm:$0xff] }
 0x247   : > { %v920_v59 = vadd.f32 %v919_v56, %v918_v55  ;;  %v4146_v56 = vld [vmem:[%s5733_s5] ss:$0 sm:$0xff] }
 0x249   : > { %v922_v12 = vadd.f32 %v921_v1, %v920_v59 }
 0x24b   : > { %v924_v2 = vadd.f32 %v923_v44, %v922_v12 }
 0x24d   : > { %v926_v58 = vadd.f32 %v925_v13, %v924_v2 }
 0x24f   : > { %927 = vadd.xlane.f32.xlu0 %v926_v58 }
 0x2dc   : > { %v928_v33 = vpop.xlane.xlu0 %927 }
 0x2dd   : > { %v929_v35 = vrot.slane %v928_v33, 4 }
 0x2df   : > { %v930_v37 = vadd.f32 %v929_v35, %v928_v33 }
 0x2e1   : > { %v931_v39 = vrot.slane %v930_v37, 2 }
 0x2e3   : > { %v932_v40 = vadd.f32 %v931_v39, %v930_v37 }
 0x2e5   : > { %v933_v41 = vrot.slane %v932_v40, 1 }
 0x2e7   : > { %v934_v43 = vadd.f32 %v933_v41, %v932_v40 }
 0x2e9   : > { %3455 = vpush %v934_v43 }
 0x31a   : > { %s3456_s29 = spop %3455 }
 0x31b   : > { %v936_v45 = vstv %s3456_s29 }
 0x31c   : > { %v937_v47 = vmul.f32 7.9719386e-05, %v936_v45 }
 0x31e   : > { %v938_v48 = vadd.f32 1e-05, %v937_v47 }
 0x320   : > { %3472 = vrsqrt.f32 %v938_v48 }
 0x32a   : > { %v4128_v49 = vpop.eup %3472 }
 0x32b   : > { %v940_v52 = vmul.f32 %v4128_v49, %v3927_v57  ;;  %v941_v53 = vmul.f32 %v4128_v49, %v3931_v7  ;;  %v942_v55 = vmul.f32 %v4128_v49, %v3935_v8  ;;  %v943_v36 = vmul.f32 %v4128_v49, %v3939_v9 }
 0x32c   : > { %v944_v59 = vmul.f32 %v4128_v49, %v3947_v60  ;;  %v945_v57 = vmul.f32 %v4128_v49, %v3953_v61  ;;  %v946_v7 = vmul.f32 %v4128_v49, %v3961_v20  ;;  %v947_v60 = vmul.f32 %v4128_v49, %v3968_v10 }
 0x32d   : > { %v971_v63 = vmul.f32 %v4133_v51, %v940_v52  ;;  %v972_v8 = vmul.f32 %v4133_v51, %v941_v53  ;;  %v973_v9 = vmul.f32 %v4133_v51, %v942_v55  ;;  %v974_v1 = vmul.f32 %v4133_v51, %v943_v36 }
 0x32e   : > { %v975_v12 = vmul.f32 %v4133_v51, %v944_v59  ;;  %v976_v44 = vmul.f32 %v4133_v51, %v945_v57  ;;  %v977_v17 = vmul.f32 %v4133_v51, %v946_v7  ;;  %v978_v28 = vmul.f32 %v4133_v51, %v947_v60 }
 0x32f   : > { %v1002_v61 = vadd.f32 %v4146_v56, %v971_v63  ;;  %v4164_v2 = vadd.f32 %v4146_v56, %v972_v8  ;;  %v4167_v20 = vadd.f32 %v4146_v56, %v973_v9  ;;  %v4170_v13 = vadd.f32 %v4146_v56, %v974_v1 }
 0x330   : > { %v4173_v58 = vadd.f32 %v4146_v56, %v975_v12  ;;  %v4180_v5 = vadd.f32 %v4146_v56, %v976_v44  ;;  %v4189_v35 = vadd.f32 %v4146_v56, %v977_v17  ;;  %v4197_v47 = vadd.f32 %v4146_v56, %v978_v28 }
 0x331   : > { %v1052_v0 = vmul.f32 0.044715, %v1002_v61  ;;  %v1053_v15 = vmul.f32 0.044715, %v4164_v2  ;;  %v1054_v10 = vmul.f32 0.044715, %v4167_v20  ;;  %v948_v8 = vmul.f32 %v4128_v49, %v3975_v14 }
 0x332   : > { %v1055_v19 = vmul.f32 0.044715, %v4170_v13  ;;  %v1056_v25 = vmul.f32 0.044715, %v4173_v58  ;;  %v1057_v41 = vmul.f32 0.044715, %v4180_v5  ;;  %v949_v9 = vmul.f32 %v4128_v49, %v3982_v18 }
 0x333   : > { %v1077_v23 = vmul.f32 %v1052_v0, %v1002_v61  ;;  %v1078_v24 = vmul.f32 %v1053_v15, %v4164_v2  ;;  %v1079_v29 = vmul.f32 %v1054_v10, %v4167_v20  ;;  %v1058_v57 = vmul.f32 0.044715, %v4189_v35 }
 0x334   : > { %v1080_v31 = vmul.f32 %v1055_v19, %v4170_v13  ;;  %v1081_v40 = vmul.f32 %v1056_v25, %v4173_v58  ;;  %v1082_v59 = vmul.f32 %v1057_v41, %v4180_v5  ;;  %v1059_v63 = vmul.f32 0.044715, %v4197_v47 }
 0x335   : > { %v1102_v32 = vmul.f32 %v1077_v23, %v1002_v61  ;;  %v1103_v33 = vmul.f32 %v1078_v24, %v4164_v2  ;;  %v1104_v37 = vmul.f32 %v1079_v29, %v4167_v20  ;;  %v979_v1 = vmul.f32 %v4133_v51, %v948_v8 }
 0x336   : > { %v1105_v39 = vmul.f32 %v1080_v31, %v4170_v13  ;;  %v1106_v36 = vmul.f32 %v1081_v40, %v4173_v58  ;;  %v950_v12 = vmul.f32 %v4128_v49, %v3989_v22  ;;  %v1107_v60 = vmul.f32 %v1082_v59, %v4180_v5 }
 0x337   : > { %v1127_v43 = vadd.f32 %v1102_v32, %v1002_v61  ;;  %v1128_v45 = vadd.f32 %v1103_v33, %v4164_v2  ;;  %v1129_v48 = vadd.f32 %v1104_v37, %v4167_v20  ;;  %v1083_v0 = vmul.f32 %v1058_v57, %v4189_v35 }
 0x338   : > { %v1130_v55 = vadd.f32 %v1105_v39, %v4170_v13  ;;  %v1131_v44 = vadd.f32 %v1106_v36, %v4173_v58  ;;  %v980_v15 = vmul.f32 %v4133_v51, %v949_v9  ;;  %v1084_v14 = vmul.f32 %v1059_v63, %v4197_v47 }
 0x339   : > { %v1152_v52 = vmul.f32 0.7978846, %v1127_v43  ;;  %v1153_v53 = vmul.f32 0.7978846, %v1128_v45  ;;  %v1154_v7 = vmul.f32 0.7978846, %v1129_v48  ;;  %v4218_v10 = vadd.f32 %v4146_v56, %v979_v1 }
 0x33a   : > { %v1155_v17 = vmul.f32 0.7978846, %v1130_v55  ;;  %v951_v18 = vmul.f32 %v4128_v49, %v3996_v26  ;;  %v4223_v22 = vadd.f32 %v4146_v56, %v980_v15  ;;  %v981_v19 = vmul.f32 %v4133_v51, %v950_v12 }
 0x33b   : > { %3474 = vtanh.f32 %v1152_v52  ;;  %v1108_v23 = vmul.f32 %v1083_v0, %v4189_v35  ;;  %v1060_v24 = vmul.f32 0.044715, %v4218_v10  ;;  %v1156_v25 = vmul.f32 0.7978846, %v1131_v44 }
 0x33c   : > { %3476 = vtanh.f32 %v1153_v53  ;;  %v1132_v28 = vadd.f32 %v1107_v60, %v4180_v5  ;;  %v1109_v29 = vmul.f32 %v1084_v14, %v4197_v47  ;;  %v982_v31 = vmul.f32 %v4133_v51, %v951_v18 }
 0x33d   : > { %3478 = vtanh.f32 %v1154_v7  ;;  %v1027_v33 = vmul.f32 0.5, %v1002_v61  ;;  %v1061_v26 = vmul.f32 0.044715, %v4223_v22  ;;  %v4233_v37 = vadd.f32 %v4146_v56, %v981_v19 }
 0x33e   : > { %3480 = vtanh.f32 %v1155_v17  ;;  %v1133_v41 = vadd.f32 %v1108_v23, %v4189_v35  ;;  %v1085_v43 = vmul.f32 %v1060_v24, %v4218_v10  ;;  %v952_v45 = vmul.f32 %v4128_v49, %v4003_v30 }
 0x33f   : > { %3482 = vtanh.f32 %v1156_v25  ;;  %v1157_v48 = vmul.f32 0.7978846, %v1132_v28  ;;  %v1134_v52 = vadd.f32 %v1109_v29, %v4197_v47  ;;  %v4241_v55 = vadd.f32 %v4146_v56, %v982_v31 }
 0x340   : > { %v1028_v59 = vmul.f32 0.5, %v4164_v2  ;;  %v1086_v57 = vmul.f32 %v1061_v26, %v4223_v22  ;;  %v1062_v7 = vmul.f32 0.044715, %v4233_v37  ;;  %v1158_v63 = vmul.f32 0.7978846, %v1133_v41 }
 0x341   : > { %v1110_v30 = vmul.f32 %v1085_v43, %v4218_v10  ;;  %v983_v8 = vmul.f32 %v4133_v51, %v952_v45  ;;  %v953_v9 = vmul.f32 %v4128_v49, %v4010_v34  ;;  %3484 = vtanh.f32 %v1157_v48 }
 0x342   : > { %v1159_v1 = vmul.f32 0.7978846, %v1134_v52  ;;  %v1063_v44 = vmul.f32 0.044715, %v4241_v55  ;;  %v1029_v0 = vmul.f32 0.5, %v4167_v20  ;;  %v1111_v15 = vmul.f32 %v1086_v57, %v4223_v22 }
 0x343   : > { %v1087_v17 = vmul.f32 %v1062_v7, %v4233_v37  ;;  %3486 = vtanh.f32 %v1158_v63  ;;  %v1135_v34 = vadd.f32 %v1110_v30, %v4218_v10  ;;  %v4260_v14 = vadd.f32 %v4146_v56, %v983_v8 }
 0x344   : > { %v984_v18 = vmul.f32 %v4133_v51, %v953_v9  ;;  %v1030_v19 = vmul.f32 0.5, %v4170_v13  ;;  %3488 = vtanh.f32 %v1159_v1  ;;  %v954_v20 = vmul.f32 %v4128_v49, %v4017_v38 }
 0x345   : > { %v3475_v32 = vpop.eup %3474  ;;  %v1088_v25 = vmul.f32 %v1063_v44, %v4241_v55  ;;  %v956_v28 = vmul.f32 %v4128_v49, %v4031_v46  ;;  %v1136_v31 = vadd.f32 %v1111_v15, %v4223_v22  ;;  %v958_v13 = vmul.f32 %v4128_v49, %v4045_v54 }
 0x346   : > { %v3477_v39 = vpop.eup %3476  ;;  %v1202_v40 = vadd.f32 1.0, %v3475_v32  ;;  %v1112_v32 = vmul.f32 %v1087_v17, %v4233_v37  ;;  %v1160_v38 = vmul.f32 0.7978846, %v1135_v34  ;;  %v1064_v26 = vmul.f32 0.044715, %v4260_v14 }
 0x347   : > { %v1203_v61 = vadd.f32 1.0, %v3477_v39  ;;  %v3479_v36 = vpop.eup %3478  ;;  %v4280_v39 = vadd.f32 %v4146_v56, %v984_v18  ;;  %v987_v46 = vmul.f32 %v4133_v51, %v956_v28  ;;  %v989_v41 = vmul.f32 %v4133_v51, %v958_v13 }
 0x348   : > { %v1227_v53 = vmul.f32 %v1202_v40, %v1027_v33  ;;  %v1204_v12 = vadd.f32 1.0, %v3479_v36  ;;  %v3481_v60 = vpop.eup %3480  ;;  %v957_v33 = vmul.f32 %v4128_v49, %v4038_v50  ;;  %v985_v40 = vmul.f32 %v4133_v51, %v954_v20 }
 0x349   : > { %v1228_v2 = vmul.f32 %v1203_v61, %v1028_v59  ;;  %v1205_v24 = vadd.f32 1.0, %v3481_v60  ;;  %v3483_v29 = vpop.eup %3482  ;;  %v955_v50 = vmul.f32 %v4128_v49, %v4024_v42  ;;  %v4291_v48 = vadd.f32 %v4146_v56, %v987_v46 }
 0x34a   : > { %3116 = vmatmul.mubr.msk.f32.vlgmr.msra.gmra.mrb[0].mxu1 %vm765_vm2, %v1227_v53  ;;  %v1229_v23 = vmul.f32 %v1204_v12, %v1029_v0  ;;  %v988_v54 = vmul.f32 %v4133_v51, %v957_v33  ;;  %v1206_v45 = vadd.f32 1.0, %v3483_v29  ;;  %v1137_v53 = vadd.f32 %v1112_v32, %v4233_v37 }
 0x34b   : > { %3118 = vmatprep.mubr.msk.f32.mxu1 %vm3585_vm0, %v3586_v6  ;;  %v1230_v43 = vmul.f32 %v1205_v24, %v1030_v19  ;;  %v3485_v52 = vpop.eup %3484  ;;  %v1113_v61 = vmul.f32 %v1088_v25, %v4241_v55  ;;  %v4299_v59 = vadd.f32 %v4146_v56, %v989_v41  ;;  %v1031_v42 = vmul.f32 0.5, %v4173_v58 }
 0x34c   : > { %v4296_v36 = vadd.f32 %v4146_v56, %v988_v54  ;;  %v1089_v57 = vmul.f32 %v1064_v26, %v4260_v14  ;;  %v1065_v7 = vmul.f32 0.044715, %v4280_v39  ;;  %3490 = vtanh.f32 %v1160_v38 }
 0x34d   : > { %v1161_v63 = vmul.f32 0.7978846, %v1136_v31  ;;  %v4308_v30 = vadd.f32 %v4146_v56, %v985_v40  ;;  %v986_v8 = vmul.f32 %v4133_v51, %v955_v50  ;;  %v3487_v9 = vpop.eup %3486  ;;  %v1231_v1 = vmul.f32 %v1206_v45, %v1031_v42 }
 0x34e   : > { %3119 = vmatmul.mubr.msk.f32.gmra.mrb[2].mxu1 %vm765_vm2, %v1228_v2  ;;  %v1207_v2 = vadd.f32 1.0, %v3485_v52  ;;  %v3489_v12 = vpop.eup %3488  ;;  %v1162_v44 = vmul.f32 0.7978846, %v1137_v53  ;;  %v1138_v58 = vadd.f32 %v1113_v61, %v4241_v55  ;;  %v959_v60 = vmul.f32 %v4128_v49, %v4052_v62 }
 0x34f   : > { %3121 = vmatprep.mubr.msk.f32.mxu1 %vm3585_vm0, %v3586_v6  ;;  %v1032_v0 = vmul.f32 0.5, %v4180_v5  ;;  %v1114_v15 = vmul.f32 %v1089_v57, %v4260_v14  ;;  %v1090_v17 = vmul.f32 %v1065_v7, %v4280_v39  ;;  %3492 = vtanh.f32 %v1161_v63 }
 0x350   : > { %v1066_v34 = vmul.f32 0.044715, %v4308_v30  ;;  %v4322_v18 = vadd.f32 %v4146_v56, %v986_v8  ;;  %v1033_v62 = vmul.f32 0.5, %v4189_v35  ;;  %v1208_v20 = vadd.f32 1.0, %v3487_v9 }
 0x351   : > { %v1232_v19 = vmul.f32 %v1207_v2, %v1032_v0  ;;  %3494 = vtanh.f32 %v1162_v44  ;;  %v990_v5 = vmul.f32 %v4133_v51, %v959_v60  ;;  %v960_v24 = vmul.f32 %v4128_v49, %v4059_v4 }
 0x352   : > { %3122 = vmatmul.mubr.msk.f32.gmra.mrb[4].mxu1 %vm765_vm2, %v1229_v23  ;;  %v1163_v23 = vmul.f32 0.7978846, %v1138_v58  ;;  %v1139_v25 = vadd.f32 %v1114_v15, %v4260_v14  ;;  %v1115_v28 = vmul.f32 %v1090_v17, %v4280_v39  ;;  %v961_v29 = vmul.f32 %v4128_v49, %v4066_v11 }
 0x353   : > { %3124 = vmatprep.mubr.msk.f32.mxu1 %vm3585_vm0, %v3586_v6  ;;  %v962_v35 = vmul.f32 %v4128_v49, %v4073_v16  ;;  %v1091_v31 = vmul.f32 %v1066_v34, %v4308_v30  ;;  %v1067_v32 = vmul.f32 0.044715, %v4322_v18  ;;  %v4340_v4 = vadd.f32 %v4146_v56, %v990_v5 }
 0x354   : > { %v991_v33 = vmul.f32 %v4133_v51, %v960_v24  ;;  %v1233_v13 = vmul.f32 %v1208_v20, %v1033_v62  ;;  %v1209_v38 = vadd.f32 1.0, %v3489_v12  ;;  %v992_v26 = vmul.f32 %v4133_v51, %v961_v29 }
 0x355   : > { %v993_v11 = vmul.f32 %v4133_v51, %v962_v35  ;;  %v1034_v16 = vmul.f32 0.5, %v4197_v47  ;;  %3496 = vtanh.f32 %v1163_v23  ;;  %v1164_v40 = vmul.f32 0.7978846, %v1139_v25 }
 0x356   : > { %3125 = vmatmul.mubr.msk.f32.gmra.mrb[6].mxu1 %vm765_vm2, %v1230_v43  ;;  %v3491_v46 = vpop.eup %3490  ;;  %v1140_v50 = vadd.f32 %v1115_v28, %v4280_v39  ;;  %v4349_v54 = vadd.f32 %v4146_v56, %v991_v33  ;;  %v4352_v41 = vadd.f32 %v4146_v56, %v992_v26  ;;  %v1116_v43 = vmul.f32 %v1091_v31, %v4308_v30 }
 0x357   : > { %3127 = vmatprep.mubr.msk.f32.mxu1 %vm3585_vm0, %v3586_v6  ;;  %v1092_v45 = vmul.f32 %v1067_v32, %v4322_v18  ;;  %v1068_v47 = vmul.f32 0.044715, %v4291_v48  ;;  %v4360_v52 = vadd.f32 %v4146_v56, %v993_v11  ;;  %v1234_v53 = vmul.f32 %v1209_v38, %v1034_v16 }
 0x358   : > { %v1210_v61 = vadd.f32 1.0, %v3491_v46  ;;  %v1035_v57 = vmul.f32 0.5, %v4218_v10  ;;  %3498 = vtanh.f32 %v1164_v40  ;;  %v1165_v7 = vmul.f32 0.7978846, %v1140_v50 }
 0x359   : > { %v3493_v42 = vpop.eup %3492  ;;  %v1141_v8 = vadd.f32 %v1116_v43, %v4308_v30  ;;  %v1117_v9 = vmul.f32 %v1092_v45, %v4322_v18  ;;  %v1069_v2 = vmul.f32 0.044715, %v4296_v36  ;;  %v963_v58 = vmul.f32 %v4128_v49, %v4080_v21 }
 0x35a   : > { %3128 = vmatmul.mubr.msk.f32.gmra.mrb[8].mxu1 %vm765_vm2, %v1231_v1  ;;  %v1093_v1 = vmul.f32 %v1068_v47, %v4291_v48  ;;  %v1235_v12 = vmul.f32 %v1210_v61, %v1035_v57  ;;  %v1211_v44 = vadd.f32 1.0, %v3493_v42  ;;  %v964_v10 = vmul.f32 %v4128_v49, %v4087_v27 }
 0x35b   : > { %3130 = vmatprep.mubr.msk.f32.mxu1 %vm3585_vm0, %v3586_v6  ;;  %v3495_v63 = vpop.eup %3494  ;;  %v1036_v60 = vmul.f32 0.5, %v4223_v22  ;;  %3500 = vtanh.f32 %v1165_v7  ;;  %v1070_v0 = vmul.f32 0.044715, %v4299_v59  ;;  %v994_v15 = vmul.f32 %v4133_v51, %v963_v58 }
 0x35c   : > { %v995_v17 = vmul.f32 %v4133_v51, %v964_v10  ;;  %v1142_v21 = vadd.f32 %v1117_v9, %v4322_v18  ;;  %v1118_v27 = vmul.f32 %v1093_v1, %v4291_v48  ;;  %v1094_v49 = vmul.f32 %v1069_v2, %v4296_v36 }
 0x35d   : > { %v1236_v22 = vmul.f32 %v1211_v44, %v1036_v60  ;;  %v1212_v62 = vadd.f32 1.0, %v3495_v63  ;;  %v4385_v20 = vadd.f32 %v4146_v56, %v994_v15  ;;  %v1037_v51 = vmul.f32 0.5, %v4233_v37 }
 0x35e   : > { %3131 = vmatmul.mubr.msk.f32.gmra.mrb[10].mxu1 %vm765_vm2, %v1232_v19  ;;  %v1166_v19 = vmul.f32 0.7978846, %v1141_v8  ;;  %v4388_v23 = vadd.f32 %v4146_v56, %v995_v17  ;;  %v1095_v5 = vmul.f32 %v1070_v0, %v4299_v59  ;;  %v1071_v24 = vmul.f32 0.044715, %v4340_v4 }
 0x35f   : > { %3133 = vmatprep.mubr.msk.f32.mxu1 %vm3585_vm0, %v3586_v6  ;;  %v3497_v34 = vpop.eup %3496  ;;  %v1167_v25 = vmul.f32 0.7978846, %v1142_v21  ;;  %v1143_v28 = vadd.f32 %v1118_v27, %v4291_v48  ;;  %v1119_v29 = vmul.f32 %v1094_v49, %v4296_v36  ;;  %v1237_v56 = vmul.f32 %v1212_v62, %v1037_v51 }
 0x360   : > { %3502 = vtanh.f32 %v1166_v19  ;;  %v1213_v31 = vadd.f32 1.0, %v3497_v34  ;;  %v1038_v37 = vmul.f32 0.5, %v4241_v55  ;;  %v1120_v32 = vmul.f32 %v1095_v5, %v4299_v59 }
 0x361   : > { %v1096_v33 = vmul.f32 %v1071_v24, %v4340_v4  ;;  %3504 = vtanh.f32 %v1167_v25  ;;  %v1144_v38 = vadd.f32 %v1119_v29, %v4296_v36  ;;  %v1072_v26 = vmul.f32 0.044715, %v4349_v54 }
 0x362   : > { %3134 = vmatmul.mubr.msk.f32.gmra.mrb[12].mxu1 %vm765_vm2, %v1233_v13  ;;  %v3499_v35 = vpop.eup %3498  ;;  %v1168_v13 = vmul.f32 0.7978846, %v1143_v28  ;;  %v1238_v46 = vmul.f32 %v1213_v31, %v1038_v37  ;;  %v1039_v55 = vmul.f32 0.5, %v4260_v14  ;;  %v1073_v50 = vmul.f32 0.044715, %v4352_v41 }
 0x363   : > { %3136 = vmatprep.mubr.msk.f32.mxu1 %vm3585_vm0, %v3586_v6  ;;  %v1214_v16 = vadd.f32 1.0, %v3499_v35  ;;  %v1121_v40 = vmul.f32 %v1096_v33, %v4340_v4  ;;  %v1169_v43 = vmul.f32 0.7978846, %v1144_v38  ;;  %v1145_v45 = vadd.f32 %v1120_v32, %v4299_v59 }
 0x364   : > { %3506 = vtanh.f32 %v1168_v13  ;;  %v1097_v47 = vmul.f32 %v1072_v26, %v4349_v54  ;;  %v1040_v14 = vmul.f32 0.5, %v4280_v39  ;;  %v1098_v7 = vmul.f32 %v1073_v50, %v4352_v41 }
 0x365   : > { %v3501_v11 = vpop.eup %3500  ;;  %v1146_v57 = vadd.f32 %v1121_v40, %v4340_v4  ;;  %3508 = vtanh.f32 %v1169_v43  ;;  %v1170_v63 = vmul.f32 0.7978846, %v1145_v45  ;;  %v1074_v9 = vmul.f32 0.044715, %v4360_v52 }
 0x366   : > { %3137 = vmatmul.mubr.msk.f32.gmra.mrb[14].mxu1 %vm765_vm2, %v1234_v53  ;;  %v1239_v53 = vmul.f32 %v1214_v16, %v1039_v55  ;;  %v1215_v61 = vadd.f32 1.0, %v3501_v11  ;;  %v1122_v8 = vmul.f32 %v1097_v47, %v4349_v54  ;;  %v1041_v39 = vmul.f32 0.5, %v4308_v30 }
 0x367   : > { %3139 = vmatprep.mubr.msk.f32.mxu1 %vm3585_vm0, %v3586_v6  ;;  %v1171_v44 = vmul.f32 0.7978846, %v1146_v57  ;;  %v1123_v58 = vmul.f32 %v1098_v7, %v4352_v41  ;;  %3510 = vtanh.f32 %v1170_v63  ;;  %v1099_v60 = vmul.f32 %v1074_v9, %v4360_v52 }
 0x368   : > { %v1240_v1 = vmul.f32 %v1215_v61, %v1040_v14  ;;  %v1147_v10 = vadd.f32 %v1122_v8, %v4349_v54  ;;  %v1075_v0 = vmul.f32 0.044715, %v4385_v20  ;;  %v1042_v30 = vmul.f32 0.5, %v4322_v18 }
 0x369   : > { %3512 = vtanh.f32 %v1171_v44  ;;  %v1148_v19 = vadd.f32 %v1123_v58, %v4352_v41  ;;  %v1124_v27 = vmul.f32 %v1099_v60, %v4360_v52  ;;  %v1043_v18 = vmul.f32 0.5, %v4291_v48 }
 0x36a   : > { %3140 = vmatmul.mubr.msk.f32.gmra.mrb[16].mxu1 %vm765_vm2, %v1235_v12  ;;  %v3503_v42 = vpop.eup %3502  ;;  %v1172_v21 = vmul.f32 0.7978846, %v1147_v10  ;;  %v1100_v49 = vmul.f32 %v1075_v0, %v4385_v20  ;;  %v1044_v37 = vmul.f32 0.5, %v4296_v36  ;;  %v1045_v11 = vmul.f32 0.5, %v4299_v59 }
 0x36b   : > { %3142 = vmatprep.mubr.msk.f32.mxu1 %vm3585_vm0, %v3586_v6  ;;  %v1216_v2 = vadd.f32 1.0, %v3503_v42  ;;  %v3505_v12 = vpop.eup %3504  ;;  %v1173_v24 = vmul.f32 0.7978846, %v1148_v19  ;;  %v1149_v25 = vadd.f32 %v1124_v27, %v4360_v52  ;;  %v1046_v50 = vmul.f32 0.5, %v4340_v4 }
 0x36c   : > { %v1217_v17 = vadd.f32 1.0, %v3505_v12  ;;  %3514 = vtanh.f32 %v1172_v21  ;;  %v1125_v28 = vmul.f32 %v1100_v49, %v4385_v20  ;;  %v1048_v4 = vmul.f32 0.5, %v4352_v41 }
 0x36d   : > { %v1241_v15 = vmul.f32 %v1216_v2, %v1041_v39  ;;  %3516 = vtanh.f32 %v1173_v24  ;;  %v1174_v48 = vmul.f32 0.7978846, %v1149_v25  ;;  %v1050_v41 = vmul.f32 0.5, %v4385_v20 }
 0x36e   : > { %3143 = vmatmul.mubr.msk.f32.gmra.mrb[18].mxu1 %vm765_vm2, %v1236_v22  ;;  %v3507_v34 = vpop.eup %3506  ;;  %v1076_v22 = vmul.f32 0.044715, %v4388_v23  ;;  %v1242_v62 = vmul.f32 %v1217_v17, %v1042_v30  ;;  %v1150_v32 = vadd.f32 %v1125_v28, %v4385_v20  ;;  %v1051_v39 = vmul.f32 0.5, %v4388_v23 }
 0x36f   : > { %3145 = vmatprep.mubr.msk.f32.mxu1 %vm3585_vm0, %v3586_v6  ;;  %v1218_v51 = vadd.f32 1.0, %v3507_v34  ;;  %v3509_v5 = vpop.eup %3508  ;;  %3518 = vtanh.f32 %v1174_v48 }
 0x370   : > { %v1101_v29 = vmul.f32 %v1076_v22, %v4388_v23  ;;  %v1175_v36 = vmul.f32 0.7978846, %v1150_v32 }
 0x371   : > { %v1243_v35 = vmul.f32 %v1218_v51, %v1043_v18  ;;  %v3511_v31 = vpop.eup %3510 }
 0x372   : > { %3146 = vmatmul.mubr.msk.f32.gmra.mrb[20].mxu1 %vm765_vm2, %v1237_v56  ;;  %v1219_v56 = vadd.f32 1.0, %v3509_v5  ;;  %v1126_v33 = vmul.f32 %v1101_v29, %v4388_v23  ;;  %v1220_v26 = vadd.f32 1.0, %v3511_v31  ;;  %3520 = vtanh.f32 %v1175_v36 }
 0x373   : > { %3148 = vmatprep.mubr.msk.f32.mxu1 %vm3585_vm0, %v3586_v6  ;;  %v3513_v13 = vpop.eup %3512 }
 0x374   : > { %v1244_v38 = vmul.f32 %v1219_v56, %v1044_v37  ;;  %v1245_v16 = vmul.f32 %v1220_v26, %v1045_v11  ;;  %v1221_v55 = vadd.f32 1.0, %v3513_v13  ;;  %v4484_v56 = vld [vmem:[%s5735_s7] ss:$0 sm:$0xff] }
 0x376   : > { %3149 = vmatmul.mubr.msk.f32.gmra.mrb[22].mxu1 %vm765_vm2, %v1238_v46  ;;  %v1151_v46 = vadd.f32 %v1126_v33, %v4388_v23  ;;  %v3515_v40 = vpop.eup %3514  ;;  %v1246_v59 = vmul.f32 %v1221_v55, %v1046_v50 }
 0x377   : > { %3151 = vmatprep.mubr.msk.f32.mxu1 %vm3585_vm0, %v3586_v6  ;;  %v1222_v45 = vadd.f32 1.0, %v3515_v40  ;;  %v3517_v47 = vpop.eup %3516 }
 0x378   : > { %v1176_v43 = vmul.f32 0.7978846, %v1151_v46  ;;  %v1223_v42 = vadd.f32 1.0, %v3517_v47 }
 0x379   : > { %v3519_v14 = vpop.eup %3518 }
 0x37a   : > { %3152 = vmatmul.mubr.msk.f32.gmra.mrb[24].mxu1 %vm765_vm2, %v1239_v53  ;;  %v1047_v53 = vmul.f32 0.5, %v4349_v54  ;;  %3522 = vtanh.f32 %v1176_v43  ;;  %v1248_v57 = vmul.f32 %v1223_v42, %v1048_v4  ;;  %v1224_v7 = vadd.f32 1.0, %v3519_v14 }
 0x37b   : > { %3154 = vmatprep.mubr.msk.f32.mxu1 %vm3585_vm0, %v3586_v6  ;;  %v1049_v54 = vmul.f32 0.5, %v4360_v52 }
 0x37c   : > { %v1247_v61 = vmul.f32 %v1222_v45, %v1047_v53  ;;  %v3521_v63 = vpop.eup %3520 }
 0x37d   : > { %v1249_v8 = vmul.f32 %v1224_v7, %v1049_v54  ;;  %v1225_v9 = vadd.f32 1.0, %v3521_v63 }
 0x37e   : > { %3155 = vmatmul.mubr.msk.f32.gmra.mrb[26].mxu1 %vm765_vm2, %v1240_v1 }
 0x37f   : > { %3157 = vmatprep.mubr.msk.f32.mxu1 %vm3585_vm0, %v3586_v6  ;;  %v1250_v2 = vmul.f32 %v1225_v9, %v1050_v41 }
 0x382   : > { %3158 = vmatmul.mubr.msk.f32.gmra.mrb[28].mxu1 %vm765_vm2, %v1241_v15 }
 0x383   : > { %3160 = vmatprep.mubr.msk.f32.mxu1 %vm3585_vm0, %v3586_v6 }
 0x384   : > { %v3523_v1 = vpop.eup %3522 }
 0x385   : > { %v1226_v12 = vadd.f32 1.0, %v3523_v1 }
 0x386   : > { %3161 = vmatmul.mubr.msk.f32.gmra.mrb[30].mxu1 %vm765_vm2, %v1242_v62 }
 0x387   : > { %3163 = vmatprep.mubr.msk.f32.mxu1 %vm3585_vm0, %v3586_v6  ;;  %v1251_v52 = vmul.f32 %v1226_v12, %v1051_v39 }
 0x38a   : > { %3164 = vmatmul.mubr.msk.f32.gmra.mrb[32].mxu1 %vm765_vm2, %v1243_v35 }
 0x38b   : > { %3166 = vmatprep.mubr.msk.f32.mxu1 %vm3585_vm0, %v3586_v6 }
 0x38e   : > { %3167 = vmatmul.mubr.msk.f32.gmra.mrb[34].mxu1 %vm765_vm2, %v1244_v38 }
 0x38f   : > { %3169 = vmatprep.mubr.msk.f32.mxu1 %vm3585_vm0, %v3586_v6 }
 0x392   : > { %3170 = vmatmul.mubr.msk.f32.gmra.mrb[36].mxu1 %vm765_vm2, %v1245_v16 }
 0x393   : > { %3172 = vmatprep.mubr.msk.f32.mxu1 %vm3585_vm0, %v3586_v6 }
 0x396   : > { %3173 = vmatmul.mubr.msk.f32.gmra.mrb[38].mxu1 %vm765_vm2, %v1246_v59 }
 0x397   : > { %3175 = vmatprep.mubr.msk.f32.mxu1 %vm3585_vm0, %v3586_v6 }
 0x39a   : > { %3176 = vmatmul.mubr.msk.f32.gmra.mrb[40].mxu1 %vm765_vm2, %v1247_v61 }
 0x39b   : > { %3178 = vmatprep.mubr.msk.f32.mxu1 %vm3585_vm0, %v3586_v6 }
 0x39e   : > { %3179 = vmatmul.mubr.msk.f32.gmra.mrb[42].mxu1 %vm765_vm2, %v1248_v57 }
 0x39f   : > { %3181 = vmatprep.mubr.msk.f32.mxu1 %vm3585_vm0, %v3586_v6 }
 0x3a2   : > { %3182 = vmatmul.mubr.msk.f32.gmra.mrb[44].mxu1 %vm765_vm2, %v1249_v8 }
 0x3a3   : > { %3184 = vmatprep.mubr.msk.f32.mxu1 %vm3585_vm0, %v3586_v6 }
 0x3a6   : > { %3185 = vmatmul.mubr.msk.f32.gmra.mrb[46].mxu1 %vm765_vm2, %v1250_v2 }
 0x3a7   : > { %3187 = vmatprep.mubr.msk.f32.mxu1 %vm3585_vm0, %v3586_v6 }
 0x3aa   : > { %3188 = vmatmul.mubr.msk.f32.gmra.mrb[48].mxu1 %vm765_vm2, %v1251_v52 }
 0x41d   : > { %v1408_v44 = vpop.f32.mrb[0].mxu1 }
 0x41e   : > { %v3117_v58 = vpop.f32.mrb[1].mxu1  ;;  %v4490_v48 = vadd.f32 %v4484_v56, %v1408_v44 }
 0x421   : > { %v1413_v10 = vpop.f32.mrb[2].mxu1 }
 0x422   : > { %v3120_v60 = vpop.f32.mrb[3].mxu1  ;;  %v4487_v37 = vadd.f32 %v4484_v56, %v1413_v10 }
 0x424   : > { %v1534_v38 = vadd.f32 %v4487_v37, %v4490_v48 }
 0x425   : > { %v1418_v20 = vpop.f32.mrb[4].mxu1 }
 0x426   : > { %v3123_v0 = vpop.f32.mrb[5].mxu1  ;;  %v4493_v32 = vadd.f32 %v4484_v56, %v1418_v20 }
 0x428   : > { %v1535_v11 = vadd.f32 %v1534_v38, %v4493_v32 }
 0x429   : > { %v1423_v15 = vpop.f32.mrb[6].mxu1 }
 0x42a   : > { %v3126_v17 = vpop.f32.mrb[7].mxu1  ;;  %v4498_v26 = vadd.f32 %v4484_v56, %v1423_v15 }
 0x42c   : > { %v1536_v55 = vadd.f32 %v1535_v11, %v4498_v26 }
 0x42d   : > { %v1428_v34 = vpop.f32.mrb[8].mxu1 }
 0x42e   : > { %v3129_v30 = vpop.f32.mrb[9].mxu1  ;;  %v4502_v36 = vadd.f32 %v4484_v56, %v1428_v34 }
 0x430   : > { %v1537_v50 = vadd.f32 %v1536_v55, %v4502_v36 }
 0x431   : > { %v1433_v19 = vpop.f32.mrb[10].mxu1 }
 0x432   : > { %v3132_v21 = vpop.f32.mrb[11].mxu1  ;;  %v4506_v40 = vadd.f32 %v4484_v56, %v1433_v19 }
 0x434   : > { %v1538_v47 = vadd.f32 %v1537_v50, %v4506_v40 }
 0x435   : > { %v1438_v27 = vpop.f32.mrb[12].mxu1 }
 0x436   : > { %v3135_v23 = vpop.f32.mrb[13].mxu1  ;;  %v4510_v43 = vadd.f32 %v4484_v56, %v1438_v27 }
 0x438   : > { %v1539_v61 = vadd.f32 %v1538_v47, %v4510_v43 }
 0x439   : > { %v1443_v49 = vpop.f32.mrb[14].mxu1 }
 0x43a   : > { %v3138_v22 = vpop.f32.mrb[15].mxu1  ;;  %v4514_v53 = vadd.f32 %v4484_v56, %v1443_v49 }
 0x43c   : > { %v1540_v57 = vadd.f32 %v1539_v61, %v4514_v53 }
 0x43d   : > { %v1448_v62 = vpop.f32.mrb[16].mxu1 }
 0x43e   : > { %v3141_v51 = vpop.f32.mrb[17].mxu1  ;;  %v4518_v42 = vadd.f32 %v4484_v56, %v1448_v62 }
 0x440   : > { %v1541_v63 = vadd.f32 %v1540_v57, %v4518_v42  ;;  %v2089_v57 = vld [vmem:[%s5739_s11 + $0x8] sm:$0xff] }
 0x441   : > { %v1453_v5 = vpop.f32.mrb[18].mxu1 }
 0x442   : > { %v3144_v18 = vpop.f32.mrb[19].mxu1  ;;  %v4522_v7 = vadd.f32 %v4484_v56, %v1453_v5 }
 0x444   : > { %v1542_v1 = vadd.f32 %v1541_v63, %v4522_v7 }
 0x445   : > { %v1458_v24 = vpop.f32.mrb[20].mxu1 }
 0x446   : > { %v3147_v25 = vpop.f32.mrb[21].mxu1  ;;  %v4526_v54 = vadd.f32 %v4484_v56, %v1458_v24 }
 0x448   : > { %v1543_v2 = vadd.f32 %v1542_v1, %v4526_v54  ;;  %v2121_v1 = vld [vmem:[%s5739_s11 + $0x108] sm:$0xff] }
 0x449   : > { %v1463_v28 = vpop.f32.mrb[22].mxu1 }
 0x44a   : > { %v3150_v29 = vpop.f32.mrb[23].mxu1  ;;  %v4530_v41 = vadd.f32 %v4484_v56, %v1463_v28 }
 0x44c   : > { %v1544_v44 = vadd.f32 %v1543_v2, %v4530_v41 }
 0x44d   : > { %v1468_v35 = vpop.f32.mrb[24].mxu1 }
 0x44e   : > { %v3153_v31 = vpop.f32.mrb[25].mxu1  ;;  %v4534_v12 = vadd.f32 %v4484_v56, %v1468_v35 }
 0x450   : > { %v1545_v10 = vadd.f32 %v1544_v44, %v4534_v12 }
 0x451   : > { %v1473_v33 = vpop.f32.mrb[26].mxu1 }
 0x452   : > { %v3156_v13 = vpop.f32.mrb[27].mxu1  ;;  %v4538_v58 = vadd.f32 %v4484_v56, %v1473_v33 }
 0x454   : > { %v1546_v15 = vadd.f32 %v1545_v10, %v4538_v58  ;;  %v2122_v10 = vld [vmem:[%s5739_s11 + $0x110] sm:$0xff] }
 0x455   : > { %v1478_v46 = vpop.f32.mrb[28].mxu1 }
 0x456   : > { %v3159_v16 = vpop.f32.mrb[29].mxu1  ;;  %v4542_v60 = vadd.f32 %v4484_v56, %v1478_v46 }
 0x458   : > { %v1547_v34 = vadd.f32 %v1546_v15, %v4542_v60  ;;  %v2093_v15 = vld [vmem:[%s5739_s11 + $0x28] sm:$0xff] }
 0x459   : > { %v1483_v59 = vpop.f32.mrb[30].mxu1 }
 0x45a   : > { %v3162_v45 = vpop.f32.mrb[31].mxu1  ;;  %v4546_v17 = vadd.f32 %v4484_v56, %v1483_v59 }
 0x45c   : > { %v1548_v27 = vadd.f32 %v1547_v34, %v4546_v17 }
 0x45d   : > { %v1488_v14 = vpop.f32.mrb[32].mxu1 }
 0x45e   : > { %v3165_v4 = vpop.f32.mrb[33].mxu1  ;;  %v4550_v30 = vadd.f32 %v4484_v56, %v1488_v14 }
 0x45f   : > { %v2088_v4 = vld [vmem:[%s5739_s11] sm:$0xff] }
 0x460   : > { %v1549_v49 = vadd.f32 %v1548_v27, %v4550_v30  ;;  %v3316_v63 = vpack.c.bf16 %v2089_v57, %v2088_v4  ;;  %v2125_v27 = vld [vmem:[%s5739_s11 + $0x128] sm:$0xff]  ;;  %v2099_v4 = vld [vmem:[%s5739_s11 + $0x58] sm:$0xff] }
 0x461   : > { %v1493_v8 = vpop.f32.mrb[34].mxu1 }
 0x462   : > { %v3168_v9 = vpop.f32.mrb[35].mxu1  ;;  %v4554_v23 = vadd.f32 %v4484_v56, %v1493_v8  ;;  %v2091_v8 = vld [vmem:[%s5739_s11 + $0x18] sm:$0xff]  ;;  %3317 = vmatpush1.bf16.msra.mxu0 %v3316_v63 }
 0x463   : > { %v2120_v9 = vld [vmem:[%s5739_s11 + $0x100] sm:$0xff]  ;;  %3318 = vmatprep.subr.bf16.mxu0 %v3584_v3  ;;  %v2131_v63 = vld [vmem:[%s5739_s11 + $0x158] sm:$0xff] }
 0x464   : > { %v1550_v5 = vadd.f32 %v1549_v49, %v4554_v23 }
 0x465   : > { %v1498_v39 = vpop.f32.mrb[36].mxu1 }
 0x466   : > { %v3171_v52 = vpop.f32.mrb[37].mxu1  ;;  %v4558_v22 = vadd.f32 %v4484_v56, %v1498_v39  ;;  %v3364_v39 = vpack.c.bf16 %v2121_v1, %v2120_v9  ;;  %v2100_v9 = vld [vmem:[%s5739_s11 + $0x60] sm:$0xff]  ;;  %v2101_v1 = vld [vmem:[%s5739_s11 + $0x68] sm:$0xff] }
 0x468   : > { %v1551_v24 = vadd.f32 %v1550_v5, %v4558_v22  ;;  %3365 = vmatpush1.bf16.msra.mxu1 %v3364_v39  ;;  %v2095_v5 = vld [vmem:[%s5739_s11 + $0x38] sm:$0xff]  ;;  %v2132_v39 = vld [vmem:[%s5739_s11 + $0x160] sm:$0xff] }
 0x469   : > { %v1503_v20 = vpop.f32.mrb[38].mxu1  ;;  %3366 = vmatprep.subr.bf16.mxu1 %v3584_v3 }
 0x46a   : > { %v3174_v0 = vpop.f32.mrb[39].mxu1  ;;  %v4562_v18 = vadd.f32 %v4484_v56, %v1503_v20  ;;  %v2123_v20 = vld [vmem:[%s5739_s11 + $0x118] sm:$0xff] }
 0x46b   : > { %v2092_v0 = vld [vmem:[%s5739_s11 + $0x20] sm:$0xff]  ;;  %v3367_v34 = vpack.c.bf16 %v2123_v20, %v2122_v10  ;;  %v2102_v10 = vld [vmem:[%s5739_s11 + $0x70] sm:$0xff]  ;;  %v2103_v20 = vld [vmem:[%s5739_s11 + $0x78] sm:$0xff] }
 0x46c   : > { %v1552_v35 = vadd.f32 %v1551_v24, %v4562_v18 }
 0x46d   : > { %v1508_v19 = vpop.f32.mrb[40].mxu1  ;;  %3368 = vmatpush1.bf16.msra.mxu1 %v3367_v34  ;;  %v2135_v34 = vld [vmem:[%s5739_s11 + $0x178] sm:$0xff] }
 0x46e   : > { %v3177_v21 = vpop.f32.mrb[41].mxu1  ;;  %v4566_v25 = vadd.f32 %v4484_v56, %v1508_v19  ;;  %3369 = vmatprep.subr.bf16.mxu1 %v3584_v3 }
 0x46f   : > { %v2124_v21 = vld [vmem:[%s5739_s11 + $0x120] sm:$0xff] }
 0x470   : > { %v1553_v33 = vadd.f32 %v1552_v35, %v4566_v25  ;;  %v3370_v24 = vpack.c.bf16 %v2125_v27, %v2124_v21  ;;  %v2127_v35 = vld [vmem:[%s5739_s11 + $0x138] sm:$0xff]  ;;  %v2104_v21 = vld [vmem:[%s5739_s11 + $0x80] sm:$0xff]  ;;  %v2105_v27 = vld [vmem:[%s5739_s11 + $0x88] sm:$0xff] }
 0x471   : > { %v1513_v62 = vpop.f32.mrb[42].mxu1 }
 0x472   : > { %v3180_v51 = vpop.f32.mrb[43].mxu1  ;;  %v4570_v31 = vadd.f32 %v4484_v56, %v1513_v62  ;;  %v3322_v62 = vpack.c.bf16 %v2093_v15, %v2092_v0  ;;  %3371 = vmatpush1.bf16.msra.mxu1 %v3370_v24  ;;  %v2134_v15 = vld [vmem:[%s5739_s11 + $0x170] sm:$0xff] }
 0x473   : > { %v2094_v51 = vld [vmem:[%s5739_s11 + $0x30] sm:$0xff]  ;;  %3372 = vmatprep.subr.bf16.mxu1 %v3584_v3 }
 0x474   : > { %v1554_v46 = vadd.f32 %v1553_v33, %v4570_v31  ;;  %v2106_v24 = vld [vmem:[%s5739_s11 + $0x90] sm:$0xff] }
 0x475   : > { %v1518_v28 = vpop.f32.mrb[44].mxu1 }
 0x476   : > { %v3183_v29 = vpop.f32.mrb[45].mxu1  ;;  %v4574_v13 = vadd.f32 %v4484_v56, %v1518_v28 }
 0x477   : > { %v2126_v29 = vld [vmem:[%s5739_s11 + $0x130] sm:$0xff] }
 0x478   : > { %v1555_v55 = vadd.f32 %v1554_v46, %v4574_v13  ;;  %v2097_v46 = vld [vmem:[%s5739_s11 + $0x48] sm:$0xff] }
 0x479   : > { %v1523_v38 = vpop.f32.mrb[46].mxu1 }
 0x47a   : > { %v3186_v11 = vpop.f32.mrb[47].mxu1  ;;  %v4578_v16 = vadd.f32 %v4484_v56, %v1523_v38  ;;  %v3325_v38 = vpack.c.bf16 %v2095_v5, %v2094_v51  ;;  %v2137_v51 = vld [vmem:[%s5739_s11 + $0x188] sm:$0xff]  ;;  %v3340_v5 = vpack.c.bf16 %v2105_v27, %v2104_v21 }
 0x47b   : > { %v2096_v11 = vld [vmem:[%s5739_s11 + $0x40] sm:$0xff]  ;;  %v2117_v21 = vld [vmem:[%s5739_s11 + $0xe8] sm:$0xff] }
 0x47c   : > { %v1556_v47 = vadd.f32 %v1555_v55, %v4578_v16  ;;  %v3373_v55 = vpack.c.bf16 %v2127_v35, %v2126_v29  ;;  %v2138_v35 = vld [vmem:[%s5739_s11 + $0x190] sm:$0xff] }
 0x47d   : > { %v1528_v50 = vpop.f32.mrb[48].mxu1 }
 0x47e   : > { %v4582_v59 = vadd.f32 %v4484_v56, %v1528_v50  ;;  %v3189_v45 = vpop.f32.mrb[49].mxu1  ;;  %v2090_v56 = vld [vmem:[%s5739_s11 + $0x10] sm:$0xff]  ;;  %3374 = vmatpush1.bf16.msra.mxu1 %v3373_v55 }
 0x47f   : > { %v3319_v44 = vpack.c.bf16 %v2091_v8, %v2090_v56  ;;  %v2128_v45 = vld [vmem:[%s5739_s11 + $0x140] sm:$0xff]  ;;  %3375 = vmatprep.subr.bf16.mxu1 %v3584_v3  ;;  %v2130_v56 = vld [vmem:[%s5739_s11 + $0x150] sm:$0xff] }
 0x480   : > { %v1558_v61 = vsel %vm1557_vm4, %v4582_v59, 0.0 }
 0x481   : > { %v1559_v14 = vadd.f32 %v1558_v61, %v1556_v47  ;;  %3320 = vmatpush1.bf16.msra.mxu0 %v3319_v44  ;;  %v2129_v47 = vld [vmem:[%s5739_s11 + $0x148] sm:$0xff]  ;;  %v3328_v61 = vpack.c.bf16 %v2097_v46, %v2096_v11  ;;  %v3334_v44 = vpack.c.bf16 %v2101_v1, %v2100_v9  ;;  %v2108_v11 = vld [vmem:[%s5739_s11 + $0xa0] sm:$0xff] }
 0x482   : > { %3321 = vmatprep.subr.bf16.mxu0 %v3584_v3  ;;  %v3376_v57 = vpack.c.bf16 %v2129_v47, %v2128_v45  ;;  %v2109_v46 = vld [vmem:[%s5739_s11 + $0xa8] sm:$0xff] }
 0x483   : > { %1560 = vadd.xlane.f32.xlu1 %v1559_v14  ;;  %v2098_v14 = vld [vmem:[%s5739_s11 + $0x50] sm:$0xff]  ;;  %v2141_v45 = vld [vmem:[%s5739_s11 + $0x1a8] sm:$0xff]  ;;  %v3346_v47 = vpack.c.bf16 %v2109_v46, %v2108_v11 }
 0x484   : > { %v3331_v8 = vpack.c.bf16 %v2099_v4, %v2098_v14  ;;  %3377 = vmatpush1.bf16.msra.mxu1 %v3376_v57  ;;  %v2111_v14 = vld [vmem:[%s5739_s11 + $0xb8] sm:$0xff]  ;;  %v2142_v57 = vld [vmem:[%s5739_s11 + $0x1b0] sm:$0xff]  ;;  %v2113_v9 = vld [vmem:[%s5739_s11 + $0xc8] sm:$0xff] }
 0x485   : > { %3323 = vmatpush1.bf16.msra.mxu0 %v3322_v62  ;;  %3378 = vmatprep.subr.bf16.mxu1 %v3584_v3  ;;  %v2136_v62 = vld [vmem:[%s5739_s11 + $0x180] sm:$0xff] }
 0x486   : > { %3324 = vmatprep.subr.bf16.mxu0 %v3584_v3  ;;  %v3388_v29 = vpack.c.bf16 %v2137_v51, %v2136_v62 }
 0x489   : > { %3326 = vmatpush1.bf16.msra.mxu0 %v3325_v38 }
 0x48a   : > { %3327 = vmatprep.subr.bf16.mxu0 %v3584_v3 }
 0x48d   : > { %3329 = vmatpush1.bf16.msra.mxu0 %v3328_v61  ;;  %v2110_v61 = vld [vmem:[%s5739_s11 + $0xb0] sm:$0xff] }
 0x48e   : > { %3330 = vmatprep.subr.bf16.mxu0 %v3584_v3 }
 0x491   : > { %3332 = vmatpush1.bf16.msra.mxu0 %v3331_v8  ;;  %v2112_v8 = vld [vmem:[%s5739_s11 + $0xc0] sm:$0xff] }
 0x492   : > { %3333 = vmatprep.subr.bf16.mxu0 %v3584_v3 }
 0x495   : > { %3335 = vmatpush1.bf16.msra.mxu0 %v3334_v44  ;;  %v2114_v44 = vld [vmem:[%s5739_s11 + $0xd0] sm:$0xff] }
 0x496   : > { %3336 = vmatprep.subr.bf16.mxu0 %v3584_v3 }
 0x510   : > { %v1561_v2 = vpop.xlane.xlu1 %1560 }
 0x511   : > { %v1562_v52 = vrot.slane %v1561_v2, 4 }
 0x513   : > { %v1563_v19 = vadd.f32 %v1562_v52, %v1561_v2  ;;  %v3379_v2 = vpack.c.bf16 %v2131_v63, %v2130_v56  ;;  %v2133_v52 = vld [vmem:[%s5739_s11 + $0x168] sm:$0xff]  ;;  %v2143_v56 = vld [vmem:[%s5739_s11 + $0x1b8] sm:$0xff]  ;;  %v3349_v63 = vpack.c.bf16 %v2111_v14, %v2110_v61 }
 0x514   : > { %v3382_v0 = vpack.c.bf16 %v2133_v52, %v2132_v39  ;;  %v3397_v1 = vpack.c.bf16 %v2143_v56, %v2142_v57  ;;  %v2145_v39 = vld [vmem:[%s5739_s11 + $0x1c8] sm:$0xff]  ;;  %v3352_v52 = vpack.c.bf16 %v2113_v9, %v2112_v8 }
 0x515   : > { %v1564_v49 = vrot.slane %v1563_v19, 2  ;;  %3380 = vmatpush1.bf16.msra.mxu1 %v3379_v2  ;;  %v2144_v2 = vld [vmem:[%s5739_s11 + $0x1c0] sm:$0xff] }
 0x516   : > { %3381 = vmatprep.subr.bf16.mxu1 %v3584_v3 }
 0x517   : > { %v1565_v28 = vadd.f32 %v1564_v49, %v1563_v19  ;;  %v3337_v19 = vpack.c.bf16 %v2103_v20, %v2102_v10  ;;  %v3385_v49 = vpack.c.bf16 %v2135_v34, %v2134_v15  ;;  %v2115_v10 = vld [vmem:[%s5739_s11 + $0xd8] sm:$0xff]  ;;  %v3400_v20 = vpack.c.bf16 %v2145_v39, %v2144_v2 }
 0x518   : > { %v2147_v15 = vld [vmem:[%s5739_s11 + $0x1d8] sm:$0xff]  ;;  %v3355_v34 = vpack.c.bf16 %v2115_v10, %v2114_v44 }
 0x519   : > { %v1566_v33 = vrot.slane %v1565_v28, 1  ;;  %3383 = vmatpush1.bf16.msra.mxu1 %v3382_v0  ;;  %3338 = vmatpush1.bf16.msra.mxu0 %v3337_v19  ;;  %v2146_v0 = vld [vmem:[%s5739_s11 + $0x1d0] sm:$0xff]  ;;  %v2116_v19 = vld [vmem:[%s5739_s11 + $0xe0] sm:$0xff] }
 0x51a   : > { %3384 = vmatprep.subr.bf16.mxu1 %v3584_v3  ;;  %3339 = vmatprep.subr.bf16.mxu0 %v3584_v3  ;;  %v3403_v27 = vpack.c.bf16 %v2147_v15, %v2146_v0 }
 0x51b   : > { %v1567_v50 = vadd.f32 %v1566_v33, %v1565_v28  ;;  %v2107_v28 = vld [vmem:[%s5739_s11 + $0x98] sm:$0xff] }
 0x51c   : > { %v2139_v33 = vld [vmem:[%s5739_s11 + $0x198] sm:$0xff]  ;;  %v3343_v38 = vpack.c.bf16 %v2107_v28, %v2106_v24 }
 0x51d   : > { %3457 = vpush %v1567_v50  ;;  %3386 = vmatpush1.bf16.msra.mxu1 %v3385_v49  ;;  %3341 = vmatpush1.bf16.msra.mxu0 %v3340_v5  ;;  %v3391_v55 = vpack.c.bf16 %v2139_v33, %v2138_v35  ;;  %v2140_v50 = vld [vmem:[%s5739_s11 + $0x1a0] sm:$0xff]  ;;  %v3358_v49 = vpack.c.bf16 %v2117_v21, %v2116_v19 }
 0x51e   : > { %3387 = vmatprep.subr.bf16.mxu1 %v3584_v3  ;;  %3342 = vmatprep.subr.bf16.mxu0 %v3584_v3  ;;  %v3394_v4 = vpack.c.bf16 %v2141_v45, %v2140_v50 }
 0x521   : > { %3389 = vmatpush1.bf16.msra.mxu1 %v3388_v29  ;;  %3344 = vmatpush1.bf16.msra.mxu0 %v3343_v38 }
 0x522   : > { %3390 = vmatprep.subr.bf16.mxu1 %v3584_v3  ;;  %3345 = vmatprep.subr.bf16.mxu0 %v3584_v3 }
 0x525   : > { %3392 = vmatpush1.bf16.msra.mxu1 %v3391_v55  ;;  %3347 = vmatpush1.bf16.msra.mxu0 %v3346_v47 }
 0x526   : > { %3393 = vmatprep.subr.bf16.mxu1 %v3584_v3  ;;  %3348 = vmatprep.subr.bf16.mxu0 %v3584_v3 }
 0x529   : > { %3395 = vmatpush1.bf16.msra.mxu1 %v3394_v4  ;;  %3350 = vmatpush1.bf16.msra.mxu0 %v3349_v63 }
 0x52a   : > { %3396 = vmatprep.subr.bf16.mxu1 %v3584_v3  ;;  %3351 = vmatprep.subr.bf16.mxu0 %v3584_v3 }
 0x52d   : > { %3398 = vmatpush1.bf16.msra.mxu1 %v3397_v1  ;;  %3353 = vmatpush1.bf16.msra.mxu0 %v3352_v52 }
 0x52e   : > { %3399 = vmatprep.subr.bf16.mxu1 %v3584_v3  ;;  %3354 = vmatprep.subr.bf16.mxu0 %v3584_v3 }
 0x531   : > { %3401 = vmatpush1.bf16.msra.mxu1 %v3400_v20  ;;  %3356 = vmatpush1.bf16.msra.mxu0 %v3355_v34 }
 0x532   : > { %3402 = vmatprep.subr.bf16.mxu1 %v3584_v3  ;;  %3357 = vmatprep.subr.bf16.mxu0 %v3584_v3 }
 0x535   : > { %3404 = vmatpush1.bf16.msra.mxu1 %v3403_v27  ;;  %3359 = vmatpush1.bf16.msra.mxu0 %v3358_v49 }
 0x536   : > { %3405 = vmatprep.subr.bf16.mxu1 %v3584_v3  ;;  %3360 = vmatprep.subr.bf16.mxu0 %v3584_v3 }
 0x54e   : > { %s3458_s24 = spop %3457 }
 0x54f   : > { %v1569_v62 = vstv %s3458_s24 }
 0x550   : > { %v4790_v51 = vmul.f32 3.9859693e-05, %v1569_v62 }
 0x552   : > { %v4794_v5 = vsub.f32 %v4490_v48, %v4790_v51  ;;  %v4798_v24 = vsub.f32 %v4487_v37, %v4790_v51  ;;  %v4802_v28 = vsub.f32 %v4493_v32, %v4790_v51  ;;  %v4810_v33 = vsub.f32 %v4498_v26, %v4790_v51 }
 0x553   : > { %v4814_v48 = vsub.f32 %v4502_v36, %v4790_v51  ;;  %v4820_v32 = vsub.f32 %v4506_v40, %v4790_v51  ;;  %v4826_v26 = vsub.f32 %v4510_v43, %v4790_v51  ;;  %v4832_v50 = vsub.f32 %v4514_v53, %v4790_v51 }
 0x554   : > { %v1597_v29 = vmul.f32 %v4794_v5, %v4794_v5  ;;  %v1598_v35 = vmul.f32 %v4798_v24, %v4798_v24  ;;  %v1599_v37 = vmul.f32 %v4802_v28, %v4802_v28  ;;  %v1600_v11 = vmul.f32 %v4810_v33, %v4810_v33 }
 0x555   : > { %v1601_v36 = vmul.f32 %v4814_v48, %v4814_v48  ;;  %v1602_v40 = vmul.f32 %v4820_v32, %v4820_v32  ;;  %v4838_v47 = vsub.f32 %v4518_v42, %v4790_v51  ;;  %v1603_v43 = vmul.f32 %v4826_v26, %v4826_v26 }
 0x556   : > { %v1622_v38 = vadd.f32 %v1598_v35, %v1597_v29  ;;  %v4844_v14 = vsub.f32 %v4522_v7, %v4790_v51  ;;  %v1604_v53 = vmul.f32 %v4832_v50, %v4832_v50  ;;  %v4850_v57 = vsub.f32 %v4526_v54, %v4790_v51 }
 0x557   : > { %v1605_v42 = vmul.f32 %v4838_v47, %v4838_v47  ;;  %v4856_v63 = vsub.f32 %v4530_v41, %v4790_v51  ;;  %v4862_v9 = vsub.f32 %v4534_v12, %v4790_v51  ;;  %v4868_v2 = vsub.f32 %v4538_v58, %v4790_v51 }
 0x558   : > { %v1623_v46 = vadd.f32 %v1622_v38, %v1599_v37  ;;  %v1606_v7 = vmul.f32 %v4844_v14, %v4844_v14  ;;  %v1607_v54 = vmul.f32 %v4850_v57, %v4850_v57  ;;  %v4874_v52 = vsub.f32 %v4542_v60, %v4790_v51 }
 0x559   : > { %v1608_v41 = vmul.f32 %v4856_v63, %v4856_v63  ;;  %v1609_v12 = vmul.f32 %v4862_v9, %v4862_v9  ;;  %v4880_v10 = vsub.f32 %v4546_v17, %v4790_v51  ;;  %v1610_v58 = vmul.f32 %v4868_v2, %v4868_v2 }
 0x55a   : > { %v1624_v55 = vadd.f32 %v1623_v46, %v1600_v11  ;;  %v4886_v0 = vsub.f32 %v4550_v30, %v4790_v51  ;;  %v1611_v60 = vmul.f32 %v4874_v52, %v4874_v52  ;;  %v4892_v34 = vsub.f32 %v4554_v23, %v4790_v51 }
 0x55b   : > { %v1612_v17 = vmul.f32 %v4880_v10, %v4880_v10  ;;  %v4898_v21 = vsub.f32 %v4558_v22, %v4790_v51  ;;  %v4904_v49 = vsub.f32 %v4562_v18, %v4790_v51  ;;  %v4910_v29 = vsub.f32 %v4566_v25, %v4790_v51 }
 0x55c   : > { %v1625_v45 = vadd.f32 %v1624_v55, %v1601_v36  ;;  %v1613_v30 = vmul.f32 %v4886_v0, %v4886_v0  ;;  %v1614_v23 = vmul.f32 %v4892_v34, %v4892_v34  ;;  %v4916_v37 = vsub.f32 %v4570_v31, %v4790_v51 }
 0x55d   : > { %v1615_v22 = vmul.f32 %v4898_v21, %v4898_v21  ;;  %v1616_v18 = vmul.f32 %v4904_v49, %v4904_v49  ;;  %v4922_v11 = vsub.f32 %v4574_v13, %v4790_v51  ;;  %v1617_v25 = vmul.f32 %v4910_v29, %v4910_v29 }
 0x55e   : > { %v1626_v61 = vadd.f32 %v1625_v45, %v1602_v40  ;;  %v4928_v36 = vsub.f32 %v4582_v59, %v4790_v51  ;;  %v4932_v31 = vsub.f32 %v4578_v16, %v4790_v51  ;;  %v1618_v55 = vmul.f32 %v4916_v37, %v4916_v37  ;;  %v2148_v51 = vld [vmem:[%s5739_s11 + $0x1e0] sm:$0xff] }
 0x55f   : > { %v1619_v13 = vmul.f32 %v4922_v11, %v4922_v11 }
 0x560   : > { %v1627_v4 = vadd.f32 %v1626_v61, %v1603_v43  ;;  %v1621_v43 = vmul.f32 %v4928_v36, %v4928_v36  ;;  %v1620_v61 = vmul.f32 %v4932_v31, %v4932_v31 }
 0x562   : > { %v1628_v56 = vadd.f32 %v1627_v4, %v1604_v53  ;;  %v1645_v4 = vsel %vm1557_vm4, %v1621_v43, 0.0  ;;  %v2000_v43 = vld [vmem:[%s4947_s30 + $0x60] sm:$0xff] }
 0x564   : > { %v1629_v8 = vadd.f32 %v1628_v56, %v1605_v42  ;;  %v2149_v42 = vld [vmem:[%s5739_s11 + $0x1e8] sm:$0xff]  ;;  %v2118_v56 = vld [vmem:[%s5739_s11 + $0xf0] sm:$0xff] }
 0x566   : > { %v1630_v1 = vadd.f32 %v1629_v8, %v1606_v7  ;;  %v3406_v7 = vpack.c.bf16 %v2149_v42, %v2148_v51  ;;  %v2119_v8 = vld [vmem:[%s5739_s11 + $0xf8] sm:$0xff]  ;;  %v2004_v51 = vld [vmem:[%s4947_s30 + $0x80] sm:$0xff] }
 0x567   : > { %v2007_v42 = vld [vmem:[%s4947_s30 + $0x98] sm:$0xff] }
 0x568   : > { %v1631_v39 = vadd.f32 %v1630_v1, %v1607_v54  ;;  %v2150_v54 = vld [vmem:[%s5739_s11 + $0x1f0] sm:$0xff]  ;;  %v2151_v1 = vld [vmem:[%s5739_s11 + $0x1f8] sm:$0xff]  ;;  %3407 = vmatpush1.bf16.msra.mxu1 %v3406_v7  ;;  %v2009_v7 = vld [vmem:[%s4947_s30 + $0xa8] sm:$0xff] }
 0x569   : > { %3408 = vmatprep.subr.bf16.mxu1 %v3584_v3 }
 0x56a   : > { %v1632_v44 = vadd.f32 %v1631_v39, %v1608_v41  ;;  %v3361_v41 = vpack.c.bf16 %v2119_v8, %v2118_v56  ;;  %v1989_v39 = vld [vmem:[%s4947_s30 + $0x8] sm:$0xff]  ;;  %v2006_v8 = vld [vmem:[%s4947_s30 + $0x90] sm:$0xff] }
 0x56b   : > { %2216 = vmatprep.mubr.f32.mxu0 %v1989_v39  ;;  %v1981_v39 = vld [vmem:[%s5738_s10 + $0x48] sm:$0xff] }
 0x56c   : > { %v1633_v20 = vadd.f32 %v1632_v44, %v1609_v12  ;;  %v1991_v12 = vld [vmem:[%s4947_s30 + $0x18] sm:$0xff]  ;;  %v3409_v44 = vpack.c.bf16 %v2151_v1, %v2150_v54  ;;  %3362 = vmatpush1.bf16.msra.mxu0 %v3361_v41  ;;  %v2008_v54 = vld [vmem:[%s4947_s30 + $0xa0] sm:$0xff] }
 0x56d   : > { %2406 = vmatprep.mubr.f32.mxu1 %v1991_v12  ;;  %3411 = vmatprep.subr.bf16.mxu0 %v3584_v3  ;;  %v2011_v1 = vld [vmem:[%s4947_s30 + $0xb8] sm:$0xff]  ;;  %v1980_v41 = vld [vmem:[%s5738_s10 + $0x40] sm:$0xff]  ;;  %v2013_v12 = vld [vmem:[%s4947_s30 + $0xc8] sm:$0xff] }
 0x56e   : > { %v1634_v15 = vadd.f32 %v1633_v20, %v1610_v58  ;;  %v1972_v58 = vld [vmem:[%s5738_s10] sm:$0xff]  ;;  %v1973_v20 = vld [vmem:[%s5738_s10 + $0x8] sm:$0xff]  ;;  %3410 = vmatpush1.bf16.msra.mxu1 %v3409_v44  ;;  %v3424_v44 = vpack.c.bf16 %v1981_v39, %v1980_v41  ;;  %v2047_v39 = vld [vmem:[%s4947_s30 + $0x1d8] sm:$0xff] }
 0x56f   : > { %3435 = vmatprep.subr.bf16.mxu1 %v3584_v3  ;;  %v2044_v41 = vld [vmem:[%s4947_s30 + $0x1c0] sm:$0xff] }
 0x570   : > { %v1635_v19 = vadd.f32 %v1634_v15, %v1611_v60  ;;  %v1988_v60 = vld [vmem:[%s4947_s30] sm:$0xff]  ;;  %v3412_v15 = vpack.c.bf16 %v1973_v20, %v1972_v58  ;;  %v2010_v58 = vld [vmem:[%s4947_s30 + $0xb0] sm:$0xff] }
 0x571   : > { %2217 = vmatmul.mubr.f32.vlgmr.msra.gmra.mrb[50].mxu0 %v1988_v60  ;;  %v2012_v20 = vld [vmem:[%s4947_s30 + $0xc0] sm:$0xff]  ;;  %v2015_v60 = vld [vmem:[%s4947_s30 + $0xd8] sm:$0xff] }
 0x572   : > { %v1636_v27 = vadd.f32 %v1635_v19, %v1612_v17  ;;  %v1993_v17 = vld [vmem:[%s4947_s30 + $0x28] sm:$0xff]  ;;  %v1990_v19 = vld [vmem:[%s4947_s30 + $0x10] sm:$0xff]  ;;  %3413 = vmatpush3.bf16.msra.mxu0 %v3412_v15 }
 0x573   : > { %2221 = vmatprep.mubr.f32.mxu0 %v1993_v17  ;;  %3414 = vmatprep.subr.bf16.mxu0 %v3584_v3  ;;  %v2014_v17 = vld [vmem:[%s4947_s30 + $0xd0] sm:$0xff] }
 0x574   : > { %v1637_v62 = vadd.f32 %v1636_v27, %v1613_v30  ;;  %v1992_v30 = vld [vmem:[%s4947_s30 + $0x20] sm:$0xff]  ;;  %v1995_v27 = vld [vmem:[%s4947_s30 + $0x38] sm:$0xff]  ;;  %2407 = vmatmul.mubr.f32.vlgmr.msra.gmra.mrb[50].mxu1 %v1990_v19 }
 0x575   : > { %2222 = vmatmul.mubr.f32.gmra.mrb[52].mxu0 %v1992_v30  ;;  %2411 = vmatprep.mubr.f32.mxu1 %v1995_v27  ;;  %v2016_v19 = vld [vmem:[%s4947_s30 + $0xe0] sm:$0xff]  ;;  %v2019_v30 = vld [vmem:[%s4947_s30 + $0xf8] sm:$0xff]  ;;  %v2021_v27 = vld [vmem:[%s4947_s30 + $0x108] sm:$0xff] }
 0x576   : > { %v1638_v35 = vadd.f32 %v1637_v62, %v1614_v23  ;;  %v1997_v23 = vld [vmem:[%s4947_s30 + $0x48] sm:$0xff]  ;;  %v1974_v62 = vld [vmem:[%s5738_s10 + $0x10] sm:$0xff]  ;;  %3443 = vmatpush3.bf16.msra.mxu1 %v3412_v15 }
 0x577   : > { %2226 = vmatprep.mubr.f32.mxu0 %v1997_v23  ;;  %3436 = vmatprep.subr.bf16.mxu1 %v3584_v3  ;;  %v2017_v15 = vld [vmem:[%s4947_s30 + $0xe8] sm:$0xff]  ;;  %v2018_v23 = vld [vmem:[%s4947_s30 + $0xf0] sm:$0xff] }
 0x578   : > { %v1639_v38 = vadd.f32 %v1638_v35, %v1615_v22  ;;  %v1975_v22 = vld [vmem:[%s5738_s10 + $0x18] sm:$0xff]  ;;  %v1994_v35 = vld [vmem:[%s4947_s30 + $0x30] sm:$0xff] }
 0x579   : > { %2412 = vmatmul.mubr.f32.gmra.mrb[52].mxu1 %v1994_v35  ;;  %v2025_v35 = vld [vmem:[%s4947_s30 + $0x128] sm:$0xff] }
 0x57a   : > { %v1640_v46 = vadd.f32 %v1639_v38, %v1616_v18  ;;  %v3415_v18 = vpack.c.bf16 %v1975_v22, %v1974_v62  ;;  %v1996_v38 = vld [vmem:[%s4947_s30 + $0x40] sm:$0xff]  ;;  %v2023_v22 = vld [vmem:[%s4947_s30 + $0x118] sm:$0xff] }
 0x57b   : > { %2227 = vmatmul.mubr.f32.gmra.mrb[54].mxu0 %v1996_v38  ;;  %v2020_v62 = vld [vmem:[%s4947_s30 + $0x100] sm:$0xff] }
 0x57c   : > { %v1641_v40 = vadd.f32 %v1640_v46, %v1617_v25  ;;  %v1999_v25 = vld [vmem:[%s4947_s30 + $0x58] sm:$0xff]  ;;  %v2001_v46 = vld [vmem:[%s4947_s30 + $0x68] sm:$0xff]  ;;  %3416 = vmatpush3.bf16.msra.mxu0 %v3415_v18  ;;  %3444 = vmatpush3.bf16.msra.mxu1 %v3415_v18  ;;  %v2022_v18 = vld [vmem:[%s4947_s30 + $0x110] sm:$0xff] }
 0x57d   : > { %3417 = vmatprep.subr.bf16.mxu0 %v3584_v3  ;;  %2416 = vmatprep.mubr.f32.mxu1 %v1999_v25  ;;  %v2024_v38 = vld [vmem:[%s4947_s30 + $0x120] sm:$0xff]  ;;  %v2027_v25 = vld [vmem:[%s4947_s30 + $0x138] sm:$0xff] }
 0x57e   : > { %v1642_v45 = vadd.f32 %v1641_v40, %v1618_v55  ;;  %v1976_v55 = vld [vmem:[%s5738_s10 + $0x20] sm:$0xff]  ;;  %v1977_v40 = vld [vmem:[%s5738_s10 + $0x28] sm:$0xff]  ;;  %2231 = vmatprep.mubr.f32.mxu0 %v2001_v46  ;;  %3437 = vmatprep.subr.bf16.mxu1 %v3584_v3 }
 0x57f   : > { %2232 = vmatmul.mubr.f32.gmra.mrb[56].mxu0 %v2000_v43  ;;  %v2029_v46 = vld [vmem:[%s4947_s30 + $0x148] sm:$0xff]  ;;  %v2030_v43 = vld [vmem:[%s4947_s30 + $0x150] sm:$0xff] }
 0x580   : > { %v1643_v59 = vadd.f32 %v1642_v45, %v1619_v13  ;;  %v1998_v13 = vld [vmem:[%s4947_s30 + $0x50] sm:$0xff]  ;;  %v3418_v45 = vpack.c.bf16 %v1977_v40, %v1976_v55  ;;  %v2028_v40 = vld [vmem:[%s4947_s30 + $0x140] sm:$0xff] }
 0x581   : > { %2417 = vmatmul.mubr.f32.gmra.mrb[54].mxu1 %v1998_v13  ;;  %v2026_v55 = vld [vmem:[%s4947_s30 + $0x130] sm:$0xff]  ;;  %v2031_v13 = vld [vmem:[%s4947_s30 + $0x158] sm:$0xff] }
 0x582   : > { %v1644_v53 = vadd.f32 %v1643_v59, %v1620_v61  ;;  %v2003_v61 = vld [vmem:[%s4947_s30 + $0x78] sm:$0xff]  ;;  %v2005_v59 = vld [vmem:[%s4947_s30 + $0x88] sm:$0xff]  ;;  %3419 = vmatpush3.bf16.msra.mxu0 %v3418_v45  ;;  %3445 = vmatpush3.bf16.msra.mxu1 %v3418_v45 }
 0x583   : > { %3420 = vmatprep.subr.bf16.mxu0 %v3584_v3  ;;  %2421 = vmatprep.mubr.f32.mxu1 %v2003_v61  ;;  %v2033_v45 = vld [vmem:[%s4947_s30 + $0x168] sm:$0xff]  ;;  %v2032_v61 = vld [vmem:[%s4947_s30 + $0x160] sm:$0xff] }
 0x584   : > { %v1646_v16 = vadd.f32 %v1645_v4, %v1644_v53  ;;  %v2002_v53 = vld [vmem:[%s4947_s30 + $0x70] sm:$0xff]  ;;  %2236 = vmatprep.mubr.f32.mxu0 %v2005_v59  ;;  %3438 = vmatprep.subr.bf16.mxu1 %v3584_v3  ;;  %v2035_v59 = vld [vmem:[%s4947_s30 + $0x178] sm:$0xff] }
 0x585   : > { %v1978_v4 = vld [vmem:[%s5738_s10 + $0x30] sm:$0xff]  ;;  %2422 = vmatmul.mubr.f32.gmra.mrb[56].mxu1 %v2002_v53  ;;  %2237 = vmatmul.mubr.f32.gmra.mrb[58].mxu0 %v2004_v51  ;;  %v2037_v53 = vld [vmem:[%s4947_s30 + $0x188] sm:$0xff]  ;;  %v2039_v51 = vld [vmem:[%s4947_s30 + $0x198] sm:$0xff] }
 0x586   : > { %1647 = vadd.xlane.f32.xlu1 %v1646_v16  ;;  %v1979_v16 = vld [vmem:[%s5738_s10 + $0x38] sm:$0xff]  ;;  %2426 = vmatprep.mubr.f32.mxu1 %v2007_v42  ;;  %v2041_v42 = vld [vmem:[%s4947_s30 + $0x1a8] sm:$0xff] }
 0x587   : > { %v3421_v56 = vpack.c.bf16 %v1979_v16, %v1978_v4  ;;  %2241 = vmatprep.mubr.f32.mxu0 %v2009_v7  ;;  %v2034_v4 = vld [vmem:[%s4947_s30 + $0x170] sm:$0xff]  ;;  %v2036_v16 = vld [vmem:[%s4947_s30 + $0x180] sm:$0xff] }
 0x588   : > { %v2040_v7 = vld [vmem:[%s4947_s30 + $0x1a0] sm:$0xff] }
 0x589   : > { %3422 = vmatpush3.bf16.msra.mxu0 %v3421_v56  ;;  %3446 = vmatpush3.bf16.msra.mxu1 %v3421_v56  ;;  %v2038_v56 = vld [vmem:[%s4947_s30 + $0x190] sm:$0xff] }
 0x58a   : > { %3423 = vmatprep.subr.bf16.mxu0 %v3584_v3  ;;  %2427 = vmatmul.mubr.f32.gmra.mrb[58].mxu1 %v2006_v8  ;;  %v2043_v8 = vld [vmem:[%s4947_s30 + $0x1b8] sm:$0xff] }
 0x58b   : > { %3439 = vmatprep.subr.bf16.mxu1 %v3584_v3  ;;  %2242 = vmatmul.mubr.f32.gmra.mrb[60].mxu0 %v2008_v54  ;;  %v2042_v54 = vld [vmem:[%s4947_s30 + $0x1b0] sm:$0xff] }
 0x58c   : > { %2431 = vmatprep.mubr.f32.mxu1 %v2011_v1  ;;  %2246 = vmatprep.mubr.f32.mxu0 %v2013_v12  ;;  %v2045_v1 = vld [vmem:[%s4947_s30 + $0x1c8] sm:$0xff] }
 0x58d   : > { %3425 = vmatpush3.bf16.msra.mxu0 %v3424_v44  ;;  %3447 = vmatpush3.bf16.msra.mxu1 %v3424_v44  ;;  %v2049_v12 = vld [vmem:[%s4947_s30 + $0x1e8] sm:$0xff]  ;;  %v2046_v44 = vld [vmem:[%s4947_s30 + $0x1d0] sm:$0xff] }
 0x58e   : > { %3426 = vmatprep.subr.bf16.mxu0 %v3584_v3  ;;  %2432 = vmatmul.mubr.f32.gmra.mrb[60].mxu1 %v2010_v58  ;;  %v2048_v58 = vld [vmem:[%s4947_s30 + $0x1e0] sm:$0xff] }
 0x58f   : > { %3440 = vmatprep.subr.bf16.mxu1 %v3584_v3  ;;  %2247 = vmatmul.mubr.f32.gmra.mrb[62].mxu0 %v2012_v20  ;;  %v2051_v20 = vld [vmem:[%s4947_s30 + $0x1f8] sm:$0xff] }
 0x590   : > { %2436 = vmatprep.mubr.f32.mxu1 %v2015_v60  ;;  %2251 = vmatprep.mubr.f32.mxu0 %v2017_v15  ;;  %v2053_v60 = vld [vmem:[%s4947_s30 + $0x208] sm:$0xff]  ;;  %v1982_v15 = vld [vmem:[%s5738_s10 + $0x50] sm:$0xff] }
 0x592   : > { %2437 = vmatmul.mubr.f32.gmra.mrb[62].mxu1 %v2014_v17  ;;  %v1983_v17 = vld [vmem:[%s5738_s10 + $0x58] sm:$0xff] }
 0x593   : > { %2252 = vmatmul.mubr.f32.gmra.mrb[64].mxu0 %v2016_v19  ;;  %2441 = vmatprep.mubr.f32.mxu1 %v2019_v30  ;;  %v3427_v19 = vpack.c.bf16 %v1983_v17, %v1982_v15  ;;  %v2050_v30 = vld [vmem:[%s4947_s30 + $0x1f0] sm:$0xff]  ;;  %v2080_v15 = vld [vmem:[%s4947_s30 + $0x2e0] sm:$0xff]  ;;  %v2083_v17 = vld [vmem:[%s4947_s30 + $0x2f8] sm:$0xff] }
 0x594   : > { %2256 = vmatprep.mubr.f32.mxu0 %v2021_v27  ;;  %v2052_v27 = vld [vmem:[%s4947_s30 + $0x200] sm:$0xff] }
 0x595   : > { %3428 = vmatpush3.bf16.msra.mxu0 %v3427_v19  ;;  %3448 = vmatpush3.bf16.msra.mxu1 %v3427_v19  ;;  %v2085_v19 = vld [vmem:[%s4947_s30 + $0x308] sm:$0xf] }
 0x596   : > { %2442 = vmatmul.mubr.f32.gmra.mrb[64].mxu1 %v2018_v23  ;;  %v2055_v23 = vld [vmem:[%s4947_s30 + $0x218] sm:$0xff]  ;;  %3429 = vmatprep.subr.bf16.mxu0 %v3584_v3 }
 0x597   : > { %2257 = vmatmul.mubr.f32.gmra.mrb[66].mxu0 %v2020_v62  ;;  %2446 = vmatprep.mubr.f32.mxu1 %v2023_v22  ;;  %v2057_v62 = vld [vmem:[%s4947_s30 + $0x228] sm:$0xff]  ;;  %v1984_v22 = vld [vmem:[%s5738_s10 + $0x60] sm:$0xff] }
 0x598   : > { %2261 = vmatprep.mubr.f32.mxu0 %v2025_v35  ;;  %v1985_v35 = vld [vmem:[%s5738_s10 + $0x68] sm:$0xff]  ;;  %3441 = vmatprep.subr.bf16.mxu1 %v3584_v3 }
 0x59a   : > { %2447 = vmatmul.mubr.f32.gmra.mrb[66].mxu1 %v2022_v18  ;;  %v2054_v18 = vld [vmem:[%s4947_s30 + $0x210] sm:$0xff] }
 0x59b   : > { %2262 = vmatmul.mubr.f32.gmra.mrb[68].mxu0 %v2024_v38  ;;  %2451 = vmatprep.mubr.f32.mxu1 %v2027_v25  ;;  %v3430_v38 = vpack.c.bf16 %v1985_v35, %v1984_v22  ;;  %v2056_v25 = vld [vmem:[%s4947_s30 + $0x220] sm:$0xff] }
 0x59c   : > { %2266 = vmatprep.mubr.f32.mxu0 %v2029_v46  ;;  %v2059_v46 = vld [vmem:[%s4947_s30 + $0x238] sm:$0xff] }
 0x59d   : > { %3431 = vmatpush3.bf16.msra.mxu0 %v3430_v38  ;;  %3449 = vmatpush3.bf16.msra.mxu1 %v3430_v38 }
 0x59e   : > { %2452 = vmatmul.mubr.f32.gmra.mrb[68].mxu1 %v2026_v55  ;;  %v2061_v55 = vld [vmem:[%s4947_s30 + $0x248] sm:$0xff]  ;;  %3432 = vmatprep.subr.bf16.mxu0 %v3584_v3 }
 0x59f   : > { %2267 = vmatmul.mubr.f32.gmra.mrb[70].mxu0 %v2028_v40  ;;  %2456 = vmatprep.mubr.f32.mxu1 %v2031_v13  ;;  %v1986_v40 = vld [vmem:[%s5738_s10 + $0x70] sm:$0xff] }
 0x5a0   : > { %2271 = vmatprep.mubr.f32.mxu0 %v2033_v45  ;;  %v2058_v13 = vld [vmem:[%s4947_s30 + $0x230] sm:$0xff]  ;;  %v1987_v45 = vld [vmem:[%s5738_s10 + $0x78] sm:$0xff]  ;;  %3442 = vmatprep.subr.bf16.mxu1 %v3584_v3 }
 0x5a1   : > { %v2066_v3 = vld [vmem:[%s4947_s30 + $0x270] sm:$0xff] }
 0x5a2   : > { %2457 = vmatmul.mubr.f32.gmra.mrb[70].mxu1 %v2030_v43  ;;  %v2060_v43 = vld [vmem:[%s4947_s30 + $0x240] sm:$0xff] }
 0x5a3   : > { %2272 = vmatmul.mubr.f32.gmra.mrb[72].mxu0 %v2032_v61  ;;  %2461 = vmatprep.mubr.f32.mxu1 %v2035_v59  ;;  %v2063_v61 = vld [vmem:[%s4947_s30 + $0x258] sm:$0xff]  ;;  %v3433_v59 = vpack.c.bf16 %v1987_v45, %v1986_v40 }
 0x5a4   : > { %2276 = vmatprep.mubr.f32.mxu0 %v2037_v53  ;;  %v2065_v53 = vld [vmem:[%s4947_s30 + $0x268] sm:$0xff] }
 0x5a5   : > { %3434 = vmatpush3.bf16.msra.mxu0 %v3433_v59  ;;  %3450 = vmatpush3.bf16.msra.mxu1 %v3433_v59 }
 0x5a6   : > { %2462 = vmatmul.mubr.f32.gmra.mrb[72].mxu1 %v2034_v4  ;;  %v2062_v4 = vld [vmem:[%s4947_s30 + $0x250] sm:$0xff] }
 0x5a7   : > { %2277 = vmatmul.mubr.f32.gmra.mrb[74].mxu0 %v2036_v16  ;;  %2466 = vmatprep.mubr.f32.mxu1 %v2039_v51  ;;  %v2064_v16 = vld [vmem:[%s4947_s30 + $0x260] sm:$0xff]  ;;  %v2067_v51 = vld [vmem:[%s4947_s30 + $0x278] sm:$0xff] }
 0x5a8   : > { %2281 = vmatprep.mubr.f32.mxu0 %v2041_v42  ;;  %v2069_v42 = vld [vmem:[%s4947_s30 + $0x288] sm:$0xff] }
 0x5aa   : > { %2467 = vmatmul.mubr.f32.gmra.mrb[74].mxu1 %v2038_v56  ;;  %v2068_v56 = vld [vmem:[%s4947_s30 + $0x280] sm:$0xff] }
 0x5ab   : > { %2282 = vmatmul.mubr.f32.gmra.mrb[76].mxu0 %v2040_v7  ;;  %2471 = vmatprep.mubr.f32.mxu1 %v2043_v8  ;;  %v2071_v7 = vld [vmem:[%s4947_s30 + $0x298] sm:$0xff]  ;;  %v2073_v8 = vld [vmem:[%s4947_s30 + $0x2a8] sm:$0xff] }
 0x5ac   : > { %2286 = vmatprep.mubr.f32.mxu0 %v2045_v1  ;;  %v2072_v1 = vld [vmem:[%s4947_s30 + $0x2a0] sm:$0xff] }
 0x5ae   : > { %2472 = vmatmul.mubr.f32.gmra.mrb[76].mxu1 %v2042_v54  ;;  %v2070_v54 = vld [vmem:[%s4947_s30 + $0x290] sm:$0xff] }
 0x5af   : > { %2287 = vmatmul.mubr.f32.gmra.mrb[78].mxu0 %v2044_v41  ;;  %2476 = vmatprep.mubr.f32.mxu1 %v2047_v39  ;;  %v2075_v41 = vld [vmem:[%s4947_s30 + $0x2b8] sm:$0xff]  ;;  %v2077_v39 = vld [vmem:[%s4947_s30 + $0x2c8] sm:$0xff] }
 0x5b0   : > { %2291 = vmatprep.mubr.f32.mxu0 %v2049_v12  ;;  %v2074_v12 = vld [vmem:[%s4947_s30 + $0x2b0] sm:$0xff] }
 0x5b2   : > { %2477 = vmatmul.mubr.f32.gmra.mrb[78].mxu1 %v2046_v44  ;;  %v2076_v44 = vld [vmem:[%s4947_s30 + $0x2c0] sm:$0xff] }
 0x5b3   : > { %2292 = vmatmul.mubr.f32.gmra.mrb[80].mxu0 %v2048_v58  ;;  %2481 = vmatprep.mubr.f32.mxu1 %v2051_v20  ;;  %v2079_v58 = vld [vmem:[%s4947_s30 + $0x2d8] sm:$0xff]  ;;  %v2081_v20 = vld [vmem:[%s4947_s30 + $0x2e8] sm:$0xff] }
 0x5b4   : > { %2296 = vmatprep.mubr.f32.mxu0 %v2053_v60  ;;  %v2078_v60 = vld [vmem:[%s4947_s30 + $0x2d0] sm:$0xff] }
 0x5b6   : > { %2482 = vmatmul.mubr.f32.gmra.mrb[80].mxu1 %v2050_v30  ;;  %v2082_v30 = vld [vmem:[%s4947_s30 + $0x2f0] sm:$0xff] }
 0x5b7   : > { %2297 = vmatmul.mubr.f32.gmra.mrb[82].mxu0 %v2052_v27  ;;  %2486 = vmatprep.mubr.f32.mxu1 %v2055_v23  ;;  %v2084_v27 = vld [vmem:[%s4947_s30 + $0x300] sm:$0xf]  ;;  %v2087_v23 = vld [vmem:[%s4947_s30 + $0x318] sm:$0xf] }
 0x5b8   : > { %2301 = vmatprep.mubr.f32.mxu0 %v2057_v62  ;;  %v2086_v62 = vld [vmem:[%s4947_s30 + $0x310] sm:$0xf] }
 0x5ba   : > { %2487 = vmatmul.mubr.f32.gmra.mrb[82].mxu1 %v2054_v18 }
 0x5bb   : > { %2302 = vmatmul.mubr.f32.gmra.mrb[84].mxu0 %v2056_v25  ;;  %2491 = vmatprep.mubr.f32.mxu1 %v2059_v46 }
 0x5bc   : > { %2306 = vmatprep.mubr.f32.mxu0 %v2061_v55 }
 0x5be   : > { %2492 = vmatmul.mubr.f32.gmra.mrb[84].mxu1 %v2058_v13 }
 0x5bf   : > { %2307 = vmatmul.mubr.f32.gmra.mrb[86].mxu0 %v2060_v43  ;;  %2496 = vmatprep.mubr.f32.mxu1 %v2063_v61  ;;  %v5141_v61 = vld [vmem:[%s5736_s8] ss:$0 sm:$0xff] }
 0x5c0   : > { %2311 = vmatprep.mubr.f32.mxu0 %v2065_v53 }
 0x5c2   : > { %2497 = vmatmul.mubr.f32.gmra.mrb[86].mxu1 %v2062_v4 }
 0x5c3   : > { %2312 = vmatmul.mubr.f32.gmra.mrb[88].mxu0 %v2064_v16  ;;  %2501 = vmatprep.mubr.f32.mxu1 %v2067_v51  ;;  %v5154_v51 = vld [vmem:[%s5737_s9] ss:$0 sm:$0xff] }
 0x5c4   : > { %2316 = vmatprep.mubr.f32.mxu0 %v2069_v42 }
 0x5c6   : > { %2502 = vmatmul.mubr.f32.gmra.mrb[88].mxu1 %v2066_v3 }
 0x5c7   : > { %2317 = vmatmul.mubr.f32.gmra.mrb[90].mxu0 %v2068_v56  ;;  %2506 = vmatprep.mubr.f32.mxu1 %v2071_v7 }
 0x5c8   : > { %2321 = vmatprep.mubr.f32.mxu0 %v2073_v8 }
 0x5ca   : > { %2507 = vmatmul.mubr.f32.gmra.mrb[90].mxu1 %v2070_v54 }
 0x5cb   : > { %2322 = vmatmul.mubr.f32.gmra.mrb[92].mxu0 %v2072_v1  ;;  %2511 = vmatprep.mubr.f32.mxu1 %v2075_v41 }
 0x5cc   : > { %2326 = vmatprep.mubr.f32.mxu0 %v2077_v39 }
 0x5ce   : > { %2512 = vmatmul.mubr.f32.gmra.mrb[92].mxu1 %v2074_v12 }
 0x5cf   : > { %2327 = vmatmul.mubr.f32.gmra.mrb[94].mxu0 %v2076_v44  ;;  %2516 = vmatprep.mubr.f32.mxu1 %v2079_v58 }
 0x5d0   : > { %2331 = vmatprep.mubr.f32.mxu0 %v2081_v20 }
 0x5d2   : > { %2517 = vmatmul.mubr.f32.gmra.mrb[94].mxu1 %v2078_v60 }
 0x5d3   : > { %2332 = vmatmul.mubr.f32.gmra.mrb[96].mxu0 %v2080_v15  ;;  %2521 = vmatprep.mubr.f32.mxu1 %v2083_v17 }
 0x5d4   : > { %2336 = vmatprep.mubr.f32.mxu0 %v2085_v19 }
 0x5d6   : > { %2522 = vmatmul.mubr.f32.gmra.mrb[96].mxu1 %v2082_v30 }
 0x5d7   : > { %2337 = vmatmul.mubr.f32.gmra.mrb[98].mxu0 %v2084_v27  ;;  %2526 = vmatprep.mubr.f32.mxu1 %v2087_v23 }
 0x5d8   : > { %3222 = vmatprep.mubr.msk.f32.mxu0 %vm3585_vm0, %v3586_v6 }
 0x5da   : > { %2527 = vmatmul.mubr.f32.gmra.mrb[98].mxu1 %v2086_v62 }
 0x5db   : > { %3264 = vmatprep.mubr.msk.f32.mxu1 %vm3585_vm0, %v3586_v6 }
 0x613   : > { %v1648_v22 = vpop.xlane.xlu1 %1647 }
 0x614   : > { %v1649_v35 = vrot.slane %v1648_v22, 4 }
 0x616   : > { %v1650_v18 = vadd.f32 %v1649_v35, %v1648_v22 }
 0x618   : > { %v1651_v38 = vrot.slane %v1650_v18, 2 }
 0x61a   : > { %v1652_v25 = vadd.f32 %v1651_v38, %v1650_v18 }
 0x61c   : > { %v1653_v46 = vrot.slane %v1652_v25, 1 }
 0x61e   : > { %v1654_v55 = vadd.f32 %v1653_v46, %v1652_v25 }
 0x620   : > { %3459 = vpush %v1654_v55 }
 0x651   : > { %s3460_s20 = spop %3459 }
 0x652   : > { %v1656_v40 = vstv %s3460_s20 }
 0x653   : > { %v1657_v13 = vmul.f32 3.9859693e-05, %v1656_v40 }
 0x655   : > { %v1658_v45 = vadd.f32 1e-05, %v1657_v13 }
 0x657   : > { %3524 = vrsqrt.f32 %v1658_v45 }
 0x661   : > { %v5136_v43 = vpop.eup %3524 }
 0x662   : > { %v1660_v59 = vmul.f32 %v5136_v43, %v4794_v5  ;;  %v1674_v53 = vmul.f32 %v5136_v43, %v4874_v52  ;;  %v1661_v4 = vmul.f32 %v5136_v43, %v4798_v24  ;;  %v1675_v16 = vmul.f32 %v5136_v43, %v4880_v10 }
 0x663   : > { %v1662_v42 = vmul.f32 %v5136_v43, %v4802_v28  ;;  %v1676_v5 = vmul.f32 %v5136_v43, %v4886_v0  ;;  %v1663_v52 = vmul.f32 %v5136_v43, %v4810_v33  ;;  %v1677_v24 = vmul.f32 %v5136_v43, %v4892_v34 }
 0x664   : > { %v1691_v3 = vmul.f32 %v5141_v61, %v1660_v59  ;;  %v1705_v10 = vmul.f32 %v5141_v61, %v1674_v53  ;;  %v1692_v56 = vmul.f32 %v5141_v61, %v1661_v4  ;;  %v1706_v7 = vmul.f32 %v5141_v61, %v1675_v16 }
 0x665   : > { %v1693_v8 = vmul.f32 %v5141_v61, %v1662_v42  ;;  %v1707_v28 = vmul.f32 %v5141_v61, %v1676_v5  ;;  %v1694_v0 = vmul.f32 %v5141_v61, %v1663_v52  ;;  %v1708_v12 = vmul.f32 %v5141_v61, %v1677_v24 }
 0x666   : > { %v1722_v54 = vadd.f32 %v5154_v51, %v1691_v3  ;;  %v1736_v33 = vadd.f32 %v5154_v51, %v1705_v10  ;;  %v5174_v34 = vadd.f32 %v5154_v51, %v1692_v56  ;;  %v5177_v1 = vadd.f32 %v5154_v51, %v1706_v7 }
 0x667   : > { %v5180_v41 = vadd.f32 %v5154_v51, %v1693_v8  ;;  %v5183_v39 = vadd.f32 %v5154_v51, %v1707_v28  ;;  %v5189_v15 = vadd.f32 %v5154_v51, %v1694_v0  ;;  %v5196_v22 = vadd.f32 %v5154_v51, %v1708_v12 }
 0x668   : > { %v1772_v44 = vmul.f32 0.044715, %v1722_v54  ;;  %v1786_v58 = vmul.f32 0.044715, %v1736_v33  ;;  %v1773_v20 = vmul.f32 0.044715, %v5174_v34  ;;  %v1664_v12 = vmul.f32 %v5136_v43, %v4814_v48 }
 0x669   : > { %v1787_v60 = vmul.f32 0.044715, %v5177_v1  ;;  %v1774_v30 = vmul.f32 0.044715, %v5180_v41  ;;  %v1788_v62 = vmul.f32 0.044715, %v5183_v39 }
 0x66a   : > { %v1797_v17 = vmul.f32 %v1772_v44, %v1722_v54  ;;  %v1811_v19 = vmul.f32 %v1786_v58, %v1736_v33  ;;  %v1798_v27 = vmul.f32 %v1773_v20, %v5174_v34  ;;  %v5198_v35 = vmul.f32 0.5, %v1722_v54 }
 0x66b   : > { %v1812_v23 = vmul.f32 %v1787_v60, %v5177_v1  ;;  %v1799_v25 = vmul.f32 %v1774_v30, %v5180_v41  ;;  %v1813_v40 = vmul.f32 %v1788_v62, %v5183_v39  ;;  %v1775_v13 = vmul.f32 0.044715, %v5189_v15  ;;  %v5226_v30 = vpop.f32.mrb[50].mxu0 }
 0x66c   : > { %v1822_v18 = vmul.f32 %v1797_v17, %v1722_v54  ;;  %v1836_v38 = vmul.f32 %v1811_v19, %v1736_v33  ;;  %v1823_v46 = vmul.f32 %v1798_v27, %v5174_v34  ;;  %v5205_v59 = vmul.f32 0.5, %v1736_v33  ;;  %v2220_v62 = vpop.f32.mrb[51].mxu0 }
 0x66d   : > { %v1837_v55 = vmul.f32 %v1812_v23, %v5177_v1  ;;  %v1824_v4 = vmul.f32 %v1799_v25, %v5180_v41  ;;  %v1838_v5 = vmul.f32 %v1813_v40, %v5183_v39  ;;  %v1800_v52 = vmul.f32 %v1775_v13, %v5189_v15 }
 0x66e   : > { %v1847_v45 = vadd.f32 %v1822_v18, %v1722_v54  ;;  %v1861_v53 = vadd.f32 %v1836_v38, %v1736_v33  ;;  %v1848_v16 = vadd.f32 %v1823_v46, %v5174_v34  ;;  %v1789_v56 = vmul.f32 0.044715, %v5196_v22 }
 0x66f   : > { %v1862_v42 = vadd.f32 %v1837_v55, %v5177_v1  ;;  %v1849_v10 = vadd.f32 %v1824_v4, %v5180_v41  ;;  %v1863_v28 = vadd.f32 %v1838_v5, %v5183_v39  ;;  %v1825_v0 = vmul.f32 %v1800_v52, %v5189_v15  ;;  %v5242_v55 = vpop.f32.mrb[50].mxu1 }
 0x670   : > { %v1872_v24 = vmul.f32 0.7978846, %v1847_v45  ;;  %v1886_v3 = vmul.f32 0.7978846, %v1861_v53  ;;  %v1873_v7 = vmul.f32 0.7978846, %v1848_v16  ;;  %v1814_v33 = vmul.f32 %v1789_v56, %v5196_v22 }
 0x671   : > { %v1887_v8 = vmul.f32 0.7978846, %v1862_v42  ;;  %v1874_v54 = vmul.f32 0.7978846, %v1849_v10  ;;  %v1888_v44 = vmul.f32 0.7978846, %v1863_v28  ;;  %v1850_v58 = vadd.f32 %v1825_v0, %v5189_v15 }
 0x672   : > { %3526 = vtanh.f32 %v1872_v24  ;;  %v1678_v20 = vmul.f32 %v5136_v43, %v4898_v21  ;;  %v1839_v60 = vmul.f32 %v1814_v33, %v5196_v22  ;;  %v1695_v17 = vmul.f32 %v5141_v61, %v1664_v12  ;;  %v5248_v45 = vpop.f32.mrb[52].mxu0  ;;  %v2410_v42 = vpop.f32.mrb[51].mxu1 }
 0x673   : > { %3528 = vtanh.f32 %v1886_v3  ;;  %v1665_v19 = vmul.f32 %v5136_v43, %v4820_v32  ;;  %v1875_v27 = vmul.f32 0.7978846, %v1850_v58  ;;  %v1679_v23 = vmul.f32 %v5136_v43, %v4904_v49 }
 0x674   : > { %3530 = vtanh.f32 %v1873_v7  ;;  %v1709_v48 = vmul.f32 %v5141_v61, %v1678_v20  ;;  %v1864_v21 = vadd.f32 %v1839_v60, %v5196_v22  ;;  %v5233_v18 = vadd.f32 %v5154_v51, %v1695_v17  ;;  %v5272_v7 = vpop.f32.mrb[52].mxu1 }
 0x675   : > { %3532 = vtanh.f32 %v1887_v8  ;;  %v1696_v38 = vmul.f32 %v5141_v61, %v1665_v19  ;;  %v1710_v25 = vmul.f32 %v5141_v61, %v1679_v23  ;;  %v1666_v46 = vmul.f32 %v5136_v43, %v4826_v26 }
 0x676   : > { %3534 = vtanh.f32 %v1874_v54  ;;  %v5237_v32 = vadd.f32 %v5154_v51, %v1709_v48  ;;  %v5245_v49 = vmul.f32 0.5, %v5174_v34  ;;  %v1889_v40 = vmul.f32 0.7978846, %v1864_v21  ;;  %v2225_v34 = vpop.f32.mrb[53].mxu0 }
 0x677   : > { %3536 = vtanh.f32 %v1888_v44  ;;  %v1776_v13 = vmul.f32 0.044715, %v5233_v18  ;;  %v5251_v53 = vmul.f32 0.5, %v5177_v1  ;;  %v5255_v16 = vadd.f32 %v5154_v51, %v1696_v38  ;;  %v5282_v54 = vpop.f32.mrb[54].mxu0 }
 0x678   : > { %3538 = vtanh.f32 %v1875_v27  ;;  %v1790_v4 = vmul.f32 0.044715, %v5237_v32  ;;  %v5258_v26 = vadd.f32 %v5154_v51, %v1710_v25  ;;  %v1697_v52 = vmul.f32 %v5141_v61, %v1666_v46 }
 0x679   : > { %3540 = vtanh.f32 %v1889_v40  ;;  %v1801_v5 = vmul.f32 %v1776_v13, %v5233_v18  ;;  %v1680_v24 = vmul.f32 %v5136_v43, %v4910_v29  ;;  %v5265_v1 = vmul.f32 0.5, %v5180_v41 }
 0x67a   : > { %v5268_v3 = vmul.f32 0.5, %v5183_v39  ;;  %v1815_v10 = vmul.f32 %v1790_v4, %v5237_v32  ;;  %v1777_v56 = vmul.f32 0.044715, %v5255_v16  ;;  %v5275_v28 = vmul.f32 0.5, %v5189_v15  ;;  %v2415_v39 = vpop.f32.mrb[53].mxu1  ;;  %v2230_v15 = vpop.f32.mrb[55].mxu0 }
 0x67b   : > { %v5278_v0 = vmul.f32 0.5, %v5196_v22  ;;  %v1826_v29 = vmul.f32 %v1801_v5, %v5233_v18  ;;  %v1791_v41 = vmul.f32 0.044715, %v5258_v26  ;;  %v5287_v20 = vadd.f32 %v5154_v51, %v1697_v52  ;;  %v5295_v25 = vpop.f32.mrb[54].mxu1  ;;  %v5299_v34 = vpop.f32.mrb[56].mxu0 }
 0x67c   : > { %v3527_v8 = vpop.eup %3526  ;;  %v1840_v44 = vmul.f32 %v1815_v10, %v5237_v32  ;;  %v1802_v58 = vmul.f32 %v1777_v56, %v5255_v16  ;;  %v1711_v27 = vmul.f32 %v5141_v61, %v1680_v24  ;;  %v2420_v5 = vpop.f32.mrb[55].mxu1  ;;  %v1667_v56 = vmul.f32 %v5136_v43, %v4832_v50 }
 0x67d   : > { %v3529_v33 = vpop.eup %3528  ;;  %v1922_v12 = vadd.f32 1.0, %v3527_v8  ;;  %v1851_v17 = vadd.f32 %v1826_v29, %v5233_v18  ;;  %v1816_v19 = vmul.f32 %v1791_v41, %v5258_v26  ;;  %v2235_v8 = vpop.f32.mrb[57].mxu0  ;;  %v5307_v41 = vmul.f32 0.5, %v5233_v18 }
 0x67e   : > { %v3531_v60 = vpop.eup %3530  ;;  %v1936_v22 = vadd.f32 1.0, %v3529_v33  ;;  %v1865_v21 = vadd.f32 %v1840_v44, %v5237_v32  ;;  %v1827_v38 = vmul.f32 %v1802_v58, %v5255_v16  ;;  %v5314_v50 = vmul.f32 0.5, %v5237_v32  ;;  %v5316_v44 = vpop.f32.mrb[56].mxu1 }
 0x67f   : > { %v3533_v48 = vpop.eup %3532  ;;  %v1947_v23 = vmul.f32 %v1922_v12, %v5198_v35  ;;  %v1923_v62 = vadd.f32 1.0, %v3531_v60  ;;  %v1876_v4 = vmul.f32 0.7978846, %v1851_v17  ;;  %v1841_v42 = vmul.f32 %v1816_v19, %v5258_v26  ;;  %v5323_v17 = vpop.f32.mrb[58].mxu0 }
 0x680   : > { %v3535_v46 = vpop.eup %3534  ;;  %v1961_v40 = vmul.f32 %v1936_v22, %v5205_v59  ;;  %v1937_v13 = vadd.f32 1.0, %v3533_v48  ;;  %v1890_v24 = vmul.f32 0.7978846, %v1865_v21  ;;  %v1852_v10 = vadd.f32 %v1827_v38, %v5255_v16  ;;  %v2425_v19 = vpop.f32.mrb[57].mxu1 }
 0x681   : > { %v3537_v52 = vpop.eup %3536  ;;  %3223 = vmatmul.mubr.f32.vlgmr.msra.gmra.mrb[100].mxu0 %v1947_v23  ;;  %v1924_v35 = vadd.f32 1.0, %v3535_v46  ;;  %3542 = vtanh.f32 %v1876_v4  ;;  %v1866_v39 = vadd.f32 %v1841_v42, %v5258_v26  ;;  %v1948_v33 = vmul.f32 %v1923_v62, %v5245_v49  ;;  %v2240_v23 = vpop.f32.mrb[59].mxu0 }
 0x682   : > { %v3539_v29 = vpop.eup %3538  ;;  %3265 = vmatmul.mubr.f32.vlgmr.msra.gmra.mrb[100].mxu1 %v1961_v40  ;;  %3225 = vmatprep.mubr.msk.f32.mxu0 %vm3585_vm0, %v3586_v6  ;;  %v1938_v59 = vadd.f32 1.0, %v3537_v52  ;;  %3544 = vtanh.f32 %v1890_v24  ;;  %v1877_v12 = vmul.f32 0.7978846, %v1852_v10  ;;  %v1962_v15 = vmul.f32 %v1937_v13, %v5251_v53  ;;  %v5341_v40 = vpop.f32.mrb[58].mxu1 }
 0x683   : > { %3267 = vmatprep.mubr.msk.f32.mxu1 %vm3585_vm0, %v3586_v6  ;;  %v3541_v58 = vpop.eup %3540  ;;  %v1891_v18 = vmul.f32 0.7978846, %v1866_v39  ;;  %v1778_v60 = vmul.f32 0.044715, %v5287_v20  ;;  %v5321_v22 = vadd.f32 %v5154_v51, %v1711_v27  ;;  %v1949_v32 = vmul.f32 %v1924_v35, %v5265_v1  ;;  %v5349_v5 = vpop.f32.mrb[60].mxu0 }
 0x684   : > { %v1925_v49 = vadd.f32 1.0, %v3539_v29  ;;  %3546 = vtanh.f32 %v1877_v12  ;;  %v1698_v48 = vmul.f32 %v5141_v61, %v1667_v56  ;;  %v1963_v53 = vmul.f32 %v1938_v59, %v5268_v3  ;;  %v2430_v52 = vpop.f32.mrb[59].mxu1  ;;  %v2245_v10 = vpop.f32.mrb[61].mxu0 }
 0x685   : > { %3226 = vmatmul.mubr.f32.gmra.mrb[102].mxu0 %v1948_v33  ;;  %3548 = vtanh.f32 %v1891_v18  ;;  %v1803_v27 = vmul.f32 %v1778_v60, %v5287_v20  ;;  %v1792_v62 = vmul.f32 0.044715, %v5321_v22  ;;  %v1939_v1 = vadd.f32 1.0, %v3541_v58  ;;  %v5378_v60 = vpop.f32.mrb[62].mxu0 }
 0x686   : > { %3268 = vmatmul.mubr.f32.gmra.mrb[102].mxu1 %v1962_v15  ;;  %3228 = vmatprep.mubr.msk.f32.mxu0 %vm3585_vm0, %v3586_v6  ;;  %v5335_v21 = vadd.f32 %v5154_v51, %v1698_v48  ;;  %v1681_v38 = vmul.f32 %v5136_v43, %v4916_v37  ;;  %v1668_v46 = vmul.f32 %v5136_v43, %v4838_v47  ;;  %v5352_v37 = vmul.f32 0.5, %v5255_v16 }
 0x687   : > { %3270 = vmatprep.mubr.msk.f32.mxu1 %vm3585_vm0, %v3586_v6  ;;  %v1828_v3 = vmul.f32 %v1803_v27, %v5287_v20  ;;  %v1817_v13 = vmul.f32 %v1792_v62, %v5321_v22  ;;  %v1682_v4 = vmul.f32 %v5136_v43, %v4922_v11  ;;  %v1669_v42 = vmul.f32 %v5136_v43, %v4844_v14 }
 0x688   : > { %v1779_v47 = vmul.f32 0.044715, %v5335_v21  ;;  %v1712_v35 = vmul.f32 %v5141_v61, %v1681_v38  ;;  %v1699_v24 = vmul.f32 %v5141_v61, %v1668_v46  ;;  %v1766_v14 = vmul.f32 0.5, %v5258_v26  ;;  %v5373_v26 = vpop.f32.mrb[60].mxu1 }
 0x689   : > { %3229 = vmatmul.mubr.f32.gmra.mrb[104].mxu0 %v1949_v32  ;;  %v1853_v11 = vadd.f32 %v1828_v3, %v5287_v20  ;;  %v1842_v56 = vmul.f32 %v1817_v13, %v5321_v22  ;;  %v1713_v16 = vmul.f32 %v5141_v61, %v1682_v4  ;;  %v1950_v8 = vmul.f32 %v1925_v49, %v5275_v28  ;;  %v2435_v28 = vpop.f32.mrb[61].mxu1 }
 0x68a   : > { %3271 = vmatmul.mubr.f32.gmra.mrb[104].mxu1 %v1963_v53  ;;  %3231 = vmatprep.mubr.msk.f32.mxu0 %vm3585_vm0, %v3586_v6  ;;  %v1804_v29 = vmul.f32 %v1779_v47, %v5335_v21  ;;  %v5368_v59 = vadd.f32 %v5154_v51, %v1712_v35  ;;  %v5371_v39 = vadd.f32 %v5154_v51, %v1699_v24  ;;  %v2250_v53 = vpop.f32.mrb[63].mxu0  ;;  %v5395_v4 = vpop.f32.mrb[62].mxu1 }
 0x68b   : > { %3273 = vmatprep.mubr.msk.f32.mxu1 %vm3585_vm0, %v3586_v6  ;;  %v3543_v33 = vpop.eup %3542  ;;  %v1964_v12 = vmul.f32 %v1939_v1, %v5278_v0  ;;  %v1878_v58 = vmul.f32 0.7978846, %v1853_v11  ;;  %v1867_v15 = vadd.f32 %v1842_v56, %v5321_v22  ;;  %v1700_v18 = vmul.f32 %v5141_v61, %v1669_v42  ;;  %v5401_v35 = vpop.f32.mrb[64].mxu0 }
 0x68c   : > { %v3545_v19 = vpop.eup %3544  ;;  %v1926_v32 = vadd.f32 1.0, %v3543_v33  ;;  %v1829_v49 = vmul.f32 %v1804_v29, %v5335_v21  ;;  %v1793_v48 = vmul.f32 0.044715, %v5368_v59  ;;  %v5383_v23 = vadd.f32 %v5154_v51, %v1713_v16  ;;  %v2440_v24 = vpop.f32.mrb[63].mxu1 }
 0x68d   : > { %3232 = vmatmul.mubr.f32.gmra.mrb[106].mxu0 %v1950_v8  ;;  %v1940_v0 = vadd.f32 1.0, %v3545_v19  ;;  %3550 = vtanh.f32 %v1878_v58  ;;  %v1892_v27 = vmul.f32 0.7978846, %v1867_v15  ;;  %v1683_v62 = vmul.f32 %v5136_v43, %v4932_v31  ;;  %v2255_v16 = vpop.f32.mrb[65].mxu0  ;;  %v5420_v15 = vpop.f32.mrb[64].mxu1 }
 0x68e   : > { %3274 = vmatmul.mubr.f32.gmra.mrb[106].mxu1 %v1964_v12  ;;  %3234 = vmatprep.mubr.msk.f32.mxu0 %vm3585_vm0, %v3586_v6  ;;  %v3547_v1 = vpop.eup %3546  ;;  %v1951_v38 = vmul.f32 %v1926_v32, %v5307_v41  ;;  %v1854_v46 = vadd.f32 %v1829_v49, %v5335_v21  ;;  %v1818_v3 = vmul.f32 %v1793_v48, %v5368_v59  ;;  %v1780_v13 = vmul.f32 0.044715, %v5371_v39  ;;  %v5427_v32 = vpop.f32.mrb[66].mxu0 }
 0x68f   : > { %3276 = vmatprep.mubr.msk.f32.mxu1 %vm3585_vm0, %v3586_v6  ;;  %v3549_v42 = vpop.eup %3548  ;;  %v1965_v52 = vmul.f32 %v1940_v0, %v5314_v50  ;;  %v1927_v47 = vadd.f32 1.0, %v3547_v1  ;;  %v5399_v31 = vmul.f32 0.5, %v5287_v20  ;;  %3552 = vtanh.f32 %v1892_v27  ;;  %v2445_v49 = vpop.f32.mrb[65].mxu1 }
 0x690   : > { %v1941_v41 = vadd.f32 1.0, %v3549_v42  ;;  %v1879_v10 = vmul.f32 0.7978846, %v1854_v46  ;;  %v1843_v11 = vmul.f32 %v1818_v3, %v5368_v59  ;;  %v1805_v56 = vmul.f32 %v1780_v13, %v5371_v39  ;;  %v2260_v0 = vpop.f32.mrb[67].mxu0  ;;  %v5444_v3 = vpop.f32.mrb[66].mxu1 }
 0x691   : > { %3235 = vmatmul.mubr.f32.gmra.mrb[108].mxu0 %v1951_v38  ;;  %v5408_v50 = vmul.f32 0.5, %v5321_v22  ;;  %v1794_v20 = vmul.f32 0.044715, %v5383_v23  ;;  %v5412_v8 = vadd.f32 %v5154_v51, %v1700_v18  ;;  %v1714_v29 = vmul.f32 %v5141_v61, %v1683_v62  ;;  %v5451_v24 = vpop.f32.mrb[68].mxu0 }
 0x692   : > { %3277 = vmatmul.mubr.f32.gmra.mrb[108].mxu1 %v1965_v52  ;;  %3237 = vmatprep.mubr.msk.f32.mxu0 %vm3585_vm0, %v3586_v6  ;;  %v1952_v33 = vmul.f32 %v1927_v47, %v5352_v37  ;;  %3554 = vtanh.f32 %v1879_v10  ;;  %v1868_v12 = vadd.f32 %v1843_v11, %v5368_v59  ;;  %v1830_v58 = vmul.f32 %v1805_v56, %v5371_v39  ;;  %v2265_v16 = vpop.f32.mrb[69].mxu0 }
 0x693   : > { %3279 = vmatprep.mubr.msk.f32.mxu1 %vm3585_vm0, %v3586_v6  ;;  %v1966_v22 = vmul.f32 %v1941_v41, %v1766_v14  ;;  %v1819_v28 = vmul.f32 %v1794_v20, %v5383_v23  ;;  %v1781_v18 = vmul.f32 0.044715, %v5412_v8  ;;  %v5425_v19 = vadd.f32 %v5154_v51, %v1714_v29  ;;  %v2450_v41 = vpop.f32.mrb[67].mxu1 }
 0x694   : > { %v1893_v37 = vmul.f32 0.7978846, %v1868_v12  ;;  %v1855_v48 = vadd.f32 %v1830_v58, %v5371_v39  ;;  %v1670_v53 = vmul.f32 %v5136_v43, %v4850_v57  ;;  %v1684_v14 = vmul.f32 %v5136_v43, %v4928_v36  ;;  %v5465_v49 = vpop.f32.mrb[68].mxu1 }
 0x695   : > { %3238 = vmatmul.mubr.f32.gmra.mrb[110].mxu0 %v1952_v33  ;;  %v1754_v27 = vmul.f32 0.5, %v5335_v21  ;;  %v1844_v62 = vmul.f32 %v1819_v28, %v5383_v23  ;;  %v1806_v1 = vmul.f32 %v1781_v18, %v5412_v8  ;;  %v1795_v38 = vmul.f32 0.044715, %v5425_v19  ;;  %v2455_v0 = vpop.f32.mrb[69].mxu1 }
 0x696   : > { %3280 = vmatmul.mubr.f32.gmra.mrb[110].mxu1 %v1966_v22  ;;  %3240 = vmatprep.mubr.msk.f32.mxu0 %vm3585_vm0, %v3586_v6  ;;  %3556 = vtanh.f32 %v1893_v37  ;;  %v1880_v57 = vmul.f32 0.7978846, %v1855_v48  ;;  %v1701_v36 = vmul.f32 %v5141_v61, %v1670_v53  ;;  %v1715_v46 = vmul.f32 %v5141_v61, %v1684_v14  ;;  %v5469_v14 = vpop.f32.mrb[70].mxu0 }
 0x697   : > { %3282 = vmatprep.mubr.msk.f32.mxu1 %vm3585_vm0, %v3586_v6  ;;  %v3551_v13 = vpop.eup %3550  ;;  %v1869_v21 = vadd.f32 %v1844_v62, %v5383_v23  ;;  %v1831_v42 = vmul.f32 %v1806_v1, %v5412_v8  ;;  %v1820_v52 = vmul.f32 %v1795_v38, %v5425_v19  ;;  %v1671_v47 = vmul.f32 %v5136_v43, %v4856_v63 }
 0x698   : > { %v1928_v10 = vadd.f32 1.0, %v3551_v13  ;;  %3558 = vtanh.f32 %v1880_v57  ;;  %v5454_v11 = vadd.f32 %v5154_v51, %v1701_v36  ;;  %v5457_v56 = vadd.f32 %v5154_v51, %v1715_v46  ;;  %v2270_v57 = vpop.f32.mrb[71].mxu0 }
 0x699   : > { %v3553_v20 = vpop.eup %3552  ;;  %v1894_v29 = vmul.f32 0.7978846, %v1869_v21  ;;  %v1856_v33 = vadd.f32 %v1831_v42, %v5412_v8  ;;  %v1845_v12 = vmul.f32 %v1820_v52, %v5425_v19  ;;  %v1702_v63 = vmul.f32 %v5141_v61, %v1671_v47  ;;  %v5485_v52 = vpop.f32.mrb[70].mxu1 }
 0x69a   : > { %v1953_v58 = vmul.f32 %v1928_v10, %v5399_v31  ;;  %v1942_v22 = vadd.f32 1.0, %v3553_v20  ;;  %v1768_v28 = vmul.f32 0.5, %v5368_v59  ;;  %v1782_v18 = vmul.f32 0.044715, %v5454_v11  ;;  %v5492_v10 = vpop.f32.mrb[72].mxu0 }
 0x69b   : > { %v1755_v37 = vmul.f32 0.5, %v5371_v39  ;;  %3560 = vtanh.f32 %v1894_v29  ;;  %v1881_v48 = vmul.f32 0.7978846, %v1856_v33  ;;  %v1870_v53 = vadd.f32 %v1845_v12, %v5425_v19 }
 0x69c   : > { %v3555_v62 = vpop.eup %3554  ;;  %3241 = vmatmul.mubr.f32.gmra.mrb[112].mxu0 %v1953_v58  ;;  %v1967_v31 = vmul.f32 %v1942_v22, %v5408_v50  ;;  %v1807_v1 = vmul.f32 %v1782_v18, %v5454_v11  ;;  %v1796_v59 = vmul.f32 0.044715, %v5457_v56  ;;  %v5475_v38 = vadd.f32 %v5154_v51, %v1702_v63 }
 0x69d   : > { %3243 = vmatprep.mubr.msk.f32.mxu0 %vm3585_vm0, %v3586_v6  ;;  %v1929_v39 = vadd.f32 1.0, %v3555_v62  ;;  %3562 = vtanh.f32 %v1881_v48  ;;  %v1895_v36 = vmul.f32 0.7978846, %v1870_v53  ;;  %v1672_v46 = vmul.f32 %v5136_v43, %v4862_v9 }
 0x69e   : > { %3283 = vmatmul.mubr.f32.gmra.mrb[112].mxu1 %v1967_v31  ;;  %v1769_v50 = vmul.f32 0.5, %v5383_v23  ;;  %v1832_v13 = vmul.f32 %v1807_v1, %v5454_v11  ;;  %v1821_v21 = vmul.f32 %v1796_v59, %v5457_v56  ;;  %v1783_v42 = vmul.f32 0.044715, %v5475_v38  ;;  %v2460_v23 = vpop.f32.mrb[71].mxu1 }
 0x69f   : > { %3285 = vmatprep.mubr.msk.f32.mxu1 %vm3585_vm0, %v3586_v6  ;;  %v1954_v47 = vmul.f32 %v1929_v39, %v1754_v27  ;;  %3564 = vtanh.f32 %v1895_v36  ;;  %v1703_v41 = vmul.f32 %v5141_v61, %v1672_v46  ;;  %v1673_v9 = vmul.f32 %v5136_v43, %v4868_v2  ;;  %v2275_v27 = vpop.f32.mrb[73].mxu0  ;;  %v2463_v53 = vpop.f32.mrb[72].mxu1 }
 0x6a0   : > { %v3557_v16 = vpop.eup %3556  ;;  %v1857_v20 = vadd.f32 %v1832_v13, %v5454_v11  ;;  %v1846_v29 = vmul.f32 %v1821_v21, %v5457_v56  ;;  %v1808_v33 = vmul.f32 %v1783_v42, %v5475_v38  ;;  %v5499_v12 = vadd.f32 %v5242_v55, %v5226_v30  ;;  %v2465_v31 = vpop.f32.mrb[73].mxu1 }
 0x6a1   : > { %3244 = vmatmul.mubr.f32.gmra.mrb[114].mxu0 %v1954_v47  ;;  %v1943_v63 = vadd.f32 1.0, %v3557_v16  ;;  %v5502_v58 = vadd.f32 %v5154_v51, %v1703_v41  ;;  %v1704_v2 = vmul.f32 %v5141_v61, %v1673_v9  ;;  %v5507_v43 = vadd.f32 %v5272_v7, %v5248_v45  ;;  %v2278_v7 = vpop.f32.mrb[74].mxu0  ;;  %v2468_v21 = vpop.f32.mrb[74].mxu1 }
 0x6a2   : > { %v3559_v22 = vpop.eup %3558  ;;  %3246 = vmatprep.mubr.msk.f32.mxu0 %vm3585_vm0, %v3586_v6  ;;  %v1882_v18 = vmul.f32 0.7978846, %v1857_v20  ;;  %v1871_v30 = vadd.f32 %v1846_v29, %v5457_v56  ;;  %v1833_v55 = vmul.f32 %v1808_v33, %v5475_v38  ;;  %v5515_v48 = vadd.f32 %v5295_v25, %v5282_v54  ;;  %v2280_v39 = vpop.f32.mrb[75].mxu0 }
 0x6a3   : > { %v1968_v0 = vmul.f32 %v1943_v63, %v1768_v28  ;;  %v1930_v61 = vadd.f32 1.0, %v3559_v22  ;;  %v1756_v62 = vmul.f32 0.5, %v5412_v8  ;;  %v1784_v45 = vmul.f32 0.044715, %v5502_v58  ;;  %v2470_v47 = vpop.f32.mrb[75].mxu1 }
 0x6a4   : > { %3566 = vtanh.f32 %v1882_v18  ;;  %v1896_v1 = vmul.f32 0.7978846, %v1871_v30  ;;  %v1858_v59 = vadd.f32 %v1833_v55, %v5475_v38  ;;  %v5521_v57 = vadd.f32 %v5154_v51, %v1704_v2  ;;  %v2473_v29 = vpop.f32.mrb[76].mxu1 }
 0x6a5   : > { %v3561_v36 = vpop.eup %3560  ;;  %3286 = vmatmul.mubr.f32.gmra.mrb[114].mxu1 %v1968_v0  ;;  %v1955_v54 = vmul.f32 %v1930_v61, %v1755_v37  ;;  %v1809_v25 = vmul.f32 %v1784_v45, %v5502_v58  ;;  %v5526_v8 = vadd.f32 %v5316_v44, %v5299_v34  ;;  %v5530_v28 = vadd.f32 %v5341_v40, %v5323_v17  ;;  %v2283_v40 = vpop.f32.mrb[76].mxu0 }
 0x6a6   : > { %3288 = vmatprep.mubr.msk.f32.mxu1 %vm3585_vm0, %v3586_v6  ;;  %v1944_v46 = vadd.f32 1.0, %v3561_v36  ;;  %v1770_v51 = vmul.f32 0.5, %v5425_v19  ;;  %3568 = vtanh.f32 %v1896_v1  ;;  %v1883_v13 = vmul.f32 0.7978846, %v1858_v59  ;;  %v2285_v23 = vpop.f32.mrb[77].mxu0  ;;  %v2475_v27 = vpop.f32.mrb[77].mxu1 }
 0x6a7   : > { %v3563_v37 = vpop.eup %3562  ;;  %3247 = vmatmul.mubr.f32.gmra.mrb[116].mxu0 %v1955_v54  ;;  %v1834_v42 = vmul.f32 %v1809_v25, %v5502_v58  ;;  %v1785_v34 = vmul.f32 0.044715, %v5521_v57  ;;  %v5539_v44 = vadd.f32 %v5373_v26, %v5349_v5  ;;  %v5543_v17 = vadd.f32 %v5395_v4, %v5378_v60  ;;  %v2478_v2 = vpop.f32.mrb[78].mxu1 }
 0x6a8   : > { %v1969_v19 = vmul.f32 %v1944_v46, %v1769_v50  ;;  %3249 = vmatprep.mubr.msk.f32.mxu0 %vm3585_vm0, %v3586_v6  ;;  %v1931_v41 = vadd.f32 1.0, %v3563_v37  ;;  %3570 = vtanh.f32 %v1883_v13  ;;  %v5549_v9 = vadd.f32 %v5420_v15, %v5401_v35  ;;  %v2480_v0 = vpop.f32.mrb[79].mxu1 }
 0x6a9   : > { %v3565_v16 = vpop.eup %3564  ;;  %v1859_v5 = vadd.f32 %v1834_v42, %v5502_v58  ;;  %v1810_v26 = vmul.f32 %v1785_v34, %v5521_v57  ;;  %v5555_v60 = vadd.f32 %v5444_v3, %v5427_v32  ;;  %v5559_v4 = vadd.f32 %v5465_v49, %v5451_v24  ;;  %v2288_v49 = vpop.f32.mrb[78].mxu0 }
 0x6aa   : > { %3289 = vmatmul.mubr.f32.gmra.mrb[116].mxu1 %v1969_v19  ;;  %v1956_v50 = vmul.f32 %v1931_v41, %v1756_v62  ;;  %v1945_v20 = vadd.f32 1.0, %v3565_v16  ;;  %v5563_v35 = vadd.f32 %v5485_v52, %v5469_v14  ;;  %v5566_v15 = vadd.f32 %v2463_v53, %v5492_v10  ;;  %v2290_v14 = vpop.f32.mrb[79].mxu0  ;;  %v2483_v59 = vpop.f32.mrb[80].mxu1 }
 0x6ab   : > { %3291 = vmatprep.mubr.msk.f32.mxu1 %vm3585_vm0, %v3586_v6  ;;  %v1884_v32 = vmul.f32 0.7978846, %v1859_v5  ;;  %v1835_v3 = vmul.f32 %v1810_v26, %v5521_v57  ;;  %v5571_v33 = vadd.f32 %v2468_v21, %v2278_v7  ;;  %v5573_v24 = vadd.f32 %v2473_v29, %v2283_v40  ;;  %v2293_v53 = vpop.f32.mrb[80].mxu0  ;;  %v2485_v46 = vpop.f32.mrb[81].mxu1 }
 0x6ac   : > { %3250 = vmatmul.mubr.f32.gmra.mrb[118].mxu0 %v1956_v50  ;;  %v1970_v63 = vmul.f32 %v1945_v20, %v1770_v51  ;;  %v1757_v22 = vmul.f32 0.5, %v5454_v11  ;;  %v5581_v55 = vadd.f32 %v2478_v2, %v2288_v49  ;;  %v2295_v62 = vpop.f32.mrb[81].mxu0  ;;  %v1771_v7 = vmul.f32 0.5, %v5457_v56  ;;  %v2488_v56 = vpop.f32.mrb[82].mxu1 }
 0x6ad   : > { %3252 = vmatprep.mubr.msk.f32.mxu0 %vm3585_vm0, %v3586_v6  ;;  %3572 = vtanh.f32 %v1884_v32  ;;  %v1860_v52 = vadd.f32 %v1835_v3, %v5521_v57  ;;  %v1758_v36 = vmul.f32 0.5, %v5475_v38  ;;  %v5585_v54 = vadd.f32 %v2483_v59, %v2293_v53  ;;  %v2298_v25 = vpop.f32.mrb[82].mxu0  ;;  %v2490_v34 = vpop.f32.mrb[83].mxu1 }
 0x6ae   : > { %v3567_v10 = vpop.eup %3566  ;;  %3292 = vmatmul.mubr.f32.gmra.mrb[118].mxu1 %v1970_v63  ;;  %v2300_v51 = vpop.f32.mrb[83].mxu0  ;;  %v5589_v37 = vadd.f32 %v2488_v56, %v2298_v25  ;;  %v1759_v38 = vmul.f32 0.5, %v5502_v58  ;;  %v1760_v50 = vmul.f32 0.5, %v5521_v57 }
 0x6af   : > { %3294 = vmatprep.mubr.msk.f32.mxu1 %vm3585_vm0, %v3586_v6  ;;  %v1932_v18 = vadd.f32 1.0, %v3567_v10  ;;  %v1885_v30 = vmul.f32 0.7978846, %v1860_v52  ;;  %v2303_v42 = vpop.f32.mrb[84].mxu0  ;;  %v2493_v41 = vpop.f32.mrb[84].mxu1 }
 0x6b0   : > { %v3569_v61 = vpop.eup %3568  ;;  %v2305_v47 = vpop.f32.mrb[85].mxu0  ;;  %v5594_v16 = vadd.f32 %v2493_v41, %v2303_v42 }
 0x6b1   : > { %v1957_v45 = vmul.f32 %v1932_v18, %v1757_v22  ;;  %v1946_v31 = vadd.f32 1.0, %v3569_v61  ;;  %3574 = vtanh.f32 %v1885_v30  ;;  %v2308_v5 = vpop.f32.mrb[86].mxu0  ;;  %v2495_v26 = vpop.f32.mrb[85].mxu1 }
 0x6b2   : > { %v3571_v1 = vpop.eup %3570  ;;  %v2310_v29 = vpop.f32.mrb[87].mxu0 }
 0x6b3   : > { %3253 = vmatmul.mubr.f32.gmra.mrb[120].mxu0 %v1957_v45  ;;  %v1971_v39 = vmul.f32 %v1946_v31, %v1771_v7  ;;  %v1933_v11 = vadd.f32 1.0, %v3571_v1  ;;  %v2498_v3 = vpop.f32.mrb[86].mxu1  ;;  %v2313_v49 = vpop.f32.mrb[88].mxu0 }
 0x6b4   : > { %3255 = vmatprep.mubr.msk.f32.mxu0 %vm3585_vm0, %v3586_v6  ;;  %v5599_v58 = vadd.f32 %v2498_v3, %v2308_v5  ;;  %v2500_v27 = vpop.f32.mrb[87].mxu1  ;;  %v2315_v63 = vpop.f32.mrb[89].mxu0 }
 0x6b5   : > { %3295 = vmatmul.mubr.f32.gmra.mrb[120].mxu1 %v1971_v39  ;;  %v1958_v13 = vmul.f32 %v1933_v11, %v1758_v36  ;;  %v2503_v14 = vpop.f32.mrb[88].mxu1  ;;  %v2318_v10 = vpop.f32.mrb[90].mxu0 }
 0x6b6   : > { %v5601_v52 = vadd.f32 %v2503_v14, %v2313_v49  ;;  %v2505_v2 = vpop.f32.mrb[89].mxu1  ;;  %v2320_v22 = vpop.f32.mrb[91].mxu0 }
 0x6b7   : > { %v3573_v21 = vpop.eup %3572  ;;  %3256 = vmatmul.mubr.f32.gmra.mrb[122].mxu0 %v1958_v13  ;;  %v2508_v57 = vpop.f32.mrb[90].mxu1 }
 0x6b8   : > { %3258 = vmatprep.mubr.msk.f32.mxu0 %vm3585_vm0, %v3586_v6  ;;  %v1934_v40 = vadd.f32 1.0, %v3573_v21  ;;  %v5603_v18 = vadd.f32 %v2508_v57, %v2318_v10  ;;  %v2323_v30 = vpop.f32.mrb[92].mxu0  ;;  %v2510_v53 = vpop.f32.mrb[91].mxu1 }
 0x6b9   : > { %v2513_v0 = vpop.f32.mrb[92].mxu1 }
 0x6ba   : > { %v1959_v19 = vmul.f32 %v1934_v40, %v1759_v38  ;;  %v5605_v61 = vadd.f32 %v2513_v0, %v2323_v30  ;;  %v2515_v45 = vpop.f32.mrb[93].mxu1  ;;  %v5616_v38 = vld [vmem:[%s5740_s12] ss:$0 sm:$0xff] }
 0x6bb   : > { %v3575_v23 = vpop.eup %3574  ;;  %v2518_v31 = vpop.f32.mrb[94].mxu1 }
 0x6bc   : > { %3259 = vmatmul.mubr.f32.gmra.mrb[124].mxu0 %v1959_v19  ;;  %v1935_v20 = vadd.f32 1.0, %v3575_v23  ;;  %v2520_v39 = vpop.f32.mrb[95].mxu1 }
 0x6bd   : > { %3261 = vmatprep.mubr.msk.f32.mxu0 %vm3585_vm0, %v3586_v6  ;;  %v2325_v6 = vpop.f32.mrb[93].mxu0  ;;  %v2523_v11 = vpop.f32.mrb[96].mxu1 }
 0x6be   : > { %v1960_v32 = vmul.f32 %v1935_v20, %v1760_v50  ;;  %v2328_v62 = vpop.f32.mrb[94].mxu0  ;;  %v2525_v51 = vpop.f32.mrb[97].mxu1 }
 0x6bf   : > { %v2330_v7 = vpop.f32.mrb[95].mxu0  ;;  %v5607_v1 = vadd.f32 %v2518_v31, %v2328_v62  ;;  %v2528_v56 = vpop.f32.mrb[98].mxu1 }
 0x6c0   : > { %3262 = vmatmul.mubr.f32.gmra.mrb[126].mxu0 %v1960_v32  ;;  %v2333_v59 = vpop.f32.mrb[96].mxu0  ;;  %v2530_v42 = vpop.f32.mrb[99].mxu1 }
 0x6c1   : > { %v2335_v36 = vpop.f32.mrb[97].mxu0  ;;  %v5609_v25 = vadd.f32 %v2523_v11, %v2333_v59 }
 0x6c2   : > { %v2338_v46 = vpop.f32.mrb[98].mxu0 }
 0x6c3   : > { %v2340_v13 = vpop.f32.mrb[99].mxu0  ;;  %v5611_v21 = vadd.f32 %v2528_v56, %v2338_v46 }
 0x754   : > { %v2598_v34 = vpop.f32.mrb[100].mxu0 }
 0x755   : > { %v2599_v40 = vadd.f32 %v2598_v34, %v5499_v12  ;;  %v2668_v47 = vpop.f32.mrb[100].mxu1  ;;  %v3224_v19 = vpop.f32.mrb[101].mxu0 }
 0x756   : > { %v2669_v41 = vadd.f32 %v2668_v47, %v5581_v55  ;;  %v3266_v23 = vpop.f32.mrb[101].mxu1 }
 0x757   : > { %v2729_v5 = vadd.f32 %v5616_v38, %v2599_v40 }
 0x758   : > { %v2743_v26 = vadd.f32 %v5616_v38, %v2669_v41  ;;  %v2603_v12 = vpop.f32.mrb[102].mxu0 }
 0x759   : > { %2754 = vst.msk [vmem:[%s5624_s14] sm:$0xff] %vm765_vm2, %v2729_v5  ;;  %v2604_v50 = vadd.f32 %v2603_v12, %v5507_v43  ;;  %v2673_v20 = vpop.f32.mrb[102].mxu1  ;;  %v3227_v29 = vpop.f32.mrb[103].mxu0 }
 0x75a   : > { %2768 = vst.msk [vmem:[%s5624_s14 + $0x70] sm:$0xff] %vm765_vm2, %v2743_v26  ;;  %v2674_v32 = vadd.f32 %v2673_v20, %v5585_v54  ;;  %v3269_v3 = vpop.f32.mrb[103].mxu1 }
 0x75b   : > { %v2730_v55 = vadd.f32 %v5616_v38, %v2604_v50 }
 0x75c   : > { %v2744_v49 = vadd.f32 %v5616_v38, %v2674_v32  ;;  %v2608_v27 = vpop.f32.mrb[104].mxu0 }
 0x75d   : > { %2755 = vst.msk [vmem:[%s5624_s14 + $0x8] sm:$0xff] %vm765_vm2, %v2730_v55  ;;  %v2609_v63 = vadd.f32 %v2608_v27, %v5515_v48  ;;  %v2678_v14 = vpop.f32.mrb[104].mxu1  ;;  %v3230_v43 = vpop.f32.mrb[105].mxu0 }
 0x75e   : > { %2769 = vst.msk [vmem:[%s5624_s14 + $0x78] sm:$0xff] %vm765_vm2, %v2744_v49  ;;  %v2679_v10 = vadd.f32 %v2678_v14, %v5589_v37  ;;  %v3272_v2 = vpop.f32.mrb[105].mxu1 }
 0x75f   : > { %v2731_v54 = vadd.f32 %v5616_v38, %v2609_v63 }
 0x760   : > { %v2745_v22 = vadd.f32 %v5616_v38, %v2679_v10  ;;  %v2613_v57 = vpop.f32.mrb[106].mxu0 }
 0x761   : > { %2756 = vst.msk [vmem:[%s5624_s14 + $0x10] sm:$0xff] %vm765_vm2, %v2731_v54  ;;  %v2614_v30 = vadd.f32 %v2613_v57, %v5526_v8  ;;  %v2683_v53 = vpop.f32.mrb[106].mxu1  ;;  %v3233_v48 = vpop.f32.mrb[107].mxu0 }
 0x762   : > { %2770 = vst.msk [vmem:[%s5624_s14 + $0x80] sm:$0xff] %vm765_vm2, %v2745_v22  ;;  %v2684_v6 = vadd.f32 %v2683_v53, %v5594_v16  ;;  %v3275_v0 = vpop.f32.mrb[107].mxu1 }
 0x763   : > { %v2732_v37 = vadd.f32 %v5616_v38, %v2614_v30 }
 0x764   : > { %v2746_v62 = vadd.f32 %v5616_v38, %v2684_v6  ;;  %v2618_v45 = vpop.f32.mrb[108].mxu0 }
 0x765   : > { %2757 = vst.msk [vmem:[%s5624_s14 + $0x18] sm:$0xff] %vm765_vm2, %v2732_v37  ;;  %v2619_v7 = vadd.f32 %v2618_v45, %v5530_v28  ;;  %v2688_v31 = vpop.f32.mrb[108].mxu1  ;;  %v3236_v8 = vpop.f32.mrb[109].mxu0 }
 0x766   : > { %2771 = vst.msk [vmem:[%s5624_s14 + $0x88] sm:$0xff] %vm765_vm2, %v2746_v62  ;;  %v2689_v59 = vadd.f32 %v2688_v31, %v5599_v58  ;;  %v3278_v16 = vpop.f32.mrb[109].mxu1 }
 0x767   : > { %v2733_v39 = vadd.f32 %v5616_v38, %v2619_v7 }
 0x768   : > { %v2747_v36 = vadd.f32 %v5616_v38, %v2689_v59  ;;  %v2623_v11 = vpop.f32.mrb[110].mxu0 }
 0x769   : > { %2758 = vst.msk [vmem:[%s5624_s14 + $0x20] sm:$0xff] %vm765_vm2, %v2733_v39  ;;  %v2624_v46 = vadd.f32 %v2623_v11, %v5539_v44  ;;  %v2693_v51 = vpop.f32.mrb[110].mxu1  ;;  %v3239_v28 = vpop.f32.mrb[111].mxu0 }
 0x76a   : > { %2772 = vst.msk [vmem:[%s5624_s14 + $0x90] sm:$0xff] %vm765_vm2, %v2747_v36  ;;  %v2694_v13 = vadd.f32 %v2693_v51, %v5601_v52  ;;  %v3281_v56 = vpop.f32.mrb[111].mxu1 }
 0x76b   : > { %v2734_v58 = vadd.f32 %v5616_v38, %v2624_v46 }
 0x76c   : > { %v2748_v42 = vadd.f32 %v5616_v38, %v2694_v13 }
 0x76d   : > { %2759 = vst.msk [vmem:[%s5624_s14 + $0x28] sm:$0xff] %vm765_vm2, %v2734_v58 }
 0x76e   : > { %2773 = vst.msk [vmem:[%s5624_s14 + $0x98] sm:$0xff] %vm765_vm2, %v2748_v42 }
 0x76f   : > { %v2628_v34 = vpop.f32.mrb[112].mxu0 }
 0x770   : > { %v2629_v44 = vadd.f32 %v2628_v34, %v5543_v17  ;;  %v3242_v40 = vpop.f32.mrb[113].mxu0 }
 0x771   : > { %v2698_v47 = vpop.f32.mrb[112].mxu1 }
 0x772   : > { %v2735_v19 = vadd.f32 %v5616_v38, %v2629_v44  ;;  %v2699_v52 = vadd.f32 %v2698_v47, %v5603_v18  ;;  %v3284_v41 = vpop.f32.mrb[113].mxu1 }
 0x774   : > { %2760 = vst.msk [vmem:[%s5624_s14 + $0x30] sm:$0xff] %vm765_vm2, %v2735_v19  ;;  %v2749_v23 = vadd.f32 %v5616_v38, %v2699_v52  ;;  %v2633_v5 = vpop.f32.mrb[114].mxu0 }
 0x775   : > { %v2634_v26 = vadd.f32 %v2633_v5, %v5549_v9  ;;  %v3245_v12 = vpop.f32.mrb[115].mxu0 }
 0x776   : > { %2774 = vst.msk [vmem:[%s5624_s14 + $0xa0] sm:$0xff] %vm765_vm2, %v2749_v23 }
 0x777   : > { %v2736_v17 = vadd.f32 %v5616_v38, %v2634_v26 }
 0x778   : > { %v2703_v50 = vpop.f32.mrb[114].mxu1 }
 0x779   : > { %2761 = vst.msk [vmem:[%s5624_s14 + $0x38] sm:$0xff] %vm765_vm2, %v2736_v17  ;;  %v2704_v18 = vadd.f32 %v2703_v50, %v5605_v61  ;;  %v3287_v20 = vpop.f32.mrb[115].mxu1 }
 0x77a   : > { %v2638_v29 = vpop.f32.mrb[116].mxu0 }
 0x77b   : > { %v2750_v32 = vadd.f32 %v5616_v38, %v2704_v18  ;;  %v2639_v3 = vadd.f32 %v2638_v29, %v5555_v60  ;;  %v3248_v55 = vpop.f32.mrb[117].mxu0 }
 0x77d   : > { %2775 = vst.msk [vmem:[%s5624_s14 + $0xa8] sm:$0xff] %vm765_vm2, %v2750_v32  ;;  %v2737_v9 = vadd.f32 %v5616_v38, %v2639_v3  ;;  %v2708_v49 = vpop.f32.mrb[116].mxu1 }
 0x77e   : > { %v2709_v27 = vadd.f32 %v2708_v49, %v5607_v1  ;;  %v3290_v63 = vpop.f32.mrb[117].mxu1 }
 0x77f   : > { %2762 = vst.msk [vmem:[%s5624_s14 + $0x40] sm:$0xff] %vm765_vm2, %v2737_v9  ;;  %v2643_v61 = vpop.f32.mrb[118].mxu0 }
 0x780   : > { %v2751_v14 = vadd.f32 %v5616_v38, %v2709_v27  ;;  %v2644_v43 = vadd.f32 %v2643_v61, %v5559_v4  ;;  %v3251_v10 = vpop.f32.mrb[119].mxu0 }
 0x781   : > { %v2713_v60 = vpop.f32.mrb[118].mxu1 }
 0x782   : > { %2776 = vst.msk [vmem:[%s5624_s14 + $0xb0] sm:$0xff] %vm765_vm2, %v2751_v14  ;;  %v2738_v2 = vadd.f32 %v5616_v38, %v2644_v43  ;;  %v2714_v54 = vadd.f32 %v2713_v60, %v5609_v25  ;;  %v3293_v22 = vpop.f32.mrb[119].mxu1 }
 0x784   : > { %2763 = vst.msk [vmem:[%s5624_s14 + $0x48] sm:$0xff] %vm765_vm2, %v2738_v2  ;;  %v2752_v1 = vadd.f32 %v5616_v38, %v2714_v54 }
 0x786   : > { %2777 = vst.msk [vmem:[%s5624_s14 + $0xb8] sm:$0xff] %vm765_vm2, %v2752_v1  ;;  %v2648_v57 = vpop.f32.mrb[120].mxu0 }
 0x787   : > { %v2649_v4 = vadd.f32 %v2648_v57, %v5563_v35  ;;  %v3254_v30 = vpop.f32.mrb[121].mxu0 }
 0x788   : > { %v2718_v53 = vpop.f32.mrb[120].mxu1 }
 0x789   : > { %v2739_v48 = vadd.f32 %v5616_v38, %v2649_v4  ;;  %v2719_v6 = vadd.f32 %v2718_v53, %v5611_v21  ;;  %v3296_v25 = vpop.f32.mrb[121].mxu1 }
 0x78a   : > { %v2653_v0 = vpop.f32.mrb[122].mxu0 }
 0x78b   : > { %2764 = vst.msk [vmem:[%s5624_s14 + $0x50] sm:$0xff] %vm765_vm2, %v2739_v48  ;;  %v2753_v37 = vadd.f32 %v5616_v38, %v2719_v6  ;;  %v2654_v62 = vadd.f32 %v2653_v0, %v5566_v15  ;;  %v3257_v45 = vpop.f32.mrb[123].mxu0 }
 0x78d   : > { %2778 = vst.msk [vmem:[%s5624_s14 + $0xc0] sm:$0xf] %vm813_vm3, %v2753_v37  ;;  %v2740_v35 = vadd.f32 %v5616_v38, %v2654_v62 }
 0x78f   : > { %2765 = vst.msk [vmem:[%s5624_s14 + $0x58] sm:$0xff] %vm765_vm2, %v2740_v35  ;;  %v2658_v7 = vpop.f32.mrb[124].mxu0 }
 0x790   : > { %v2659_v31 = vadd.f32 %v2658_v7, %v5571_v33  ;;  %v3260_v21 = vpop.f32.mrb[125].mxu0 }
 0x792   : > { %v2741_v8 = vadd.f32 %v5616_v38, %v2659_v31 }
 0x793   : > { %v2663_v59 = vpop.f32.mrb[126].mxu0 }
 0x794   : > { %2766 = vst.msk [vmem:[%s5624_s14 + $0x60] sm:$0xff] %vm765_vm2, %v2741_v8  ;;  %v2664_v16 = vadd.f32 %v2663_v59, %v5573_v24  ;;  %v3263_v39 = vpop.f32.mrb[127].mxu0 }
 0x796   : > { %v2742_v15 = vadd.f32 %v5616_v38, %v2664_v16 }
 0x798   : > { %2767 = vst.msk [vmem:[%s5624_s14 + $0x68] sm:$0xff] %vm765_vm2, %v2742_v15 }
 0x799 PF: > { %s23_s25 = sadd.s32 1, %s3582_s25  }
 0x79a   : > { %p20_p4 = scmp.ge.s32.totalorder %s23_s25, 4  }
 0x79c   :  { %22 = sbr.rel (!%p20_p4) target bundleno = 1 (0x1), region = 105 }

</bundles_post_ra>
